<compile_context>
chip_gen: v7x
topology: tpu7x:2x2x1
jax: 0.10.0
libtpu: 0.0.40
codegen_flags: <defaults>
</compile_context>

<pallas_src>
import math
from functools import partial

import jax
import jax.numpy as jnp
from jax.experimental import pallas as pl
from jax.experimental.pallas import tpu as pltpu


# ---------------------------------------------------------------------------
# Fused forward kernel
# ---------------------------------------------------------------------------
def _fused_kernel(z_ref, label_ref, deck_ref, mask_ref,
                  w_z, w_lab, w_deck, b_in,
                  in_proj_w, in_proj_b, out_proj_w, out_proj_b,
                  ln1_g, ln1_b, ff1_w, ff1_b, ff2_w, ff2_b, ln2_g, ln2_b,
                  fc_out_w, fc_out_b, o_ref,
                  *, B, S, d_model, nhead, num_layers, num_label):
    N = B * S
    dh = d_model // nhead
    scale = 1.0 / math.sqrt(dh)
    cd = jnp.bfloat16  # MXU-native matmul input dtype; accumulation stays f32

    def mm(a, b):  # a @ b, both operands already bf16, f32 accumulate
        return jax.lax.dot_general(a, b, (((1,), (0,)), ((), ())),
                                   preferred_element_type=jnp.float32)

    def layernorm(x, g, b):
        mu = jnp.mean(x, axis=-1, keepdims=True)
        var = jnp.mean(x * x, axis=-1, keepdims=True) - mu * mu
        return (x - mu) * jax.lax.rsqrt(var + 1e-5) * g + b

    def heads(t):  # (S, d_model) -> (nhead, S, dh)
        return jnp.swapaxes(t.reshape(S, nhead, dh), 0, 1)

    # --- fused prologue: fc_z / emb_label / fc_deck / cat / fc_in / relu ----
    # (fc_z, emb, fc_deck are folded into fc_in's row blocks in the wrapper;
    #  the embedding gather is expressed as a one-hot matmul.)
    iota = jax.lax.broadcasted_iota(jnp.int32, (N, num_label), 1)
    onehot = (iota == label_ref[...]).astype(cd)                    # (N, num_label)
    x = (mm(z_ref[...], w_z[...]) + mm(onehot, w_lab[...])
         + mm(deck_ref[...], w_deck[...]) + b_in[...])               # (N, d_model) f32
    x = jnp.maximum(x, 0.0)
    x_bf = x.astype(cd)

    # additive key-padding bias built in-kernel from the (B, S) {0,1} mask
    bias = mask_ref[...] * jnp.float32(-1e9)                        # (B, S)

    # --- transformer encoder layers (statically unrolled) --------------------
    # TODO(synk): at production sizes (d_model=512, num_layers=4) stream the
    # stacked layer weights through an "arbitrary" grid axis (index_map
    # lambda l: (l, 0, 0)) with x in a VMEM scratch, so only ~2 layers of
    # weights are VMEM-resident and layer-(l+1) weights prefetch under layer l.
    for l in range(num_layers):
        # ---- self-attention ----
        qkv = mm(x_bf, in_proj_w[l]) + in_proj_b[l]                 # (N, 3*d_model) f32
        q = qkv[:, :d_model]
        k = qkv[:, d_model:2 * d_model]
        v = qkv[:, 2 * d_model:]

        outs = []
        for b in range(B):
            r0 = b * S
            qh = heads(q[r0:r0 + S])                                # (H, S, dh)
            kh = heads(k[r0:r0 + S])
            vh = heads(v[r0:r0 + S])
            bias_b = bias[b:b + 1, :].reshape(1, 1, S)              # hoisted over heads
            s = jnp.einsum('hqd,hkd->hqk', qh, kh,
                           preferred_element_type=jnp.float32) * scale + bias_b
            m = jnp.max(s, axis=-1, keepdims=True)
            e = jnp.exp(s - m)
            p = e / jnp.sum(e, axis=-1, keepdims=True)              # exact f32 softmax
            o = jnp.einsum('hqk,hkd->hqd', p, vh,
                           preferred_element_type=jnp.float32)      # (H, S, dh)
            outs.append(jnp.swapaxes(o, 0, 1).reshape(S, d_model))
        attn = jnp.concatenate(outs, axis=0)                        # (N, d_model) f32

        attn = mm(attn.astype(cd), out_proj_w[l]) + out_proj_b[l]
        x = layernorm(x + attn, ln1_g[l], ln1_b[l])
        x_bf = x.astype(cd)

        # ---- feed-forward ----
        ff = jnp.maximum(mm(x_bf, ff1_w[l]) + ff1_b[l], 0.0)
        ff = mm(ff.astype(cd), ff2_w[l]) + ff2_b[l]
        x = layernorm(x + ff, ln2_g[l], ln2_b[l])
        x_bf = x.astype(cd)

    # --- fc_out + sigmoid (lane-dense padded output) --------------------------
    y = mm(x_bf, fc_out_w[...]) + fc_out_b[...]                     # (N, 128)
    o_ref[...] = jax.nn.sigmoid(y).astype(o_ref.dtype)


# ---------------------------------------------------------------------------
# Parameter preparation (done ONCE, outside the per-call path):
#  - fold fc_z / emb / fc_deck into fc_in's row blocks (f32 math, then bf16)
#  - pre-cast all matmul weights to bf16 (biases / LN params stay f32)
#  - zero-pad fc_out to a lane-dense 128-wide output
# ---------------------------------------------------------------------------
def prepare_params(raw, cfg):
    d_model = cfg["d_model"]
    d2 = d_model // 2
    sds = cfg["small_dim_slide"]
    bf = jnp.bfloat16

    w_in = raw["fc_in_w"]                      # (2*d_model, d_model)
    rows_z, rows_lab, rows_deck = w_in[:d2], w_in[d2:d_model], w_in[d_model:]

    w_z = (raw["fc_z_w"] @ rows_z).astype(bf)                       # (dim_latent, d_model)
    w_lab = (raw["emb"] @ rows_lab).astype(bf)                      # (num_label, d_model)
    w_deck = (raw["fc_deck_w"] @ rows_deck).astype(bf)              # (sds, d_model)
    b_in = (raw["fc_z_b"] @ rows_z + raw["fc_deck_b"] @ rows_deck
            + raw["fc_in_b"])                                       # (1, d_model) f32

    out_pad = 128
    fc_out_w = jnp.zeros((d_model, out_pad), jnp.float32)
    fc_out_w = fc_out_w.at[:, :sds].set(raw["fc_out_w"]).astype(bf)
    fc_out_b = jnp.zeros((1, out_pad), jnp.float32).at[:, :sds].set(raw["fc_out_b"])

    return {
        "w_z": w_z, "w_lab": w_lab, "w_deck": w_deck, "b_in": b_in,
        "in_proj_w": raw["in_proj_w"].astype(bf), "in_proj_b": raw["in_proj_b"],
        "out_proj_w": raw["out_proj_w"].astype(bf), "out_proj_b": raw["out_proj_b"],
        "ln1_g": raw["ln1_g"], "ln1_b": raw["ln1_b"],
        "ff1_w": raw["ff1_w"].astype(bf), "ff1_b": raw["ff1_b"],
        "ff2_w": raw["ff2_w"].astype(bf), "ff2_b": raw["ff2_b"],
        "ln2_g": raw["ln2_g"], "ln2_b": raw["ln2_b"],
        "fc_out_w": fc_out_w, "fc_out_b": fc_out_b,
        "out_pad": out_pad,
    }


# ---------------------------------------------------------------------------
# Wrapper
# ---------------------------------------------------------------------------
def combined_generator_forward(prep, z, label, deck_enc, padding_mask, cfg):
    B, S, _ = z.shape
    N = B * S
    sds = cfg["small_dim_slide"]
    out_pad = prep["out_pad"]

    z_flat = z.reshape(N, -1).astype(jnp.bfloat16)
    label_flat = label.reshape(N, 1).astype(jnp.int32)
    # row n of deck_rep belongs to batch n // S (matches z.reshape ordering)
    deck_rep = jnp.repeat(deck_enc, S, axis=0).astype(jnp.bfloat16)  # (N, sds)
    mask_f = padding_mask.astype(jnp.float32)

    inputs = [
        z_flat, label_flat, deck_rep, mask_f,
        prep["w_z"], prep["w_lab"], prep["w_deck"], prep["b_in"],
        prep["in_proj_w"], prep["in_proj_b"], prep["out_proj_w"], prep["out_proj_b"],
        prep["ln1_g"], prep["ln1_b"], prep["ff1_w"], prep["ff1_b"],
        prep["ff2_w"], prep["ff2_b"], prep["ln2_g"], prep["ln2_b"],
        prep["fc_out_w"], prep["fc_out_b"],
    ]

    vmem_spec = pl.BlockSpec(memory_space=pltpu.MemorySpace.VMEM)
    kernel = partial(_fused_kernel, B=B, S=S, d_model=cfg["d_model"],
                     nhead=cfg["nhead"], num_layers=cfg["num_layers"],
                     num_label=cfg["num_label"])

    # TODO(synk): on v7x (2 TensorCores/chip) add a leading "parallel" grid
    # axis over B (activations blocked to S rows per step, weights un-blocked)
    # to shard batches across cores; keep this single-step call on 1-TC
    # v5e/v6e where each extra grid step is ~0.35us of pure overhead.
    out = pl.pallas_call(
        kernel,
        out_shape=jax.ShapeDtypeStruct((N, out_pad), jnp.float32),
        in_specs=[vmem_spec] * len(inputs),
        out_specs=vmem_spec,
    )(*inputs)
    return out[:, :sds].reshape(B, S, sds)


# ---------------------------------------------------------------------------
# Deterministic parameter init (raw, PyTorch-shaped, f32)
# ---------------------------------------------------------------------------
def init_params(key, cfg):
    d_model = cfg["d_model"]
    d2 = d_model // 2
    L = cfg["num_layers"]
    dff = cfg["dim_ff"]
    sds = cfg["small_dim_slide"]
    keys = iter(jax.random.split(key, 32))

    def w(shape, scale=0.05):
        return scale * jax.random.normal(next(keys), shape, dtype=jnp.float32)

    return {
        "fc_z_w": w((cfg["dim_latent"], d2)), "fc_z_b": w((1, d2)),
        "emb": w((cfg["num_label"], d2)).at[cfg["padding_idx"]].set(0.0),
        "fc_deck_w": w((sds, d_model)), "fc_deck_b": w((1, d_model)),
        "fc_in_w": w((2 * d_model, d_model)), "fc_in_b": w((1, d_model)),
        "fc_out_w": w((d_model, sds)), "fc_out_b": w((1, sds)),
        # per-layer parameters, stacked on a leading layer axis
        "in_proj_w": w((L, d_model, 3 * d_model)),
        "in_proj_b": w((L, 1, 3 * d_model)),
        "out_proj_w": w((L, d_model, d_model)),
        "out_proj_b": w((L, 1, d_model)),
        "ln1_g": jnp.ones((L, 1, d_model), jnp.float32),
        "ln1_b": jnp.zeros((L, 1, d_model), jnp.float32),
        "ff1_w": w((L, d_model, dff)), "ff1_b": w((L, 1, dff)),
        "ff2_w": w((L, dff, d_model)), "ff2_b": w((L, 1, d_model)),
        "ln2_g": jnp.ones((L, 1, d_model), jnp.float32),
        "ln2_b": jnp.zeros((L, 1, d_model), jnp.float32),
    }


# ---------------------------------------------------------------------------
if __name__ == "__main__":
    cfg = dict(dim_latent=16, num_label=10, small_dim_slide=24, padding_idx=0,
               d_model=32, nhead=4, num_layers=2, dim_ff=64)
    B, S = 2, 8

    key = jax.random.PRNGKey(0)
    k_p, k_z, k_l, k_d = jax.random.split(key, 4)

    raw_params = init_params(k_p, cfg)
    prep = prepare_params(raw_params, cfg)

    z = jax.random.normal(k_z, (B, S, cfg["dim_latent"]), dtype=jnp.float32)
    label = jax.random.randint(k_l, (B, S), 0, cfg["num_label"], dtype=jnp.int32)
    deck_enc = jax.random.normal(k_d, (B, cfg["small_dim_slide"]), dtype=jnp.float32)
    # last two positions of each sequence are padding
    padding_mask = jnp.arange(S)[None, :] >= (S - 2)
    padding_mask = jnp.broadcast_to(padding_mask, (B, S))

    out = combined_generator_forward(prep, z, label, deck_enc, padding_mask, cfg)
    out = jax.block_until_ready(out)

    assert out.shape == (B, S, cfg["small_dim_slide"])
    assert bool(jnp.all(jnp.isfinite(out)))
    assert bool(jnp.all((out >= 0.0) & (out <= 1.0)))   # sigmoid range
    print("KERNEL_OK")
</pallas_src>

<mosaic_0001>
module attributes {stable_mosaic.version = 11 : i64} {
  func.func @_fused_kernel(%arg0: memref<16x16xbf16, #tpu.memory_space<vmem>>, %arg1: memref<16x1xi32, #tpu.memory_space<vmem>>, %arg2: memref<16x24xbf16, #tpu.memory_space<vmem>>, %arg3: memref<2x8xf32, #tpu.memory_space<vmem>>, %arg4: memref<16x32xbf16, #tpu.memory_space<vmem>>, %arg5: memref<10x32xbf16, #tpu.memory_space<vmem>>, %arg6: memref<24x32xbf16, #tpu.memory_space<vmem>>, %arg7: memref<1x32xf32, #tpu.memory_space<vmem>>, %arg8: memref<2x32x96xbf16, #tpu.memory_space<vmem>>, %arg9: memref<2x1x96xf32, #tpu.memory_space<vmem>>, %arg10: memref<2x32x32xbf16, #tpu.memory_space<vmem>>, %arg11: memref<2x1x32xf32, #tpu.memory_space<vmem>>, %arg12: memref<2x1x32xf32, #tpu.memory_space<vmem>>, %arg13: memref<2x1x32xf32, #tpu.memory_space<vmem>>, %arg14: memref<2x32x64xbf16, #tpu.memory_space<vmem>>, %arg15: memref<2x1x64xf32, #tpu.memory_space<vmem>>, %arg16: memref<2x64x32xbf16, #tpu.memory_space<vmem>>, %arg17: memref<2x1x32xf32, #tpu.memory_space<vmem>>, %arg18: memref<2x1x32xf32, #tpu.memory_space<vmem>>, %arg19: memref<2x1x32xf32, #tpu.memory_space<vmem>>, %arg20: memref<32x128xbf16, #tpu.memory_space<vmem>>, %arg21: memref<1x128xf32, #tpu.memory_space<vmem>>, %arg22: memref<16x128xf32, #tpu.memory_space<vmem>>) attributes {dimension_semantics = [], scalar_prefetch = 0 : i64, scratch_operands = 0 : i64, tpu.core_type = #tpu.core_type<tc>} {
    %0 = tpu.iota {dimensions = array<i32: 1>} : vector<16x10xi32>
    %c0 = arith.constant 0 : index
    %c0_0 = arith.constant 0 : index
    %1 = vector.load %arg1[%c0, %c0_0] : memref<16x1xi32, #tpu.memory_space<vmem>>, vector<16x1xi32>
    %2 = vector.broadcast %1 : vector<16x1xi32> to vector<16x10xi32>
    %3 = arith.cmpi eq, %0, %2 : vector<16x10xi32>
    %4 = arith.extui %3 : vector<16x10xi1> to vector<16x10xi32>
    %5 = arith.sitofp %4 : vector<16x10xi32> to vector<16x10xf32>
    %6 = arith.truncf %5 : vector<16x10xf32> to vector<16x10xbf16>
    %c0_1 = arith.constant 0 : index
    %c0_2 = arith.constant 0 : index
    %7 = vector.load %arg0[%c0_1, %c0_2] : memref<16x16xbf16, #tpu.memory_space<vmem>>, vector<16x16xbf16>
    %c0_3 = arith.constant 0 : index
    %c0_4 = arith.constant 0 : index
    %8 = vector.load %arg4[%c0_3, %c0_4] : memref<16x32xbf16, #tpu.memory_space<vmem>>, vector<16x32xbf16>
    %cst = arith.constant dense<0.000000e+00> : vector<16x32xf32>
    %9 = tpu.matmul %7, %8, %cst {dimension_numbers = #tpu.dot_dimension_numbers<[1], [0], [0], [1], [0, 0, 1, 1], [], []>} : vector<16x16xbf16>, vector<16x32xbf16>, vector<16x32xf32> -> vector<16x32xf32>
    %c0_5 = arith.constant 0 : index
    %c0_6 = arith.constant 0 : index
    %10 = vector.load %arg5[%c0_5, %c0_6] : memref<10x32xbf16, #tpu.memory_space<vmem>>, vector<10x32xbf16>
    %cst_7 = arith.constant dense<0.000000e+00> : vector<16x32xf32>
    %11 = tpu.matmul %6, %10, %cst_7 {dimension_numbers = #tpu.dot_dimension_numbers<[1], [0], [0], [1], [0, 0, 1, 1], [], []>} : vector<16x10xbf16>, vector<10x32xbf16>, vector<16x32xf32> -> vector<16x32xf32>
    %12 = arith.addf %9, %11 : vector<16x32xf32>
    %c0_8 = arith.constant 0 : index
    %c0_9 = arith.constant 0 : index
    %13 = vector.load %arg2[%c0_8, %c0_9] : memref<16x24xbf16, #tpu.memory_space<vmem>>, vector<16x24xbf16>
    %c0_10 = arith.constant 0 : index
    %c0_11 = arith.constant 0 : index
    %14 = vector.load %arg6[%c0_10, %c0_11] : memref<24x32xbf16, #tpu.memory_space<vmem>>, vector<24x32xbf16>
    %cst_12 = arith.constant dense<0.000000e+00> : vector<16x32xf32>
    %15 = tpu.matmul %13, %14, %cst_12 {dimension_numbers = #tpu.dot_dimension_numbers<[1], [0], [0], [1], [0, 0, 1, 1], [], []>} : vector<16x24xbf16>, vector<24x32xbf16>, vector<16x32xf32> -> vector<16x32xf32>
    %16 = arith.addf %12, %15 : vector<16x32xf32>
    %c0_13 = arith.constant 0 : index
    %c0_14 = arith.constant 0 : index
    %17 = vector.load %arg7[%c0_13, %c0_14] : memref<1x32xf32, #tpu.memory_space<vmem>>, vector<1x32xf32>
    %18 = vector.broadcast %17 : vector<1x32xf32> to vector<16x32xf32>
    %19 = arith.addf %16, %18 : vector<16x32xf32>
    %cst_15 = arith.constant 0.000000e+00 : f32
    %20 = vector.broadcast %cst_15 : f32 to vector<16x32xf32>
    %21 = arith.maximumf %19, %20 : vector<16x32xf32>
    %22 = arith.truncf %21 : vector<16x32xf32> to vector<16x32xbf16>
    %c0_16 = arith.constant 0 : index
    %c0_17 = arith.constant 0 : index
    %23 = vector.load %arg3[%c0_16, %c0_17] : memref<2x8xf32, #tpu.memory_space<vmem>>, vector<2x8xf32>
    %cst_18 = arith.constant -1.000000e+09 : f32
    %24 = vector.broadcast %cst_18 : f32 to vector<2x8xf32>
    %25 = arith.mulf %23, %24 : vector<2x8xf32>
    %c0_19 = arith.constant 0 : index
    %c0_20 = arith.constant 0 : index
    %c0_21 = arith.constant 0 : index
    %26 = vector.load %arg8[%c0_19, %c0_20, %c0_21] : memref<2x32x96xbf16, #tpu.memory_space<vmem>>, vector<1x32x96xbf16>
    %27 = vector.shape_cast %26 : vector<1x32x96xbf16> to vector<32x96xbf16>
    %cst_22 = arith.constant dense<0.000000e+00> : vector<16x96xf32>
    %28 = tpu.matmul %22, %27, %cst_22 {dimension_numbers = #tpu.dot_dimension_numbers<[1], [0], [0], [1], [0, 0, 1, 1], [], []>} : vector<16x32xbf16>, vector<32x96xbf16>, vector<16x96xf32> -> vector<16x96xf32>
    %c0_23 = arith.constant 0 : index
    %c0_24 = arith.constant 0 : index
    %c0_25 = arith.constant 0 : index
    %29 = vector.load %arg9[%c0_23, %c0_24, %c0_25] : memref<2x1x96xf32, #tpu.memory_space<vmem>>, vector<1x1x96xf32>
    %30 = vector.shape_cast %29 : vector<1x1x96xf32> to vector<1x96xf32>
    %31 = vector.broadcast %30 : vector<1x96xf32> to vector<16x96xf32>
    %32 = arith.addf %28, %31 : vector<16x96xf32>
    %33 = vector.extract_strided_slice %32 {offsets = [0, 0], sizes = [16, 32], strides = [1, 1]} : vector<16x96xf32> to vector<16x32xf32>
    %34 = vector.extract_strided_slice %32 {offsets = [0, 32], sizes = [16, 32], strides = [1, 1]} : vector<16x96xf32> to vector<16x32xf32>
    %35 = vector.extract_strided_slice %32 {offsets = [0, 64], sizes = [16, 32], strides = [1, 1]} : vector<16x96xf32> to vector<16x32xf32>
    %36 = vector.extract_strided_slice %33 {offsets = [0, 0], sizes = [8, 32], strides = [1, 1]} : vector<16x32xf32> to vector<8x32xf32>
    %37 = vector.shape_cast %36 : vector<8x32xf32> to vector<8x4x8xf32>
    %38 = tpu.transpose %37, [1, 0, 2] : vector<8x4x8xf32> -> vector<4x8x8xf32>
    %39 = vector.extract_strided_slice %34 {offsets = [0, 0], sizes = [8, 32], strides = [1, 1]} : vector<16x32xf32> to vector<8x32xf32>
    %40 = vector.shape_cast %39 : vector<8x32xf32> to vector<8x4x8xf32>
    %41 = tpu.transpose %40, [1, 0, 2] : vector<8x4x8xf32> -> vector<4x8x8xf32>
    %42 = vector.extract_strided_slice %35 {offsets = [0, 0], sizes = [8, 32], strides = [1, 1]} : vector<16x32xf32> to vector<8x32xf32>
    %43 = vector.shape_cast %42 : vector<8x32xf32> to vector<8x4x8xf32>
    %44 = tpu.transpose %43, [1, 0, 2] : vector<8x4x8xf32> -> vector<4x8x8xf32>
    %45 = vector.extract_strided_slice %25 {offsets = [0, 0], sizes = [1, 8], strides = [1, 1]} : vector<2x8xf32> to vector<1x8xf32>
    %46 = vector.shape_cast %45 : vector<1x8xf32> to vector<1x1x8xf32>
    "tpu.trace_start"() <{level = 10 : i32, message = "hqd,hkd->hqk"}> : () -> ()
    %cst_26 = arith.constant dense<0.000000e+00> : vector<4x8x8xf32>
    %47 = tpu.matmul %38, %41, %cst_26 {dimension_numbers = #tpu.dot_dimension_numbers<[2], [2], [1], [1], [0, 0, 0, 1, 1, 1], [0], [0]>} : vector<4x8x8xf32>, vector<4x8x8xf32>, vector<4x8x8xf32> -> vector<4x8x8xf32>
    "tpu.trace_stop"() : () -> ()
    %cst_27 = arith.constant 0.353553385 : f32
    %48 = vector.broadcast %cst_27 : f32 to vector<4x8x8xf32>
    %49 = arith.mulf %47, %48 : vector<4x8x8xf32>
    %50 = vector.broadcast %46 : vector<1x1x8xf32> to vector<4x8x8xf32>
    %51 = arith.addf %49, %50 : vector<4x8x8xf32>
    %cst_28 = arith.constant dense<0xFF800000> : vector<4x8xf32>
    %52 = vector.multi_reduction <maximumf>, %51, %cst_28 [2] : vector<4x8x8xf32> to vector<4x8xf32>
    %53 = vector.shape_cast %52 : vector<4x8xf32> to vector<4x8x1xf32>
    %54 = vector.broadcast %53 : vector<4x8x1xf32> to vector<4x8x8xf32>
    %55 = arith.subf %51, %54 : vector<4x8x8xf32>
    %56 = math.exp %55 : vector<4x8x8xf32>
    %cst_29 = arith.constant dense<0.000000e+00> : vector<4x8xf32>
    %57 = vector.multi_reduction <add>, %56, %cst_29 [2] : vector<4x8x8xf32> to vector<4x8xf32>
    %58 = vector.shape_cast %57 : vector<4x8xf32> to vector<4x8x1xf32>
    %59 = vector.broadcast %58 : vector<4x8x1xf32> to vector<4x8x8xf32>
    %60 = arith.divf %56, %59 : vector<4x8x8xf32>
    "tpu.trace_start"() <{level = 10 : i32, message = "hqk,hkd->hqd"}> : () -> ()
    %cst_30 = arith.constant dense<0.000000e+00> : vector<4x8x8xf32>
    %61 = tpu.matmul %60, %44, %cst_30 {dimension_numbers = #tpu.dot_dimension_numbers<[2], [1], [1], [2], [0, 0, 0, 1, 1, 2], [0], [0]>} : vector<4x8x8xf32>, vector<4x8x8xf32>, vector<4x8x8xf32> -> vector<4x8x8xf32>
    "tpu.trace_stop"() : () -> ()
    %62 = tpu.transpose %61, [1, 0, 2] : vector<4x8x8xf32> -> vector<8x4x8xf32>
    %63 = vector.shape_cast %62 : vector<8x4x8xf32> to vector<8x32xf32>
    %64 = vector.extract_strided_slice %33 {offsets = [8, 0], sizes = [8, 32], strides = [1, 1]} : vector<16x32xf32> to vector<8x32xf32>
    %65 = vector.shape_cast %64 : vector<8x32xf32> to vector<8x4x8xf32>
    %66 = tpu.transpose %65, [1, 0, 2] : vector<8x4x8xf32> -> vector<4x8x8xf32>
    %67 = vector.extract_strided_slice %34 {offsets = [8, 0], sizes = [8, 32], strides = [1, 1]} : vector<16x32xf32> to vector<8x32xf32>
    %68 = vector.shape_cast %67 : vector<8x32xf32> to vector<8x4x8xf32>
    %69 = tpu.transpose %68, [1, 0, 2] : vector<8x4x8xf32> -> vector<4x8x8xf32>
    %70 = vector.extract_strided_slice %35 {offsets = [8, 0], sizes = [8, 32], strides = [1, 1]} : vector<16x32xf32> to vector<8x32xf32>
    %71 = vector.shape_cast %70 : vector<8x32xf32> to vector<8x4x8xf32>
    %72 = tpu.transpose %71, [1, 0, 2] : vector<8x4x8xf32> -> vector<4x8x8xf32>
    %73 = vector.extract_strided_slice %25 {offsets = [1, 0], sizes = [1, 8], strides = [1, 1]} : vector<2x8xf32> to vector<1x8xf32>
    %74 = vector.shape_cast %73 : vector<1x8xf32> to vector<1x1x8xf32>
    "tpu.trace_start"() <{level = 10 : i32, message = "hqd,hkd->hqk"}> : () -> ()
    %cst_31 = arith.constant dense<0.000000e+00> : vector<4x8x8xf32>
    %75 = tpu.matmul %66, %69, %cst_31 {dimension_numbers = #tpu.dot_dimension_numbers<[2], [2], [1], [1], [0, 0, 0, 1, 1, 1], [0], [0]>} : vector<4x8x8xf32>, vector<4x8x8xf32>, vector<4x8x8xf32> -> vector<4x8x8xf32>
    "tpu.trace_stop"() : () -> ()
    %cst_32 = arith.constant 0.353553385 : f32
    %76 = vector.broadcast %cst_32 : f32 to vector<4x8x8xf32>
    %77 = arith.mulf %75, %76 : vector<4x8x8xf32>
    %78 = vector.broadcast %74 : vector<1x1x8xf32> to vector<4x8x8xf32>
    %79 = arith.addf %77, %78 : vector<4x8x8xf32>
    %cst_33 = arith.constant dense<0xFF800000> : vector<4x8xf32>
    %80 = vector.multi_reduction <maximumf>, %79, %cst_33 [2] : vector<4x8x8xf32> to vector<4x8xf32>
    %81 = vector.shape_cast %80 : vector<4x8xf32> to vector<4x8x1xf32>
    %82 = vector.broadcast %81 : vector<4x8x1xf32> to vector<4x8x8xf32>
    %83 = arith.subf %79, %82 : vector<4x8x8xf32>
    %84 = math.exp %83 : vector<4x8x8xf32>
    %cst_34 = arith.constant dense<0.000000e+00> : vector<4x8xf32>
    %85 = vector.multi_reduction <add>, %84, %cst_34 [2] : vector<4x8x8xf32> to vector<4x8xf32>
    %86 = vector.shape_cast %85 : vector<4x8xf32> to vector<4x8x1xf32>
    %87 = vector.broadcast %86 : vector<4x8x1xf32> to vector<4x8x8xf32>
    %88 = arith.divf %84, %87 : vector<4x8x8xf32>
    "tpu.trace_start"() <{level = 10 : i32, message = "hqk,hkd->hqd"}> : () -> ()
    %cst_35 = arith.constant dense<0.000000e+00> : vector<4x8x8xf32>
    %89 = tpu.matmul %88, %72, %cst_35 {dimension_numbers = #tpu.dot_dimension_numbers<[2], [1], [1], [2], [0, 0, 0, 1, 1, 2], [0], [0]>} : vector<4x8x8xf32>, vector<4x8x8xf32>, vector<4x8x8xf32> -> vector<4x8x8xf32>
    "tpu.trace_stop"() : () -> ()
    %90 = tpu.transpose %89, [1, 0, 2] : vector<4x8x8xf32> -> vector<8x4x8xf32>
    %91 = vector.shape_cast %90 : vector<8x4x8xf32> to vector<8x32xf32>
    %92 = tpu.concatenate %63, %91 in 0 : vector<8x32xf32>, vector<8x32xf32> -> vector<16x32xf32>
    %93 = arith.truncf %92 : vector<16x32xf32> to vector<16x32xbf16>
    %c0_36 = arith.constant 0 : index
    %c0_37 = arith.constant 0 : index
    %c0_38 = arith.constant 0 : index
    %94 = vector.load %arg10[%c0_36, %c0_37, %c0_38] : memref<2x32x32xbf16, #tpu.memory_space<vmem>>, vector<1x32x32xbf16>
    %95 = vector.shape_cast %94 : vector<1x32x32xbf16> to vector<32x32xbf16>
    %cst_39 = arith.constant dense<0.000000e+00> : vector<16x32xf32>
    %96 = tpu.matmul %93, %95, %cst_39 {dimension_numbers = #tpu.dot_dimension_numbers<[1], [0], [0], [1], [0, 0, 1, 1], [], []>} : vector<16x32xbf16>, vector<32x32xbf16>, vector<16x32xf32> -> vector<16x32xf32>
    %c0_40 = arith.constant 0 : index
    %c0_41 = arith.constant 0 : index
    %c0_42 = arith.constant 0 : index
    %97 = vector.load %arg11[%c0_40, %c0_41, %c0_42] : memref<2x1x32xf32, #tpu.memory_space<vmem>>, vector<1x1x32xf32>
    %98 = vector.shape_cast %97 : vector<1x1x32xf32> to vector<1x32xf32>
    %99 = vector.broadcast %98 : vector<1x32xf32> to vector<16x32xf32>
    %100 = arith.addf %96, %99 : vector<16x32xf32>
    %101 = arith.addf %21, %100 : vector<16x32xf32>
    %c0_43 = arith.constant 0 : index
    %c0_44 = arith.constant 0 : index
    %c0_45 = arith.constant 0 : index
    %102 = vector.load %arg12[%c0_43, %c0_44, %c0_45] : memref<2x1x32xf32, #tpu.memory_space<vmem>>, vector<1x1x32xf32>
    %103 = vector.shape_cast %102 : vector<1x1x32xf32> to vector<1x32xf32>
    %c0_46 = arith.constant 0 : index
    %c0_47 = arith.constant 0 : index
    %c0_48 = arith.constant 0 : index
    %104 = vector.load %arg13[%c0_46, %c0_47, %c0_48] : memref<2x1x32xf32, #tpu.memory_space<vmem>>, vector<1x1x32xf32>
    %105 = vector.shape_cast %104 : vector<1x1x32xf32> to vector<1x32xf32>
    %cst_49 = arith.constant dense<0.000000e+00> : vector<16xf32>
    %106 = vector.multi_reduction <add>, %101, %cst_49 [1] : vector<16x32xf32> to vector<16xf32>
    %107 = vector.shape_cast %106 : vector<16xf32> to vector<16x1xf32>
    %cst_50 = arith.constant 3.200000e+01 : f32
    %108 = vector.broadcast %cst_50 : f32 to vector<16x1xf32>
    %109 = arith.divf %107, %108 : vector<16x1xf32>
    %110 = arith.mulf %101, %101 : vector<16x32xf32>
    %cst_51 = arith.constant dense<0.000000e+00> : vector<16xf32>
    %111 = vector.multi_reduction <add>, %110, %cst_51 [1] : vector<16x32xf32> to vector<16xf32>
    %112 = vector.shape_cast %111 : vector<16xf32> to vector<16x1xf32>
    %cst_52 = arith.constant 3.200000e+01 : f32
    %113 = vector.broadcast %cst_52 : f32 to vector<16x1xf32>
    %114 = arith.divf %112, %113 : vector<16x1xf32>
    %115 = arith.mulf %109, %109 : vector<16x1xf32>
    %116 = arith.subf %114, %115 : vector<16x1xf32>
    %117 = vector.broadcast %109 : vector<16x1xf32> to vector<16x32xf32>
    %118 = arith.subf %101, %117 : vector<16x32xf32>
    %cst_53 = arith.constant 9.99999974E-6 : f32
    %119 = vector.broadcast %cst_53 : f32 to vector<16x1xf32>
    %120 = arith.addf %116, %119 : vector<16x1xf32>
    %121 = math.rsqrt %120 : vector<16x1xf32>
    %122 = vector.broadcast %121 : vector<16x1xf32> to vector<16x32xf32>
    %123 = arith.mulf %118, %122 : vector<16x32xf32>
    %124 = vector.broadcast %103 : vector<1x32xf32> to vector<16x32xf32>
    %125 = arith.mulf %123, %124 : vector<16x32xf32>
    %126 = vector.broadcast %105 : vector<1x32xf32> to vector<16x32xf32>
    %127 = arith.addf %125, %126 : vector<16x32xf32>
    %128 = arith.truncf %127 : vector<16x32xf32> to vector<16x32xbf16>
    %c0_54 = arith.constant 0 : index
    %c0_55 = arith.constant 0 : index
    %c0_56 = arith.constant 0 : index
    %129 = vector.load %arg14[%c0_54, %c0_55, %c0_56] : memref<2x32x64xbf16, #tpu.memory_space<vmem>>, vector<1x32x64xbf16>
    %130 = vector.shape_cast %129 : vector<1x32x64xbf16> to vector<32x64xbf16>
    %cst_57 = arith.constant dense<0.000000e+00> : vector<16x64xf32>
    %131 = tpu.matmul %128, %130, %cst_57 {dimension_numbers = #tpu.dot_dimension_numbers<[1], [0], [0], [1], [0, 0, 1, 1], [], []>} : vector<16x32xbf16>, vector<32x64xbf16>, vector<16x64xf32> -> vector<16x64xf32>
    %c0_58 = arith.constant 0 : index
    %c0_59 = arith.constant 0 : index
    %c0_60 = arith.constant 0 : index
    %132 = vector.load %arg15[%c0_58, %c0_59, %c0_60] : memref<2x1x64xf32, #tpu.memory_space<vmem>>, vector<1x1x64xf32>
    %133 = vector.shape_cast %132 : vector<1x1x64xf32> to vector<1x64xf32>
    %134 = vector.broadcast %133 : vector<1x64xf32> to vector<16x64xf32>
    %135 = arith.addf %131, %134 : vector<16x64xf32>
    %cst_61 = arith.constant 0.000000e+00 : f32
    %136 = vector.broadcast %cst_61 : f32 to vector<16x64xf32>
    %137 = arith.maximumf %135, %136 : vector<16x64xf32>
    %138 = arith.truncf %137 : vector<16x64xf32> to vector<16x64xbf16>
    %c0_62 = arith.constant 0 : index
    %c0_63 = arith.constant 0 : index
    %c0_64 = arith.constant 0 : index
    %139 = vector.load %arg16[%c0_62, %c0_63, %c0_64] : memref<2x64x32xbf16, #tpu.memory_space<vmem>>, vector<1x64x32xbf16>
    %140 = vector.shape_cast %139 : vector<1x64x32xbf16> to vector<64x32xbf16>
    %cst_65 = arith.constant dense<0.000000e+00> : vector<16x32xf32>
    %141 = tpu.matmul %138, %140, %cst_65 {dimension_numbers = #tpu.dot_dimension_numbers<[1], [0], [0], [1], [0, 0, 1, 1], [], []>} : vector<16x64xbf16>, vector<64x32xbf16>, vector<16x32xf32> -> vector<16x32xf32>
    %c0_66 = arith.constant 0 : index
    %c0_67 = arith.constant 0 : index
    %c0_68 = arith.constant 0 : index
    %142 = vector.load %arg17[%c0_66, %c0_67, %c0_68] : memref<2x1x32xf32, #tpu.memory_space<vmem>>, vector<1x1x32xf32>
    %143 = vector.shape_cast %142 : vector<1x1x32xf32> to vector<1x32xf32>
    %144 = vector.broadcast %143 : vector<1x32xf32> to vector<16x32xf32>
    %145 = arith.addf %141, %144 : vector<16x32xf32>
    %146 = arith.addf %127, %145 : vector<16x32xf32>
    %c0_69 = arith.constant 0 : index
    %c0_70 = arith.constant 0 : index
    %c0_71 = arith.constant 0 : index
    %147 = vector.load %arg18[%c0_69, %c0_70, %c0_71] : memref<2x1x32xf32, #tpu.memory_space<vmem>>, vector<1x1x32xf32>
    %148 = vector.shape_cast %147 : vector<1x1x32xf32> to vector<1x32xf32>
    %c0_72 = arith.constant 0 : index
    %c0_73 = arith.constant 0 : index
    %c0_74 = arith.constant 0 : index
    %149 = vector.load %arg19[%c0_72, %c0_73, %c0_74] : memref<2x1x32xf32, #tpu.memory_space<vmem>>, vector<1x1x32xf32>
    %150 = vector.shape_cast %149 : vector<1x1x32xf32> to vector<1x32xf32>
    %cst_75 = arith.constant dense<0.000000e+00> : vector<16xf32>
    %151 = vector.multi_reduction <add>, %146, %cst_75 [1] : vector<16x32xf32> to vector<16xf32>
    %152 = vector.shape_cast %151 : vector<16xf32> to vector<16x1xf32>
    %cst_76 = arith.constant 3.200000e+01 : f32
    %153 = vector.broadcast %cst_76 : f32 to vector<16x1xf32>
    %154 = arith.divf %152, %153 : vector<16x1xf32>
    %155 = arith.mulf %146, %146 : vector<16x32xf32>
    %cst_77 = arith.constant dense<0.000000e+00> : vector<16xf32>
    %156 = vector.multi_reduction <add>, %155, %cst_77 [1] : vector<16x32xf32> to vector<16xf32>
    %157 = vector.shape_cast %156 : vector<16xf32> to vector<16x1xf32>
    %cst_78 = arith.constant 3.200000e+01 : f32
    %158 = vector.broadcast %cst_78 : f32 to vector<16x1xf32>
    %159 = arith.divf %157, %158 : vector<16x1xf32>
    %160 = arith.mulf %154, %154 : vector<16x1xf32>
    %161 = arith.subf %159, %160 : vector<16x1xf32>
    %162 = vector.broadcast %154 : vector<16x1xf32> to vector<16x32xf32>
    %163 = arith.subf %146, %162 : vector<16x32xf32>
    %cst_79 = arith.constant 9.99999974E-6 : f32
    %164 = vector.broadcast %cst_79 : f32 to vector<16x1xf32>
    %165 = arith.addf %161, %164 : vector<16x1xf32>
    %166 = math.rsqrt %165 : vector<16x1xf32>
    %167 = vector.broadcast %166 : vector<16x1xf32> to vector<16x32xf32>
    %168 = arith.mulf %163, %167 : vector<16x32xf32>
    %169 = vector.broadcast %148 : vector<1x32xf32> to vector<16x32xf32>
    %170 = arith.mulf %168, %169 : vector<16x32xf32>
    %171 = vector.broadcast %150 : vector<1x32xf32> to vector<16x32xf32>
    %172 = arith.addf %170, %171 : vector<16x32xf32>
    %173 = arith.truncf %172 : vector<16x32xf32> to vector<16x32xbf16>
    %c1 = arith.constant 1 : index
    %c0_80 = arith.constant 0 : index
    %c0_81 = arith.constant 0 : index
    %174 = vector.load %arg8[%c1, %c0_80, %c0_81] : memref<2x32x96xbf16, #tpu.memory_space<vmem>>, vector<1x32x96xbf16>
    %175 = vector.shape_cast %174 : vector<1x32x96xbf16> to vector<32x96xbf16>
    %cst_82 = arith.constant dense<0.000000e+00> : vector<16x96xf32>
    %176 = tpu.matmul %173, %175, %cst_82 {dimension_numbers = #tpu.dot_dimension_numbers<[1], [0], [0], [1], [0, 0, 1, 1], [], []>} : vector<16x32xbf16>, vector<32x96xbf16>, vector<16x96xf32> -> vector<16x96xf32>
    %c1_83 = arith.constant 1 : index
    %c0_84 = arith.constant 0 : index
    %c0_85 = arith.constant 0 : index
    %177 = vector.load %arg9[%c1_83, %c0_84, %c0_85] : memref<2x1x96xf32, #tpu.memory_space<vmem>>, vector<1x1x96xf32>
    %178 = vector.shape_cast %177 : vector<1x1x96xf32> to vector<1x96xf32>
    %179 = vector.broadcast %178 : vector<1x96xf32> to vector<16x96xf32>
    %180 = arith.addf %176, %179 : vector<16x96xf32>
    %181 = vector.extract_strided_slice %180 {offsets = [0, 0], sizes = [16, 32], strides = [1, 1]} : vector<16x96xf32> to vector<16x32xf32>
    %182 = vector.extract_strided_slice %180 {offsets = [0, 32], sizes = [16, 32], strides = [1, 1]} : vector<16x96xf32> to vector<16x32xf32>
    %183 = vector.extract_strided_slice %180 {offsets = [0, 64], sizes = [16, 32], strides = [1, 1]} : vector<16x96xf32> to vector<16x32xf32>
    %184 = vector.extract_strided_slice %181 {offsets = [0, 0], sizes = [8, 32], strides = [1, 1]} : vector<16x32xf32> to vector<8x32xf32>
    %185 = vector.shape_cast %184 : vector<8x32xf32> to vector<8x4x8xf32>
    %186 = tpu.transpose %185, [1, 0, 2] : vector<8x4x8xf32> -> vector<4x8x8xf32>
    %187 = vector.extract_strided_slice %182 {offsets = [0, 0], sizes = [8, 32], strides = [1, 1]} : vector<16x32xf32> to vector<8x32xf32>
    %188 = vector.shape_cast %187 : vector<8x32xf32> to vector<8x4x8xf32>
    %189 = tpu.transpose %188, [1, 0, 2] : vector<8x4x8xf32> -> vector<4x8x8xf32>
    %190 = vector.extract_strided_slice %183 {offsets = [0, 0], sizes = [8, 32], strides = [1, 1]} : vector<16x32xf32> to vector<8x32xf32>
    %191 = vector.shape_cast %190 : vector<8x32xf32> to vector<8x4x8xf32>
    %192 = tpu.transpose %191, [1, 0, 2] : vector<8x4x8xf32> -> vector<4x8x8xf32>
    %193 = vector.extract_strided_slice %25 {offsets = [0, 0], sizes = [1, 8], strides = [1, 1]} : vector<2x8xf32> to vector<1x8xf32>
    %194 = vector.shape_cast %193 : vector<1x8xf32> to vector<1x1x8xf32>
    "tpu.trace_start"() <{level = 10 : i32, message = "hqd,hkd->hqk"}> : () -> ()
    %cst_86 = arith.constant dense<0.000000e+00> : vector<4x8x8xf32>
    %195 = tpu.matmul %186, %189, %cst_86 {dimension_numbers = #tpu.dot_dimension_numbers<[2], [2], [1], [1], [0, 0, 0, 1, 1, 1], [0], [0]>} : vector<4x8x8xf32>, vector<4x8x8xf32>, vector<4x8x8xf32> -> vector<4x8x8xf32>
    "tpu.trace_stop"() : () -> ()
    %cst_87 = arith.constant 0.353553385 : f32
    %196 = vector.broadcast %cst_87 : f32 to vector<4x8x8xf32>
    %197 = arith.mulf %195, %196 : vector<4x8x8xf32>
    %198 = vector.broadcast %194 : vector<1x1x8xf32> to vector<4x8x8xf32>
    %199 = arith.addf %197, %198 : vector<4x8x8xf32>
    %cst_88 = arith.constant dense<0xFF800000> : vector<4x8xf32>
    %200 = vector.multi_reduction <maximumf>, %199, %cst_88 [2] : vector<4x8x8xf32> to vector<4x8xf32>
    %201 = vector.shape_cast %200 : vector<4x8xf32> to vector<4x8x1xf32>
    %202 = vector.broadcast %201 : vector<4x8x1xf32> to vector<4x8x8xf32>
    %203 = arith.subf %199, %202 : vector<4x8x8xf32>
    %204 = math.exp %203 : vector<4x8x8xf32>
    %cst_89 = arith.constant dense<0.000000e+00> : vector<4x8xf32>
    %205 = vector.multi_reduction <add>, %204, %cst_89 [2] : vector<4x8x8xf32> to vector<4x8xf32>
    %206 = vector.shape_cast %205 : vector<4x8xf32> to vector<4x8x1xf32>
    %207 = vector.broadcast %206 : vector<4x8x1xf32> to vector<4x8x8xf32>
    %208 = arith.divf %204, %207 : vector<4x8x8xf32>
    "tpu.trace_start"() <{level = 10 : i32, message = "hqk,hkd->hqd"}> : () -> ()
    %cst_90 = arith.constant dense<0.000000e+00> : vector<4x8x8xf32>
    %209 = tpu.matmul %208, %192, %cst_90 {dimension_numbers = #tpu.dot_dimension_numbers<[2], [1], [1], [2], [0, 0, 0, 1, 1, 2], [0], [0]>} : vector<4x8x8xf32>, vector<4x8x8xf32>, vector<4x8x8xf32> -> vector<4x8x8xf32>
    "tpu.trace_stop"() : () -> ()
    %210 = tpu.transpose %209, [1, 0, 2] : vector<4x8x8xf32> -> vector<8x4x8xf32>
    %211 = vector.shape_cast %210 : vector<8x4x8xf32> to vector<8x32xf32>
    %212 = vector.extract_strided_slice %181 {offsets = [8, 0], sizes = [8, 32], strides = [1, 1]} : vector<16x32xf32> to vector<8x32xf32>
    %213 = vector.shape_cast %212 : vector<8x32xf32> to vector<8x4x8xf32>
    %214 = tpu.transpose %213, [1, 0, 2] : vector<8x4x8xf32> -> vector<4x8x8xf32>
    %215 = vector.extract_strided_slice %182 {offsets = [8, 0], sizes = [8, 32], strides = [1, 1]} : vector<16x32xf32> to vector<8x32xf32>
    %216 = vector.shape_cast %215 : vector<8x32xf32> to vector<8x4x8xf32>
    %217 = tpu.transpose %216, [1, 0, 2] : vector<8x4x8xf32> -> vector<4x8x8xf32>
    %218 = vector.extract_strided_slice %183 {offsets = [8, 0], sizes = [8, 32], strides = [1, 1]} : vector<16x32xf32> to vector<8x32xf32>
    %219 = vector.shape_cast %218 : vector<8x32xf32> to vector<8x4x8xf32>
    %220 = tpu.transpose %219, [1, 0, 2] : vector<8x4x8xf32> -> vector<4x8x8xf32>
    %221 = vector.extract_strided_slice %25 {offsets = [1, 0], sizes = [1, 8], strides = [1, 1]} : vector<2x8xf32> to vector<1x8xf32>
    %222 = vector.shape_cast %221 : vector<1x8xf32> to vector<1x1x8xf32>
    "tpu.trace_start"() <{level = 10 : i32, message = "hqd,hkd->hqk"}> : () -> ()
    %cst_91 = arith.constant dense<0.000000e+00> : vector<4x8x8xf32>
    %223 = tpu.matmul %214, %217, %cst_91 {dimension_numbers = #tpu.dot_dimension_numbers<[2], [2], [1], [1], [0, 0, 0, 1, 1, 1], [0], [0]>} : vector<4x8x8xf32>, vector<4x8x8xf32>, vector<4x8x8xf32> -> vector<4x8x8xf32>
    "tpu.trace_stop"() : () -> ()
    %cst_92 = arith.constant 0.353553385 : f32
    %224 = vector.broadcast %cst_92 : f32 to vector<4x8x8xf32>
    %225 = arith.mulf %223, %224 : vector<4x8x8xf32>
    %226 = vector.broadcast %222 : vector<1x1x8xf32> to vector<4x8x8xf32>
    %227 = arith.addf %225, %226 : vector<4x8x8xf32>
    %cst_93 = arith.constant dense<0xFF800000> : vector<4x8xf32>
    %228 = vector.multi_reduction <maximumf>, %227, %cst_93 [2] : vector<4x8x8xf32> to vector<4x8xf32>
    %229 = vector.shape_cast %228 : vector<4x8xf32> to vector<4x8x1xf32>
    %230 = vector.broadcast %229 : vector<4x8x1xf32> to vector<4x8x8xf32>
    %231 = arith.subf %227, %230 : vector<4x8x8xf32>
    %232 = math.exp %231 : vector<4x8x8xf32>
    %cst_94 = arith.constant dense<0.000000e+00> : vector<4x8xf32>
    %233 = vector.multi_reduction <add>, %232, %cst_94 [2] : vector<4x8x8xf32> to vector<4x8xf32>
    %234 = vector.shape_cast %233 : vector<4x8xf32> to vector<4x8x1xf32>
    %235 = vector.broadcast %234 : vector<4x8x1xf32> to vector<4x8x8xf32>
    %236 = arith.divf %232, %235 : vector<4x8x8xf32>
    "tpu.trace_start"() <{level = 10 : i32, message = "hqk,hkd->hqd"}> : () -> ()
    %cst_95 = arith.constant dense<0.000000e+00> : vector<4x8x8xf32>
    %237 = tpu.matmul %236, %220, %cst_95 {dimension_numbers = #tpu.dot_dimension_numbers<[2], [1], [1], [2], [0, 0, 0, 1, 1, 2], [0], [0]>} : vector<4x8x8xf32>, vector<4x8x8xf32>, vector<4x8x8xf32> -> vector<4x8x8xf32>
    "tpu.trace_stop"() : () -> ()
    %238 = tpu.transpose %237, [1, 0, 2] : vector<4x8x8xf32> -> vector<8x4x8xf32>
    %239 = vector.shape_cast %238 : vector<8x4x8xf32> to vector<8x32xf32>
    %240 = tpu.concatenate %211, %239 in 0 : vector<8x32xf32>, vector<8x32xf32> -> vector<16x32xf32>
    %241 = arith.truncf %240 : vector<16x32xf32> to vector<16x32xbf16>
    %c1_96 = arith.constant 1 : index
    %c0_97 = arith.constant 0 : index
    %c0_98 = arith.constant 0 : index
    %242 = vector.load %arg10[%c1_96, %c0_97, %c0_98] : memref<2x32x32xbf16, #tpu.memory_space<vmem>>, vector<1x32x32xbf16>
    %243 = vector.shape_cast %242 : vector<1x32x32xbf16> to vector<32x32xbf16>
    %cst_99 = arith.constant dense<0.000000e+00> : vector<16x32xf32>
    %244 = tpu.matmul %241, %243, %cst_99 {dimension_numbers = #tpu.dot_dimension_numbers<[1], [0], [0], [1], [0, 0, 1, 1], [], []>} : vector<16x32xbf16>, vector<32x32xbf16>, vector<16x32xf32> -> vector<16x32xf32>
    %c1_100 = arith.constant 1 : index
    %c0_101 = arith.constant 0 : index
    %c0_102 = arith.constant 0 : index
    %245 = vector.load %arg11[%c1_100, %c0_101, %c0_102] : memref<2x1x32xf32, #tpu.memory_space<vmem>>, vector<1x1x32xf32>
    %246 = vector.shape_cast %245 : vector<1x1x32xf32> to vector<1x32xf32>
    %247 = vector.broadcast %246 : vector<1x32xf32> to vector<16x32xf32>
    %248 = arith.addf %244, %247 : vector<16x32xf32>
    %249 = arith.addf %172, %248 : vector<16x32xf32>
    %c1_103 = arith.constant 1 : index
    %c0_104 = arith.constant 0 : index
    %c0_105 = arith.constant 0 : index
    %250 = vector.load %arg12[%c1_103, %c0_104, %c0_105] : memref<2x1x32xf32, #tpu.memory_space<vmem>>, vector<1x1x32xf32>
    %251 = vector.shape_cast %250 : vector<1x1x32xf32> to vector<1x32xf32>
    %c1_106 = arith.constant 1 : index
    %c0_107 = arith.constant 0 : index
    %c0_108 = arith.constant 0 : index
    %252 = vector.load %arg13[%c1_106, %c0_107, %c0_108] : memref<2x1x32xf32, #tpu.memory_space<vmem>>, vector<1x1x32xf32>
    %253 = vector.shape_cast %252 : vector<1x1x32xf32> to vector<1x32xf32>
    %cst_109 = arith.constant dense<0.000000e+00> : vector<16xf32>
    %254 = vector.multi_reduction <add>, %249, %cst_109 [1] : vector<16x32xf32> to vector<16xf32>
    %255 = vector.shape_cast %254 : vector<16xf32> to vector<16x1xf32>
    %cst_110 = arith.constant 3.200000e+01 : f32
    %256 = vector.broadcast %cst_110 : f32 to vector<16x1xf32>
    %257 = arith.divf %255, %256 : vector<16x1xf32>
    %258 = arith.mulf %249, %249 : vector<16x32xf32>
    %cst_111 = arith.constant dense<0.000000e+00> : vector<16xf32>
    %259 = vector.multi_reduction <add>, %258, %cst_111 [1] : vector<16x32xf32> to vector<16xf32>
    %260 = vector.shape_cast %259 : vector<16xf32> to vector<16x1xf32>
    %cst_112 = arith.constant 3.200000e+01 : f32
    %261 = vector.broadcast %cst_112 : f32 to vector<16x1xf32>
    %262 = arith.divf %260, %261 : vector<16x1xf32>
    %263 = arith.mulf %257, %257 : vector<16x1xf32>
    %264 = arith.subf %262, %263 : vector<16x1xf32>
    %265 = vector.broadcast %257 : vector<16x1xf32> to vector<16x32xf32>
    %266 = arith.subf %249, %265 : vector<16x32xf32>
    %cst_113 = arith.constant 9.99999974E-6 : f32
    %267 = vector.broadcast %cst_113 : f32 to vector<16x1xf32>
    %268 = arith.addf %264, %267 : vector<16x1xf32>
    %269 = math.rsqrt %268 : vector<16x1xf32>
    %270 = vector.broadcast %269 : vector<16x1xf32> to vector<16x32xf32>
    %271 = arith.mulf %266, %270 : vector<16x32xf32>
    %272 = vector.broadcast %251 : vector<1x32xf32> to vector<16x32xf32>
    %273 = arith.mulf %271, %272 : vector<16x32xf32>
    %274 = vector.broadcast %253 : vector<1x32xf32> to vector<16x32xf32>
    %275 = arith.addf %273, %274 : vector<16x32xf32>
    %276 = arith.truncf %275 : vector<16x32xf32> to vector<16x32xbf16>
    %c1_114 = arith.constant 1 : index
    %c0_115 = arith.constant 0 : index
    %c0_116 = arith.constant 0 : index
    %277 = vector.load %arg14[%c1_114, %c0_115, %c0_116] : memref<2x32x64xbf16, #tpu.memory_space<vmem>>, vector<1x32x64xbf16>
    %278 = vector.shape_cast %277 : vector<1x32x64xbf16> to vector<32x64xbf16>
    %cst_117 = arith.constant dense<0.000000e+00> : vector<16x64xf32>
    %279 = tpu.matmul %276, %278, %cst_117 {dimension_numbers = #tpu.dot_dimension_numbers<[1], [0], [0], [1], [0, 0, 1, 1], [], []>} : vector<16x32xbf16>, vector<32x64xbf16>, vector<16x64xf32> -> vector<16x64xf32>
    %c1_118 = arith.constant 1 : index
    %c0_119 = arith.constant 0 : index
    %c0_120 = arith.constant 0 : index
    %280 = vector.load %arg15[%c1_118, %c0_119, %c0_120] : memref<2x1x64xf32, #tpu.memory_space<vmem>>, vector<1x1x64xf32>
    %281 = vector.shape_cast %280 : vector<1x1x64xf32> to vector<1x64xf32>
    %282 = vector.broadcast %281 : vector<1x64xf32> to vector<16x64xf32>
    %283 = arith.addf %279, %282 : vector<16x64xf32>
    %cst_121 = arith.constant 0.000000e+00 : f32
    %284 = vector.broadcast %cst_121 : f32 to vector<16x64xf32>
    %285 = arith.maximumf %283, %284 : vector<16x64xf32>
    %286 = arith.truncf %285 : vector<16x64xf32> to vector<16x64xbf16>
    %c1_122 = arith.constant 1 : index
    %c0_123 = arith.constant 0 : index
    %c0_124 = arith.constant 0 : index
    %287 = vector.load %arg16[%c1_122, %c0_123, %c0_124] : memref<2x64x32xbf16, #tpu.memory_space<vmem>>, vector<1x64x32xbf16>
    %288 = vector.shape_cast %287 : vector<1x64x32xbf16> to vector<64x32xbf16>
    %cst_125 = arith.constant dense<0.000000e+00> : vector<16x32xf32>
    %289 = tpu.matmul %286, %288, %cst_125 {dimension_numbers = #tpu.dot_dimension_numbers<[1], [0], [0], [1], [0, 0, 1, 1], [], []>} : vector<16x64xbf16>, vector<64x32xbf16>, vector<16x32xf32> -> vector<16x32xf32>
    %c1_126 = arith.constant 1 : index
    %c0_127 = arith.constant 0 : index
    %c0_128 = arith.constant 0 : index
    %290 = vector.load %arg17[%c1_126, %c0_127, %c0_128] : memref<2x1x32xf32, #tpu.memory_space<vmem>>, vector<1x1x32xf32>
    %291 = vector.shape_cast %290 : vector<1x1x32xf32> to vector<1x32xf32>
    %292 = vector.broadcast %291 : vector<1x32xf32> to vector<16x32xf32>
    %293 = arith.addf %289, %292 : vector<16x32xf32>
    %294 = arith.addf %275, %293 : vector<16x32xf32>
    %c1_129 = arith.constant 1 : index
    %c0_130 = arith.constant 0 : index
    %c0_131 = arith.constant 0 : index
    %295 = vector.load %arg18[%c1_129, %c0_130, %c0_131] : memref<2x1x32xf32, #tpu.memory_space<vmem>>, vector<1x1x32xf32>
    %296 = vector.shape_cast %295 : vector<1x1x32xf32> to vector<1x32xf32>
    %c1_132 = arith.constant 1 : index
    %c0_133 = arith.constant 0 : index
    %c0_134 = arith.constant 0 : index
    %297 = vector.load %arg19[%c1_132, %c0_133, %c0_134] : memref<2x1x32xf32, #tpu.memory_space<vmem>>, vector<1x1x32xf32>
    %298 = vector.shape_cast %297 : vector<1x1x32xf32> to vector<1x32xf32>
    %cst_135 = arith.constant dense<0.000000e+00> : vector<16xf32>
    %299 = vector.multi_reduction <add>, %294, %cst_135 [1] : vector<16x32xf32> to vector<16xf32>
    %300 = vector.shape_cast %299 : vector<16xf32> to vector<16x1xf32>
    %cst_136 = arith.constant 3.200000e+01 : f32
    %301 = vector.broadcast %cst_136 : f32 to vector<16x1xf32>
    %302 = arith.divf %300, %301 : vector<16x1xf32>
    %303 = arith.mulf %294, %294 : vector<16x32xf32>
    %cst_137 = arith.constant dense<0.000000e+00> : vector<16xf32>
    %304 = vector.multi_reduction <add>, %303, %cst_137 [1] : vector<16x32xf32> to vector<16xf32>
    %305 = vector.shape_cast %304 : vector<16xf32> to vector<16x1xf32>
    %cst_138 = arith.constant 3.200000e+01 : f32
    %306 = vector.broadcast %cst_138 : f32 to vector<16x1xf32>
    %307 = arith.divf %305, %306 : vector<16x1xf32>
    %308 = arith.mulf %302, %302 : vector<16x1xf32>
    %309 = arith.subf %307, %308 : vector<16x1xf32>
    %310 = vector.broadcast %302 : vector<16x1xf32> to vector<16x32xf32>
    %311 = arith.subf %294, %310 : vector<16x32xf32>
    %cst_139 = arith.constant 9.99999974E-6 : f32
    %312 = vector.broadcast %cst_139 : f32 to vector<16x1xf32>
    %313 = arith.addf %309, %312 : vector<16x1xf32>
    %314 = math.rsqrt %313 : vector<16x1xf32>
    %315 = vector.broadcast %314 : vector<16x1xf32> to vector<16x32xf32>
    %316 = arith.mulf %311, %315 : vector<16x32xf32>
    %317 = vector.broadcast %296 : vector<1x32xf32> to vector<16x32xf32>
    %318 = arith.mulf %316, %317 : vector<16x32xf32>
    %319 = vector.broadcast %298 : vector<1x32xf32> to vector<16x32xf32>
    %320 = arith.addf %318, %319 : vector<16x32xf32>
    %321 = arith.truncf %320 : vector<16x32xf32> to vector<16x32xbf16>
    %c0_140 = arith.constant 0 : index
    %c0_141 = arith.constant 0 : index
    %322 = vector.load %arg20[%c0_140, %c0_141] : memref<32x128xbf16, #tpu.memory_space<vmem>>, vector<32x128xbf16>
    %cst_142 = arith.constant dense<0.000000e+00> : vector<16x128xf32>
    %323 = tpu.matmul %321, %322, %cst_142 {dimension_numbers = #tpu.dot_dimension_numbers<[1], [0], [0], [1], [0, 0, 1, 1], [], []>} : vector<16x32xbf16>, vector<32x128xbf16>, vector<16x128xf32> -> vector<16x128xf32>
    %c0_143 = arith.constant 0 : index
    %c0_144 = arith.constant 0 : index
    %324 = vector.load %arg21[%c0_143, %c0_144] : memref<1x128xf32, #tpu.memory_space<vmem>>, vector<1x128xf32>
    %325 = vector.broadcast %324 : vector<1x128xf32> to vector<16x128xf32>
    %326 = arith.addf %323, %325 : vector<16x128xf32>
    %327 = arith.negf %326 : vector<16x128xf32>
    %328 = math.exp %327 : vector<16x128xf32>
    %cst_145 = arith.constant 1.000000e+00 : f32
    %329 = vector.broadcast %cst_145 : f32 to vector<16x128xf32>
    %330 = arith.addf %329, %328 : vector<16x128xf32>
    %331 = arith.divf %329, %330 : vector<16x128xf32>
    %c0_146 = arith.constant 0 : index
    %c0_147 = arith.constant 0 : index
    %332 = vector.load %arg22[%c0_146, %c0_147] : memref<16x128xf32, #tpu.memory_space<vmem>>, vector<16x128xf32>
    tpu.vector_store %arg22[%c0_146, %c0_147], %331 {strides = array<i32>} : memref<16x128xf32, #tpu.memory_space<vmem>>, vector<16x128xf32>,
    return
  }
}

</mosaic_0001>

<bundles_post_ra>
// kernel: tpu_custom_call.1
= control target key start
LH: loop header
LB: loop body
LE: loop exit
PB: predicated region body
PF: predicated region fallthrough
CT: control target
= control target key end

     0   :  { %s8448_s0 = inlined_call_operand.hbm [shape: bf16[16,16], index: 0, kind: input, shape index: {}]   ;;  %s8449_s1 = inlined_call_operand.vmem [shape: s32[16,1], index: 1, kind: input, shape index: {}]   ;;  %s8450_s2 = inlined_call_operand.hbm [shape: bf16[16,24], index: 2, kind: input, shape index: {}]   ;;  %s8451_s3 = inlined_call_operand.hbm [shape: f32[2,8], index: 3, kind: input, shape index: {}]   ;;  %s8452_s4 = inlined_call_operand.hbm [shape: bf16[16,32], index: 4, kind: input, shape index: {}]   ;;  %s8453_s5 = inlined_call_operand.hbm [shape: bf16[10,32], index: 5, kind: input, shape index: {}]   ;;  %s8454_s6 = inlined_call_operand.vmem [shape: bf16[24,32], index: 6, kind: input, shape index: {}]   ;;  %s8455_s7 = inlined_call_operand.hbm [shape: f32[1,32], index: 7, kind: input, shape index: {}]   ;;  %s8456_s8 = inlined_call_operand.vmem [shape: bf16[2,32,96], index: 8, kind: input, shape index: {}]   ;;  %s8457_s9 = inlined_call_operand.vmem [shape: f32[2,1,96], index: 9, kind: input, shape index: {}]   ;;  %s8458_s10 = inlined_call_operand.vmem [shape: bf16[2,32,32], index: 10, kind: input, shape index: {}]   ;;  %s8459_s11 = inlined_call_operand.hbm [shape: f32[2,1,32], index: 11, kind: input, shape index: {}]   ;;  %s8460_s12 = inlined_call_operand.hbm [shape: f32[2,1,32], index: 12, kind: input, shape index: {}]   ;;  %s8461_s13 = inlined_call_operand.vmem [shape: f32[2,1,32], index: 13, kind: input, shape index: {}]   ;;  %s8462_s14 = inlined_call_operand.vmem [shape: bf16[2,32,64], index: 14, kind: input, shape index: {}]   ;;  %s8463_s15 = inlined_call_operand.vmem [shape: f32[2,1,64], index: 15, kind: input, shape index: {}]   ;;  %s8464_s16 = inlined_call_operand.vmem [shape: bf16[2,64,32], index: 16, kind: input, shape index: {}]   ;;  %s8465_s17 = inlined_call_operand.vmem [shape: f32[2,1,32], index: 17, kind: input, shape index: {}]   ;;  %s8466_s18 = inlined_call_operand.vmem [shape: f32[2,1,32], index: 18, kind: input, shape index: {}]   ;;  %s8467_s19 = inlined_call_operand.vmem [shape: f32[2,1,32], index: 19, kind: input, shape index: {}]   ;;  %s8468_s20 = inlined_call_operand.vmem [shape: bf16[32,128], index: 20, kind: input, shape index: {}]   ;;  %s8469_s21 = inlined_call_operand.vmem [shape: f32[1,128], index: 21, kind: input, shape index: {}]   ;;  %s8470_s22 = inlined_call_operand.hbm [shape: f32[16,128], index: 22, kind: output, shape index: {}]  }
   0x1   :  { %8479 = sst [smem:[#allocation23_spill]] %s8448_s0 }
   0x2   :  { %8480 = sst [smem:[#allocation24_spill]] %s8449_s1 }
   0x3   :  { %8481 = sst [smem:[#allocation25_spill]] %s8450_s2 }
   0x4   :  { %8482 = sst [smem:[#allocation26_spill]] %s8451_s3 }
   0x5   :  { %8483 = sst [smem:[#allocation27_spill]] %s8452_s4 }
   0x6   :  { %8484 = sst [smem:[#allocation28_spill]] %s8453_s5 }
   0x7   :  { %8485 = sst [smem:[#allocation29_spill]] %s8454_s6 }
   0x8   :  { %8486 = sst [smem:[#allocation30_spill]] %s8469_s21 }
   0x9   :  { %8487 = sst [smem:[#allocation31_spill]] %s8470_s22 }
   0xa   :  { %27 = vsyncpa [#allocation3], 0 }
   0xb   :  { %28 = vsyncpa [#allocation6], 0 }
   0xc   :  { %29 = vsyncpa [#allocation9], 0 }
   0xd   :  { %30 = vsyncpa [#allocation12], 0 }
   0xe   :  { %31 = vsyncpa [#allocation15], 0 }
   0xf   :  { %32 = vsyncpa [#allocation4], 0  ;;  %s7177_s3 = smov [#allocation5]   ;;  %s7178_s29 = smov [#allocation8]  }
  0x10   :  { %s52_s28 = sshll.u32 %s7177_s3, 4  ;;  %s74_s30 = sshll.u32 %s7178_s29, 4  ;;  %s53_s28 = int_to_ptr.vmem [resolvable:$true] %s52_s28  ;;  %s7317_s30 = int_to_ptr.vmem [resolvable:$true] %s74_s30 }
  0x11   :  { %s8488_s23 = sld [smem:[#allocation25_spill]] }
  0x17   :  { %s6967_s1 = scalar_lea.hbm %s8488_s23, 128 }
  0x18   :  { %p6968_p0 = scmp.ne.s32.totalorder %s8488_s23, %s6967_s1  ;;  %p6971_p1 = scmp.lt.u32.totalorder %s6967_s1, %s8488_s23 }
  0x1a   :  { %p6973_p2 = pnand %p6971_p1, %p6968_p0 }
  0x1c   :  { %6976 = shalt.err (!%p6973_p2)
}
  0x1d   :  { %s6977_s26 = scalar_lea.vmem %s53_s28, 128  ;;  %p6982_p4 = scmp.lt.s32.totalorder %s53_s28, %s53_s28 }
  0x1e   :  { %p6978_p3 = scmp.ne.s32.totalorder %s53_s28, %s6977_s26  ;;  %p6983_p5 = scmp.lt.s32.totalorder %s6977_s26, %s6977_s26 }
  0x20   :  { %p6984_p6 = por %p6983_p5, %p6982_p4 }
  0x22   :  { %p6985_p7 = pnand %p6984_p6, %p6978_p3 }
  0x24   :  { %6988 = shalt.err (!%p6985_p7)
}
  0x25   :  { %s7179_s2 = smov 64   ;;  %s7180_s27 = smov 4  }
  0x26   :  { %58 = dma.hbm_to_vmem [thread:$0]  %s8488_s23, 128, %s53_s28, [#allocation6], %s7179_s2, %s7179_s2, %s7180_s27  }
  0x27   :  { %s8489_s1 = sld [smem:[#allocation27_spill]] }
  0x2d   :  { %s6989_s5 = scalar_lea.hbm %s8489_s1, 128 }
  0x2e   :  { %p6990_p8 = scmp.ne.s32.totalorder %s8489_s1, %s6989_s5  ;;  %p6993_p9 = scmp.lt.u32.totalorder %s6989_s5, %s8489_s1 }
  0x30   :  { %p6995_p10 = pnand %p6993_p9, %p6990_p8 }
  0x32   :  { %6998 = shalt.err (!%p6995_p10)
}
  0x33   :  { %s6999_s22 = scalar_lea.vmem %s7317_s30, 128  ;;  %p7004_p12 = scmp.lt.s32.totalorder %s7317_s30, %s7317_s30 }
  0x34   :  { %p7000_p11 = scmp.ne.s32.totalorder %s7317_s30, %s6999_s22  ;;  %p7005_p13 = scmp.lt.s32.totalorder %s6999_s22, %s6999_s22 }
  0x36   :  { %p7006_p0 = por %p7005_p13, %p7004_p12 }
  0x38   :  { %p7007_p1 = pnand %p7006_p0, %p7000_p11 }
  0x3a   :  { %7010 = shalt.err (!%p7007_p1)
}
  0x3b   :  { %80 = dma.hbm_to_vmem [thread:$0]  %s8489_s1, 128, %s7317_s30, [#allocation9], %s7179_s2, %s7179_s2, %s7180_s27  }
  0x3c   :  { %s7181_s3 = smov [#allocation11]   ;;  %s7182_s4 = smov [#allocation2]  }
  0x3d   :  { %s101_s29 = sshll.u32 %s7181_s3, 4  ;;  %s38_s0 = sshll.u32 %s7182_s4, 4  ;;  %s102_s29 = int_to_ptr.vmem [resolvable:$true] %s101_s29  ;;  %s7354_s0 = int_to_ptr.vmem [resolvable:$true] %s38_s0 }
  0x3e   :  { %s7011_s24 = scalar_lea.hbm %s8455_s7, 16 }
  0x3f   :  { %p7012_p2 = scmp.ne.s32.totalorder %s8455_s7, %s7011_s24  ;;  %p7015_p3 = scmp.lt.u32.totalorder %s7011_s24, %s8455_s7 }
  0x41   :  { %p7017_p4 = pnand %p7015_p3, %p7012_p2 }
  0x43   :  { %7020 = shalt.err (!%p7017_p4)
}
  0x44   :  { %s7021_s30 = scalar_lea.vmem %s102_s29, 16  ;;  %s7025_s1 = scalar_lea.vmem %s102_s29, 32 }
  0x45   :  { %p7022_p5 = scmp.ne.s32.totalorder %s102_s29, %s7021_s30  ;;  %p7026_p6 = scmp.lt.s32.totalorder %s102_s29, %s102_s29 }
  0x46   :  { %p7027_p7 = scmp.lt.s32.totalorder %s7025_s1, %s7021_s30 }
  0x48   :  { %p7028_p8 = por %p7027_p7, %p7026_p6 }
  0x4a   :  { %p7029_p9 = pnand %p7028_p8, %p7022_p5 }
  0x4c   :  { %7032 = shalt.err (!%p7029_p9)
}
  0x4d   :  { %104 = dma.hbm_to_vmem [thread:$0]  %s8455_s7, 16, %s102_s29, [#allocation12]  }
  0x4e   :  { %s8490_s5 = sld [smem:[#allocation23_spill]] }
  0x54   :  { %s7033_s22 = scalar_lea.hbm %s8490_s5, 128 }
  0x55   :  { %p7034_p10 = scmp.ne.s32.totalorder %s8490_s5, %s7033_s22  ;;  %p7037_p11 = scmp.lt.u32.totalorder %s7033_s22, %s8490_s5 }
  0x57   :  { %p7039_p12 = pnand %p7037_p11, %p7034_p10 }
  0x59   :  { %7042 = shalt.err (!%p7039_p12)
}
  0x5a   :  { %s7043_s26 = scalar_lea.vmem %s7354_s0, 128  ;;  %p7048_p0 = scmp.lt.s32.totalorder %s7354_s0, %s7354_s0 }
  0x5b   :  { %p7044_p13 = scmp.ne.s32.totalorder %s7354_s0, %s7043_s26  ;;  %p7049_p1 = scmp.lt.s32.totalorder %s7043_s26, %s7043_s26 }
  0x5d   :  { %p7050_p2 = por %p7049_p1, %p7048_p0 }
  0x5f   :  { %p7051_p3 = pnand %p7050_p2, %p7044_p13 }
  0x61   :  { %7054 = shalt.err (!%p7051_p3)
}
  0x62   :  { %44 = dma.hbm_to_vmem [thread:$0]  %s8490_s5, 128, %s7354_s0, [#allocation3], %s7179_s2, %s7179_s2, %s7180_s27  }
  0x63   :  { %s7183_s30 = smov [#allocation7]   ;;  %s7184_s28 = smov [#allocation10]  }
  0x64   :  { %s65_s1 = sshll.u32 %s7183_s30, 4  ;;  %s86_s23 = sshll.u32 %s7184_s28, 4  ;;  %s66_s1 = int_to_ptr.vmem [resolvable:$true] %s65_s1  ;;  %s7388_s23 = int_to_ptr.vmem [resolvable:$true] %s86_s23 }
  0x65   :  { %s8491_s22 = sld [smem:[#allocation26_spill]] }
  0x6b   :  { %s7055_s21 = scalar_lea.hbm %s8491_s22, 32 }
  0x6c   :  { %p7056_p4 = scmp.ne.s32.totalorder %s8491_s22, %s7055_s21  ;;  %p7059_p5 = scmp.lt.u32.totalorder %s7055_s21, %s8491_s22 }
  0x6e   :  { %p7061_p6 = pnand %p7059_p5, %p7056_p4 }
  0x70   :  { %7064 = shalt.err (!%p7061_p6)
}
  0x71   :  { %s7065_s0 = scalar_lea.vmem %s66_s1, 32  ;;  %p7070_p8 = scmp.lt.s32.totalorder %s66_s1, %s66_s1 }
  0x72   :  { %p7066_p7 = scmp.ne.s32.totalorder %s66_s1, %s7065_s0  ;;  %p7071_p9 = scmp.lt.s32.totalorder %s7065_s0, %s7065_s0 }
  0x74   :  { %p7072_p10 = por %p7071_p9, %p7070_p8 }
  0x76   :  { %p7073_p11 = pnand %p7072_p10, %p7066_p7 }
  0x78   :  { %7076 = shalt.err (!%p7073_p11)
}
  0x79   :  { %68 = dma.hbm_to_vmem [thread:$0]  %s8491_s22, 32, %s66_s1, [#allocation6]  }
  0x7a   :  { %s8492_s28 = sld [smem:[#allocation28_spill]] }
  0x80   :  { %s7077_s3 = scalar_lea.hbm %s8492_s28, 128 }
  0x81   :  { %p7078_p12 = scmp.ne.s32.totalorder %s8492_s28, %s7077_s3  ;;  %p7081_p13 = scmp.lt.u32.totalorder %s7077_s3, %s8492_s28 }
  0x83   :  { %p7083_p0 = pnand %p7081_p13, %p7078_p12 }
  0x85   :  { %7086 = shalt.err (!%p7083_p0)
}
  0x86   :  { %s7087_s25 = scalar_lea.vmem %s7388_s23, 128  ;;  %p7092_p2 = scmp.lt.s32.totalorder %s7388_s23, %s7388_s23 }
  0x87   :  { %p7088_p1 = scmp.ne.s32.totalorder %s7388_s23, %s7087_s25  ;;  %p7093_p3 = scmp.lt.s32.totalorder %s7087_s25, %s7087_s25 }
  0x89   :  { %p7094_p4 = por %p7093_p3, %p7092_p2 }
  0x8b   :  { %p7095_p5 = pnand %p7094_p4, %p7088_p1 }
  0x8d   :  { %7098 = shalt.err (!%p7095_p5)
}
  0x8e   :  { %92 = dma.hbm_to_vmem [thread:$0]  %s8492_s28, 128, %s7388_s23, [#allocation9], %s7179_s2, %s7179_s2, %s7180_s27  }
  0x8f   :  { %s7185_s26 = smov [#allocation13]   ;;  %s7099_s29 = scalar_lea.hbm %s8459_s11, 32 }
  0x90   :  { %s116_s0 = sshll.u32 %s7185_s26, 4  ;;  %p7100_p6 = scmp.ne.s32.totalorder %s8459_s11, %s7099_s29  ;;  %s117_s0 = int_to_ptr.vmem [resolvable:$true] %s116_s0 }
  0x91   :  { %p7103_p7 = scmp.lt.u32.totalorder %s7099_s29, %s8459_s11 }
  0x93   :  { %p7105_p8 = pnand %p7103_p7, %p7100_p6 }
  0x95   :  { %7108 = shalt.err (!%p7105_p8)
}
  0x96   :  { %s7109_s21 = scalar_lea.vmem %s117_s0, 32  ;;  %p7114_p10 = scmp.lt.s32.totalorder %s117_s0, %s117_s0 }
  0x97   :  { %p7110_p9 = scmp.ne.s32.totalorder %s117_s0, %s7109_s21  ;;  %p7115_p11 = scmp.lt.s32.totalorder %s7109_s21, %s7109_s21 }
  0x99   :  { %p7116_p12 = por %p7115_p11, %p7114_p10 }
  0x9b   :  { %p7117_p13 = pnand %p7116_p12, %p7110_p9 }
  0x9d   :  { %7120 = shalt.err (!%p7117_p13)
}
  0x9e   :  { %s7186_s27 = smov 16   ;;  %s7187_s23 = smov 1  }
  0x9f   :  { %122 = dma.hbm_to_vmem [thread:$0]  %s8459_s11, 32, %s117_s0, [#allocation12], %s7186_s27, %s7186_s27, %s7187_s23  }
  0xa0   :  { %s7188_s25 = smov [#allocation14]   ;;  %s7121_s5 = scalar_lea.hbm %s8460_s12, 32 }
  0xa1   :  { %s128_s1 = sshll.u32 %s7188_s25, 4  ;;  %p7122_p0 = scmp.ne.s32.totalorder %s8460_s12, %s7121_s5  ;;  %s129_s1 = int_to_ptr.vmem [resolvable:$true] %s128_s1 }
  0xa2   :  { %p7125_p1 = scmp.lt.u32.totalorder %s7121_s5, %s8460_s12 }
  0xa4   :  { %p7127_p2 = pnand %p7125_p1, %p7122_p0 }
  0xa6   :  { %7130 = shalt.err (!%p7127_p2)
}
  0xa7   :  { %s7131_s4 = scalar_lea.vmem %s129_s1, 32  ;;  %p7136_p4 = scmp.lt.s32.totalorder %s129_s1, %s129_s1 }
  0xa8   :  { %p7132_p3 = scmp.ne.s32.totalorder %s129_s1, %s7131_s4  ;;  %p7137_p5 = scmp.lt.s32.totalorder %s7131_s4, %s7131_s4 }
  0xaa   :  { %p7138_p6 = por %p7137_p5, %p7136_p4 }
  0xac   :  { %p7139_p7 = pnand %p7138_p6, %p7132_p3 }
  0xae   :  { %7142 = shalt.err (!%p7139_p7)
}
  0xaf   :  { %134 = dma.hbm_to_vmem [thread:$0]  %s8460_s12, 32, %s129_s1, [#allocation15], %s7186_s27, %s7186_s27, %s7187_s23  }
  0xb0   :  { %7165 = dma.done.wait [#allocation3], 128  }
  0xb1   :  { %7166 = vsyncadd [#allocation3], 4294967168 }
  0xb2   :  { %7167 = dma.done.wait [#allocation6], 160  }
  0xb3   :  { %7168 = vsyncadd [#allocation6], 4294967136 }
  0xb4   :  { %7169 = dma.done.wait [#allocation9], 256  }
  0xb5   :  { %7170 = vsyncadd [#allocation9], 4294967040 }
  0xb6   :  { %7171 = dma.done.wait [#allocation12], 48  }
  0xb7   :  { %7172 = vsyncadd [#allocation12], 4294967248 }
  0xb8   :  { %7173 = dma.done.wait [#allocation15], 32  }
  0xb9   :  { %7174 = vsyncadd [#allocation15], 4294967264  ;;  %v7189_v0 = vmov 0   ;;  %v7190_v1 = vmov 0.0   ;;  %v178_v2 = vlaneseq  ;;  %s8493_s21 = sld [smem:[#allocation24_spill]]  ;;  %vm210_vm0 = vcmask 1044480  }
  0xba   :  { %6820 = vset.pattern.permute.xlu0 %v7189_v0  ;;  %6535 = vmatprep.subr.bf16.mxu0 %v7190_v1  ;;  %v393_v7 = vld [vmem:[#allocation7] sm:$0x3]  ;;  %v6851_v10 = vld [vmem:[#allocation10] sm:$0x1f]   ;;  %v6852_v11 = vld [vmem:[#allocation8] sm:$0xff]   ;;  %vm7191_vm1 = vmmov 0  }
  0xbb   :  { %6541 = vmatprep.subr.bf16.mxu1 %v7190_v1  ;;  %v7452_v3 = vshrl.u32 %v178_v2, 7  ;;  %v7461_v8 = vmul.f32 -1e+09, %v393_v7  ;;  %v212_v12 = vsel %vm210_vm0, %v6851_v10, 0  ;;  %v6853_v13 = vld [vmem:[#allocation2] sm:$0xff]   ;;  %6537 = vmatprep.mubr.msk.bf16.mxu0 %vm7191_vm1, %v7190_v1  ;;  %vm266_vm2 = vcmask 130048  }
  0xbc   :  { %6536 = vmatpush3.bf16.msra.mxu0 %v212_v12  ;;  %6542 = vmatpush3.bf16.msra.mxu1 %v6852_v11  ;;  %v179_v14 = vand.u32 127, %v178_v2  ;;  %vm206_vm5 = vcmask 80896   ;;  %s8494_s1 = sld [smem:[#allocation29_spill]]  ;;  %vm334_vm6 = vcmask 1043456   ;;  %v6856_v23 = vld [vmem:[#allocation5] sm:$0xff]   ;;  %vm330_vm7 = vcmask 195584  }
  0xbd   :  { %v2461_v4 = vsub.s32 1, %v7452_v3  ;;  %6547 = vmatprep.subr.bf16.mxu0 %v7190_v1  ;;  %6555 = vmatprep.subr.bf16.mxu1 %v7190_v1  ;;  %v6857_v28 = vld [vmem:[%s8456_s8] sm:$0xff]   ;;  %v6858_v29 = vld [vmem:[%s8456_s8 + $0x8] sm:$0xff]   ;;  %vm418_vm8 = vcmask 261120   ;;  %s7192_s11 = smov 104   ;;  %s7193_s0 = smov 120  }
  0xbe   :  { %6543 = vmatprep.mubr.msk.bf16.mxu1 %vm7191_vm1, %v7190_v1  ;;  %v6276_v37 = vld [vmem:[#allocation11] ss:$0 sm:$0xff]  ;;  %v6277_v48 = vld [vmem:[%s8457_s9] ss:$0 sm:$0xff]  ;;  %s7194_s12 = smov 112   ;;  %s7195_s24 = smov 96  }
  0xbf   :  { %v180_v5 = vld [vmem:[%s8493_s21] sm:$0xff]  ;;  %v181_v6 = vld [vmem:[%s8493_s21 + $0x8] sm:$0xff]  ;;  %v7464_v9 = vrot.slane %v7461_v8, %v2461_v4  ;;  %6544 = vmatmul.mubr.msk.bf16.vlgmr.msra.gmra.mrb[0].mxu1 %vm266_vm2, %v6853_v13  ;;  %v7196_v58 = vmov 1983009808   ;;  %v7197_v61 = vmov 1934713408  }
  0xc0   :  { %183 = vperm.xlu0 %6820, %v180_v5   ;;  %6559 = vmatprep.mubr.msk.bf16.mxu1 %vm7191_vm1, %v7190_v1  ;;  %v476_v59 = vunpack.c.l.s4 %v7196_v58  ;;  %v508_v62 = vunpack.c.l.s4 %v7197_v61  ;;  %vm905_vm9 = vcmask 64512   ;;  %s7198_s25 = smov 8   ;;  %vm3183_vm10 = vcmask 523264  }
  0xc1   :  { %6556 = vmatpush3.bf16.msra.mxu1 %v6857_v28 }
  0xc2   :  { %v6854_v19 = vld [vmem:[%s8494_s1] sm:$0xff]   ;;  %v6855_v21 = vld [vmem:[%s8494_s1 + $0x8] ss:$0 sps:$4 sm:$0xff]   ;;  %6557 = vmatprep.subr.bf16.mxu1 %v7190_v1  ;;  %v477_v60 = vunpack.c.0.s8 %v476_v59  ;;  %s7199_s1 = smov 24  }
  0xc3   :  { %v336_v22 = vsel %vm334_vm6, %v6855_v21, 0 }
  0xc4   :  { %186 = vperm.xlu0 %6820, %v181_v6   ;;  %v7543_v2 = vsub.s32 %v477_v60, %v7452_v3  ;;  %v509_v6 = vunpack.c.0.s8 %v508_v62 }
  0xc5   :  { %6558 = vmatpush3.bf16.msra.mxu1 %v6858_v29 }
  0xc6   :  { %6563 = vmatprep.subr.mxu1 %v7190_v1  ;;  %v7554_v13 = vsub.s32 %v509_v6, %v7452_v3 }
 0x13f   :  { %v184_v15 = vpop.permute.xlu0 %183 }
 0x140   :  { %vm188_vm3 = vcmp.eq.s32.totalorder %v179_v14, %v184_v15 }
 0x141   :  { %v6265_v17 = vsel %vm188_vm3, 1.0, %v7190_v1 }
 0x143   :  { %v187_v16 = vpop.permute.xlu0 %186 }
 0x144   :  { %vm189_vm4 = vcmp.eq.s32.totalorder %v179_v14, %v187_v16 }
 0x145   :  { %v6266_v18 = vsel %vm189_vm4, 1.0, %v7190_v1 }
 0x146   :  { %v194_v20 = vpack.c.bf16 %v6266_v18, %v6265_v17 }
 0x148   :  { %6538 = vmatmul.mubr.msk.bf16.vlgmr.msra.gmra.mrb[0].mxu0 %vm206_vm5, %v194_v20 }
 0x149   :  { %6548 = vmatpush3.bf16.msra.mxu0 %v6854_v19  ;;  %6551 = vmatprep.mubr.msk.bf16.mxu0 %vm7191_vm1, %v7190_v1 }
 0x14a   :  { %6549 = vmatprep.subr.bf16.mxu0 %v7190_v1 }
 0x14d   :  { %6550 = vmatpush3.bf16.msra.mxu0 %v336_v22 }
 0x14e   :  { %6573 = vmatprep.subr.mxu0 %v7190_v1 }
 0x150   :  { %6552 = vmatmul.mubr.msk.bf16.vlgmr.msra.gmra.mrb[4].mxu0 %vm330_vm7, %v6856_v23 }
 0x151   :  { %6575 = vmatprep.mubr.msk.f32.mxu0 %vm7191_vm1, %v7190_v1 }
 0x192   :  { %v304_v24 = vpop.f32.mrb[0].mxu1 }
 0x193   :  { %v6545_v25 = vpop.f32.mrb[1].mxu1 }
 0x194   :  { %v307_v26 = vpop.f32.mrb[2].mxu1 }
 0x195   :  { %v6546_v27 = vpop.f32.mrb[3].mxu1 }
 0x21b   :  { %v248_v30 = vpop.f32.mrb[0].mxu0 }
 0x21c   :  { %v305_v31 = vadd.f32 %v304_v24, %v248_v30  ;;  %v6539_v32 = vpop.f32.mrb[1].mxu0 }
 0x21d   :  { %v251_v33 = vpop.f32.mrb[2].mxu0 }
 0x21e   :  { %v308_v34 = vadd.f32 %v307_v26, %v251_v33  ;;  %v6540_v35 = vpop.f32.mrb[3].mxu0 }
 0x223   :  { %v372_v36 = vpop.f32.mrb[4].mxu0 }
 0x224   :  { %v379_v38 = vadd.f32 %v372_v36, %v305_v31  ;;  %v6553_v39 = vpop.f32.mrb[5].mxu0 }
 0x225   :  { %v375_v40 = vpop.f32.mrb[6].mxu0 }
 0x226   :  { %v7498_v41 = vadd.f32 %v6276_v37, %v379_v38  ;;  %v380_v42 = vadd.f32 %v375_v40, %v308_v34  ;;  %v6554_v43 = vpop.f32.mrb[7].mxu0 }
 0x228   :  { %v7500_v44 = vadd.f32 %v6276_v37, %v380_v42  ;;  %v390_v45 = vmax.f32 %v7498_v41, 0.0  ;;  %v6861_v41 = vld [vmem:[%s8462_s14] sm:$0xff]  }
 0x22a   :  { %v391_v46 = vmax.f32 %v7500_v44, 0.0  ;;  %v6862_v44 = vld [vmem:[%s8462_s14 + $0x8] sm:$0xff]  }
 0x22c   :  { %v392_v47 = vpack.c.bf16 %v391_v46, %v390_v45 }
 0x22e   :  { %6560 = vmatmul.mubr.msk.bf16.vlgmr.msra.gmra.mrb[4].mxu1 %vm418_vm8, %v392_v47 }
 0x22f   :  { %6565 = vmatprep.mubr.msk.f32.mxu1 %vm7191_vm1, %v7190_v1 }
 0x301   :  { %v456_v49 = vpop.f32.mrb[4].mxu1 }
 0x302   :  { %v7514_v50 = vadd.f32 %v6277_v48, %v456_v49  ;;  %v6561_v51 = vpop.f32.mrb[5].mxu1 }
 0x303   :  { %v459_v52 = vpop.f32.mrb[6].mxu1 }
 0x304   :  { %v7516_v53 = vadd.f32 %v6277_v48, %v459_v52  ;;  %470 = vrot.lane.b32.xlu0 %v7514_v50, %s7192_s11  ;;  %464 = vrot.lane.b32.xlu1 %v7514_v50, %s7193_s0  ;;  %v6562_v54 = vpop.f32.mrb[7].mxu1 }
 0x308   :  { %467 = vrot.lane.b32.xlu1 %v7514_v50, %s7194_s12 }
 0x30c   :  { %609 = vrot.lane.b32.xlu1 %v7514_v50, %s7195_s24 }
 0x376   :  { %v7526_v55 = vpop.permute.xlu1 %464  ;;  %v7530_v56 = vpop.permute.xlu0 %470 }
 0x377   :  { %611 = vrot.lane.b32.xlu0 %v7526_v55, %s7195_s24  ;;  %v489_v4 = vcombine.low %v7526_v55, %v7530_v56  ;;  %v490_v5 = vcombine.high %v7526_v55, %v7530_v56 }
 0x379   :  { %v497_v11 = vrot.slane %v489_v4, %v7543_v2  ;;  %v504_v12 = vrot.slane %v490_v5, %v7543_v2 }
 0x37a   :  { %v7532_v57 = vpop.permute.xlu1 %467 }
 0x37b   :  { %615 = vrot.lane.b32.xlu0 %v7530_v56, %s7195_s24  ;;  %613 = vrot.lane.b32.xlu1 %v7532_v57, %s7195_s24  ;;  %v473_v63 = vcombine.low %v7514_v50, %v7532_v57  ;;  %v474_v0 = vcombine.high %v7514_v50, %v7532_v57 }
 0x37d   :  { %v481_v7 = vrot.slane %v473_v63, %v7543_v2  ;;  %v488_v10 = vrot.slane %v474_v0, %v7543_v2 }
 0x37e   :  { %v610_v18 = vpop.permute.xlu1 %609 }
 0x37f   :  { %v505_v14 = vcombine.low %v481_v7, %v497_v11  ;;  %v506_v15 = vcombine.high %v481_v7, %v497_v11  ;;  %v521_v16 = vcombine.low %v488_v10, %v504_v12  ;;  %v522_v17 = vcombine.high %v488_v10, %v504_v12 }
 0x381   :  { %v513_v20 = vrot.slane %v505_v14, %v7554_v13  ;;  %v520_v21 = vrot.slane %v506_v15, %v7554_v13  ;;  %v529_v22 = vrot.slane %v521_v16, %v7554_v13  ;;  %v536_v23 = vrot.slane %v522_v17, %v7554_v13 }
 0x383   :  { %v541_v34 = vcombine.low %v513_v20, %v520_v21  ;;  %v6281_v35 = vcombine.high %v513_v20, %v520_v21  ;;  %v557_v36 = vcombine.low %v529_v22, %v536_v23  ;;  %v6282_v37 = vcombine.high %v529_v22, %v536_v23 }
 0x385   :  { %v548_v51 = vrot.slane %v541_v34, %v7543_v2  ;;  %v556_v52 = vrot.slane %v6281_v35, %v7543_v2  ;;  %v564_v54 = vrot.slane %v557_v36, %v7543_v2  ;;  %v572_v58 = vrot.slane %v6282_v37, %v7543_v2 }
 0x387   :  { %v573_v6 = vcombine.low %v548_v51, %v556_v52  ;;  %v589_v7 = vcombine.low %v564_v54, %v572_v58  ;;  %v574_v10 = vcombine.high %v548_v51, %v556_v52  ;;  %v590_v11 = vcombine.high %v564_v54, %v572_v58 }
 0x389   :  { %v581_v21 = vrot.slane %v573_v6, %v7554_v13  ;;  %v597_v22 = vrot.slane %v589_v7, %v7554_v13  ;;  %v588_v23 = vrot.slane %v574_v10, %v7554_v13 }
 0x3e9   :  { %v612_v19 = vpop.permute.xlu0 %611 }
 0x3ed   :  { %v616_v24 = vpop.permute.xlu0 %615  ;;  %v614_v25 = vpop.permute.xlu1 %613 }
 0x3ee   :  { %v637_v26 = vcombine.low %v612_v19, %v616_v24  ;;  %v638_v27 = vcombine.high %v612_v19, %v616_v24  ;;  %v621_v28 = vcombine.low %v610_v18, %v614_v25  ;;  %v622_v29 = vcombine.high %v610_v18, %v614_v25 }
 0x3ef   :  { %v604_v24 = vrot.slane %v590_v11, %v7554_v13 }
 0x3f0   :  { %v645_v30 = vrot.slane %v637_v26, %v7543_v2  ;;  %v652_v31 = vrot.slane %v638_v27, %v7543_v2  ;;  %v629_v32 = vrot.slane %v621_v28, %v7543_v2  ;;  %v636_v33 = vrot.slane %v622_v29, %v7543_v2 }
 0x3f1   :  { %v605_v27 = vcombine.low %v581_v21, %v597_v22  ;;  %v607_v28 = vcombine.low %v588_v23, %v604_v24 }
 0x3f2   :  { %v653_v38 = vcombine.low %v629_v32, %v645_v30  ;;  %v654_v39 = vcombine.high %v629_v32, %v645_v30  ;;  %v669_v40 = vcombine.low %v636_v33, %v652_v31  ;;  %v670_v42 = vcombine.high %v636_v33, %v652_v31 }
 0x3f3   :  { %v606_v30 = vcombine.high %v581_v21, %v597_v22  ;;  %v608_v32 = vcombine.high %v588_v23, %v604_v24  ;;  %v1216_v33 = vsub.s32 0, %v7452_v3 }
 0x3f4   :  { %v661_v43 = vrot.slane %v653_v38, %v7554_v13  ;;  %v668_v47 = vrot.slane %v654_v39, %v7554_v13  ;;  %v677_v48 = vrot.slane %v669_v40, %v7554_v13  ;;  %v684_v49 = vrot.slane %v670_v42, %v7554_v13 }
 0x3f5   :  { %v7606_v34 = vrot.slane %v7461_v8, %v1216_v33 }
 0x3f6   :  { %v689_v59 = vcombine.low %v661_v43, %v668_v47  ;;  %v6283_v60 = vcombine.high %v661_v43, %v668_v47  ;;  %v705_v61 = vcombine.low %v677_v48, %v684_v49  ;;  %v6284_v62 = vcombine.high %v677_v48, %v684_v49 }
 0x3f8   :  { %v696_v63 = vrot.slane %v689_v59, %v7543_v2  ;;  %v704_v0 = vrot.slane %v6283_v60, %v7543_v2  ;;  %v712_v4 = vrot.slane %v705_v61, %v7543_v2  ;;  %v720_v5 = vrot.slane %v6284_v62, %v7543_v2 }
 0x3fa   :  { %v721_v12 = vcombine.low %v696_v63, %v704_v0  ;;  %v722_v14 = vcombine.high %v696_v63, %v704_v0  ;;  %v737_v15 = vcombine.low %v712_v4, %v720_v5  ;;  %v738_v16 = vcombine.high %v712_v4, %v720_v5 }
 0x3fc   :  { %v729_v17 = vrot.slane %v721_v12, %v7554_v13  ;;  %v745_v18 = vrot.slane %v737_v15, %v7554_v13  ;;  %v736_v19 = vrot.slane %v722_v14, %v7554_v13  ;;  %v752_v20 = vrot.slane %v738_v16, %v7554_v13 }
 0x3fe   :  { %v753_v25 = vcombine.low %v729_v17, %v745_v18  ;;  %v755_v26 = vcombine.low %v736_v19, %v752_v20  ;;  %v754_v29 = vcombine.high %v729_v17, %v745_v18  ;;  %v756_v31 = vcombine.high %v736_v19, %v752_v20 }
 0x400   :  { %6564 = vmatpush3.xpose.msk.msra.mxu1 %vm905_vm9, %v753_v25  ;;  %6574 = vmatpush3.xpose.msk.msra.mxu0 %vm905_vm9, %v755_v26 }
 0x401   :  { %6568 = vmatprep.subr.mxu1 %v7190_v1  ;;  %6583 = vmatprep.subr.mxu0 %v7190_v1 }
 0x403   :  { %6566 = vmatmul.mubr.msk.f32.vlgmr.msra.gmra.mrb[8].mxu1 %vm905_vm9, %v605_v27  ;;  %6576 = vmatmul.mubr.msk.f32.vlgmr.msra.gmra.mrb[8].mxu0 %vm905_vm9, %v607_v28 }
 0x404   :  { %6569 = vmatpush3.xpose.msk.msra.mxu1 %vm905_vm9, %v754_v29  ;;  %6570 = vmatprep.mubr.msk.f32.mxu1 %vm7191_vm1, %v7190_v1 }
 0x405   :  { %6578 = vmatprep.subr.mxu1 %v7190_v1  ;;  %6585 = vmatprep.mubr.msk.f32.mxu0 %vm7191_vm1, %v7190_v1 }
 0x407   :  { %6571 = vmatmul.mubr.msk.f32.vlgmr.msra.gmra.mrb[10].mxu1 %vm905_vm9, %v606_v30 }
 0x408   :  { %6579 = vmatpush3.xpose.msk.msra.mxu1 %vm905_vm9, %v756_v31  ;;  %6580 = vmatprep.mubr.msk.f32.mxu1 %vm7191_vm1, %v7190_v1 }
 0x409   :  { %6588 = vmatprep.subr.mxu1 %v7190_v1 }
 0x40b   :  { %6581 = vmatmul.mubr.msk.f32.vlgmr.msra.gmra.mrb[12].mxu1 %vm905_vm9, %v608_v32 }
 0x40c   :  { %6590 = vmatprep.mubr.msk.f32.mxu1 %vm7191_vm1, %v7190_v1 }
 0x4d6   :  { %v978_v35 = vpop.f32.mrb[8].mxu1  ;;  %v1130_v36 = vpop.f32.mrb[8].mxu0 }
 0x4d7   :  { %v1210_v37 = vmul.f32 0.35355338, %v978_v35  ;;  %v6567_v38 = vpop.f32.mrb[9].mxu1  ;;  %v6577_v39 = vpop.f32.mrb[9].mxu0  ;;  %v1212_v43 = vmul.f32 0.35355338, %v1130_v36 }
 0x4d9   :  { %v1218_v40 = vadd.f32 %v7606_v34, %v1210_v37  ;;  %v1220_v54 = vadd.f32 %v7606_v34, %v1212_v43 }
 0x4da   :  { %v1054_v42 = vpop.f32.mrb[10].mxu1 }
 0x4db   :  { %v1211_v47 = vmul.f32 0.35355338, %v1054_v42  ;;  %v6572_v48 = vpop.f32.mrb[11].mxu1  ;;  %v1222_v49 = vsel %vm905_vm9, %v1218_v40, -inf  ;;  %v1228_v58 = vsel %vm905_vm9, %v1220_v54, -inf }
 0x4dc   :  { %1223 = vmax.xlane.f32.xlu1 %v1222_v49 }
 0x4dd   :  { %v1219_v51 = vadd.f32 %v7606_v34, %v1211_v47 }
 0x4de   :  { %v1206_v3 = vpop.f32.mrb[12].mxu1 }
 0x4df   :  { %v6582_v52 = vpop.f32.mrb[13].mxu1  ;;  %v1225_v8 = vsel %vm905_vm9, %v1219_v51, -inf  ;;  %v1213_v59 = vmul.f32 0.35355338, %v1206_v3 }
 0x4e0   :  { %1226 = vmax.xlane.f32.xlu0 %v1225_v8 }
 0x4e1   :  { %v1221_v60 = vadd.f32 %v7606_v34, %v1213_v59 }
 0x4e3   :  { %v1231_v61 = vsel %vm905_vm9, %v1221_v60, -inf }
 0x4e4   :  { %1229 = vmax.xlane.f32.xlu0 %v1228_v58 }
 0x4ed   :  { %1713 = vrot.lane.b32.xlu1 %v7516_v53, %s7194_s12 }
 0x4f1   :  { %1716 = vrot.lane.b32.xlu1 %v7516_v53, %s7192_s11 }
 0x4fa   :  { %1710 = vrot.lane.b32.xlu0 %v7516_v53, %s7193_s0 }
 0x4fe   :  { %759 = vrot.lane.b32.xlu0 %v7526_v55, %s7179_s2 }
 0x502   :  { %1855 = vrot.lane.b32.xlu0 %v7516_v53, %s7195_s24 }
 0x515   :  { %1232 = vmax.xlane.f32.xlu1 %v1231_v61 }
 0x526   :  { %757 = vrot.lane.b32.xlu1 %v7514_v50, %s7179_s2 }
 0x52a   :  { %761 = vrot.lane.b32.xlu1 %v7532_v57, %s7179_s2 }
 0x52e   :  { %763 = vrot.lane.b32.xlu1 %v7530_v56, %s7179_s2 }
 0x569   :  { %v1224_v62 = vpop.xlane.xlu1 %1223 }
 0x56a   :  { %v1234_v55 = vsub.f32 %v1218_v40, %v1224_v62 }
 0x56c   :  { %v1238_v63 = vmul.f32 1.442695, %v1234_v55 }
 0x56d   :  { %v1227_v0 = vpop.xlane.xlu0 %1226  ;;  %v7646_v15 = vpop.permute.xlu1 %1713 }
 0x56e   :  { %6879 = vpow2.f32 %v1238_v63  ;;  %v1235_v11 = vsub.f32 %v1219_v51, %v1227_v0 }
 0x570   :  { %v1240_v12 = vmul.f32 1.442695, %v1235_v11 }
 0x571   :  { %v1230_v4 = vpop.xlane.xlu0 %1229  ;;  %v7650_v17 = vpop.permute.xlu1 %1716 }
 0x572   :  { %v1236_v5 = vsub.f32 %v1220_v54, %v1230_v4 }
 0x574   :  { %v1242_v6 = vmul.f32 1.442695, %v1236_v5 }
 0x575   :  { %v7632_v7 = vpop.permute.xlu0 %1710 }
 0x576   :  { %6881 = vpow2.f32 %v1242_v6  ;;  %1857 = vrot.lane.b32.xlu1 %v7632_v7, %s7195_s24 }
 0x577   :  { %6883 = vpow2.f32 %v1240_v12 }
 0x578   :  { %v7636_v50 = vpop.eup %6879 }
 0x579   :  { %v1246_v57 = vsel %vm905_vm9, %v7636_v50, 0.0  ;;  %v760_v25 = vpop.permute.xlu0 %759 }
 0x57a   :  { %1247 = vadd.xlane.f32.xlu0 %v1246_v57 }
 0x57d   :  { %v1856_v11 = vpop.permute.xlu0 %1855 }
 0x580   :  { %v7640_v56 = vpop.eup %6881 }
 0x581   :  { %v1252_v10 = vsel %vm905_vm9, %v7640_v56, 0.0  ;;  %v7644_v14 = vpop.eup %6883 }
 0x582   :  { %1253 = vadd.xlane.f32.xlu0 %v1252_v10  ;;  %v1249_v16 = vsel %vm905_vm9, %v7644_v14, 0.0 }
 0x59a   :  { %1250 = vadd.xlane.f32.xlu1 %v1249_v16 }
 0x5a2   :  { %v1233_v18 = vpop.xlane.xlu1 %1232 }
 0x5a3   :  { %v1237_v19 = vsub.f32 %v1221_v60, %v1233_v18 }
 0x5a5   :  { %v1244_v20 = vmul.f32 1.442695, %v1237_v19 }
 0x5a6   :  { %v758_v21 = vpop.permute.xlu1 %757 }
 0x5a7   :  { %6885 = vpow2.f32 %v1244_v20 }
 0x5aa   :  { %v762_v22 = vpop.permute.xlu1 %761 }
 0x5ab   :  { %1861 = vrot.lane.b32.xlu1 %v7650_v17, %s7195_s24  ;;  %v769_v23 = vcombine.low %v758_v21, %v762_v22  ;;  %v770_v24 = vcombine.high %v758_v21, %v762_v22 }
 0x5ad   :  { %v777_v30 = vrot.slane %v769_v23, %v7543_v2  ;;  %v784_v31 = vrot.slane %v770_v24, %v7543_v2 }
 0x5ae   :  { %v764_v26 = vpop.permute.xlu1 %763 }
 0x5af   :  { %v785_v27 = vcombine.low %v760_v25, %v764_v26  ;;  %v786_v28 = vcombine.high %v760_v25, %v764_v26  ;;  %v1735_v25 = vcombine.low %v7632_v7, %v7650_v17  ;;  %v1736_v26 = vcombine.high %v7632_v7, %v7650_v17 }
 0x5b1   :  { %v7654_v29 = vpop.eup %6885  ;;  %v793_v32 = vrot.slane %v785_v27, %v7543_v2  ;;  %v800_v33 = vrot.slane %v786_v28, %v7543_v2  ;;  %v1743_v27 = vrot.slane %v1735_v25, %v7543_v2 }
 0x5b2   :  { %v1255_v35 = vsel %vm905_vm9, %v7654_v29, 0.0 }
 0x5b3   :  { %v801_v36 = vcombine.low %v777_v30, %v793_v32  ;;  %v802_v37 = vcombine.high %v777_v30, %v793_v32  ;;  %v817_v38 = vcombine.low %v784_v31, %v800_v33  ;;  %v818_v39 = vcombine.high %v784_v31, %v800_v33  ;;  %1256 = vadd.xlane.f32.xlu0 %v1255_v35 }
 0x5b4   :  { %v1750_v30 = vrot.slane %v1736_v26, %v7543_v2 }
 0x5b5   :  { %v809_v40 = vrot.slane %v801_v36, %v7554_v13  ;;  %v816_v42 = vrot.slane %v802_v37, %v7554_v13  ;;  %v825_v43 = vrot.slane %v817_v38, %v7554_v13  ;;  %v832_v47 = vrot.slane %v818_v39, %v7554_v13 }
 0x5b7   :  { %v837_v48 = vcombine.low %v809_v40, %v816_v42  ;;  %v6285_v49 = vcombine.high %v809_v40, %v816_v42  ;;  %v853_v51 = vcombine.low %v825_v43, %v832_v47  ;;  %v6286_v3 = vcombine.high %v825_v43, %v832_v47 }
 0x5b9   :  { %v844_v52 = vrot.slane %v837_v48, %v7543_v2  ;;  %v852_v8 = vrot.slane %v6285_v49, %v7543_v2  ;;  %v860_v54 = vrot.slane %v853_v51, %v7543_v2  ;;  %v868_v58 = vrot.slane %v6286_v3, %v7543_v2 }
 0x5bb   :  { %v869_v59 = vcombine.low %v844_v52, %v852_v8  ;;  %v885_v60 = vcombine.low %v860_v54, %v868_v58  ;;  %v870_v61 = vcombine.high %v844_v52, %v852_v8  ;;  %v886_v62 = vcombine.high %v860_v54, %v868_v58 }
 0x5bd   :  { %v877_v55 = vrot.slane %v869_v59, %v7554_v13  ;;  %v893_v63 = vrot.slane %v885_v60, %v7554_v13  ;;  %v884_v0 = vrot.slane %v870_v61, %v7554_v13  ;;  %v900_v4 = vrot.slane %v886_v62, %v7554_v13 }
 0x5bf   :  { %v901_v5 = vcombine.low %v877_v55, %v893_v63  ;;  %v902_v6 = vcombine.high %v877_v55, %v893_v63  ;;  %v903_v57 = vcombine.low %v884_v0, %v900_v4  ;;  %v904_v10 = vcombine.high %v884_v0, %v900_v4 }
 0x5c1   :  { %6584 = vmatpush3.msra.mxu0 %v901_v5  ;;  %6589 = vmatpush3.msra.mxu1 %v902_v6 }
 0x5c2   :  { %6593 = vmatprep.subr.mxu0 %v7190_v1  ;;  %6598 = vmatprep.subr.mxu1 %v7190_v1 }
 0x5c9   :  { %1859 = vrot.lane.b32.xlu0 %v7646_v15, %s7195_s24 }
 0x5e8   :  { %v1858_v22 = vpop.permute.xlu1 %1857 }
 0x607   :  { %v1248_v12 = vpop.xlane.xlu0 %1247 }
 0x608   :  { %6887 = vrcp.f32 %v1248_v12 }
 0x60f   :  { %v1254_v16 = vpop.xlane.xlu0 %1253 }
 0x610   :  { %6889 = vrcp.f32 %v1254_v16 }
 0x612   :  { %v6888_v18 = vpop.eup %6887 }
 0x613   :  { %v1259_v19 = vmul.f32 %v6888_v18, %v7636_v50 }
 0x615   :  { %6586 = vmatmul.mubr.msk.f32.vlgmr.msra.gmra.mrb[10].mxu0 %vm905_vm9, %v1259_v19 }
 0x616   :  { %6594 = vmatpush3.msra.mxu0 %v903_v57  ;;  %6595 = vmatprep.mubr.msk.f32.mxu0 %vm7191_vm1, %v7190_v1 }
 0x617   :  { %6603 = vmatprep.subr.mxu0 %v7190_v1 }
 0x61a   :  { %v6890_v20 = vpop.eup %6889 }
 0x61b   :  { %v1263_v21 = vmul.f32 %v6890_v20, %v7640_v56  ;;  %v1719_v56 = vcombine.low %v7516_v53, %v7646_v15 }
 0x61d   :  { %6596 = vmatmul.mubr.msk.f32.vlgmr.msra.gmra.mrb[12].mxu0 %vm905_vm9, %v1263_v21  ;;  %v1727_v28 = vrot.slane %v1719_v56, %v7543_v2 }
 0x61e   :  { %6605 = vmatprep.mubr.msk.f32.mxu0 %vm7191_vm1, %v7190_v1 }
 0x61f   :  { %v1751_v32 = vcombine.low %v1727_v28, %v1743_v27  ;;  %v1752_v33 = vcombine.high %v1727_v28, %v1743_v27 }
 0x621   :  { %v1759_v39 = vrot.slane %v1751_v32, %v7554_v13  ;;  %v1766_v40 = vrot.slane %v1752_v33, %v7554_v13 }
 0x623   :  { %v1787_v52 = vcombine.low %v1759_v39, %v1766_v40  ;;  %v6301_v60 = vcombine.high %v1759_v39, %v1766_v40 }
 0x625   :  { %v1794_v5 = vrot.slane %v1787_v52, %v7543_v2  ;;  %v1802_v16 = vrot.slane %v6301_v60, %v7543_v2 }
 0x627   :  { %v1251_v23 = vpop.xlane.xlu1 %1250 }
 0x628   :  { %6891 = vrcp.f32 %v1251_v23 }
 0x62b   :  { %v1862_v37 = vpop.permute.xlu1 %1861 }
 0x62c   :  { %v1883_v42 = vcombine.low %v1858_v22, %v1862_v37  ;;  %v1884_v43 = vcombine.high %v1858_v22, %v1862_v37 }
 0x62e   :  { %v1891_v8 = vrot.slane %v1883_v42, %v7543_v2  ;;  %v1898_v54 = vrot.slane %v1884_v43, %v7543_v2 }
 0x632   :  { %v6892_v50 = vpop.eup %6891 }
 0x633   :  { %v1261_v24 = vmul.f32 %v6892_v50, %v7644_v14  ;;  %v1720_v14 = vcombine.high %v7516_v53, %v7646_v15 }
 0x635   :  { %6591 = vmatmul.mubr.msk.f32.vlgmr.msra.gmra.mrb[14].mxu1 %vm905_vm9, %v1261_v24  ;;  %v1734_v31 = vrot.slane %v1720_v14, %v7543_v2  ;;  %v1819_v14 = vcombine.low %v1794_v5, %v1802_v16 }
 0x636   :  { %6599 = vmatpush3.msra.mxu1 %v904_v10  ;;  %6600 = vmatprep.mubr.msk.f32.mxu1 %vm7191_vm1, %v7190_v1 }
 0x637   :  { %6608 = vmatprep.subr.mxu1 %v7190_v1  ;;  %v1767_v35 = vcombine.low %v1734_v31, %v1750_v30  ;;  %v1768_v36 = vcombine.high %v1734_v31, %v1750_v30 }
 0x639   :  { %v1775_v47 = vrot.slane %v1767_v35, %v7554_v13  ;;  %v1782_v48 = vrot.slane %v1768_v36, %v7554_v13  ;;  %v1820_v35 = vcombine.high %v1794_v5, %v1802_v16  ;;  %v1827_v36 = vrot.slane %v1819_v14, %v7554_v13 }
 0x63b   :  { %v1803_v61 = vcombine.low %v1775_v47, %v1782_v48  ;;  %v6302_v62 = vcombine.high %v1775_v47, %v1782_v48  ;;  %v1834_v47 = vrot.slane %v1820_v35, %v7554_v13 }
 0x63d   :  { %v1810_v18 = vrot.slane %v1803_v61, %v7543_v2  ;;  %v1818_v19 = vrot.slane %v6302_v62, %v7543_v2 }
 0x63f   :  { %v1835_v27 = vcombine.low %v1810_v18, %v1818_v19 }
 0x640   :  { %v1257_v38 = vpop.xlane.xlu0 %1256 }
 0x641   :  { %6893 = vrcp.f32 %v1257_v38  ;;  %v1843_v37 = vrot.slane %v1835_v27, %v7554_v13  ;;  %v1836_v38 = vcombine.high %v1810_v18, %v1818_v19 }
 0x643   :  { %v1851_v48 = vcombine.low %v1827_v36, %v1843_v37 }
 0x644   :  { %v1860_v49 = vpop.permute.xlu0 %1859 }
 0x645   :  { %v1867_v51 = vcombine.low %v1856_v11, %v1860_v49  ;;  %v1868_v3 = vcombine.high %v1856_v11, %v1860_v49  ;;  %v1852_v49 = vcombine.high %v1827_v36, %v1843_v37 }
 0x647   :  { %v1875_v58 = vrot.slane %v1867_v51, %v7543_v2  ;;  %v1882_v59 = vrot.slane %v1868_v3, %v7543_v2  ;;  %v1850_v51 = vrot.slane %v1836_v38, %v7554_v13 }
 0x649   :  { %v1899_v55 = vcombine.low %v1875_v58, %v1891_v8  ;;  %v1900_v63 = vcombine.high %v1875_v58, %v1891_v8  ;;  %v1915_v0 = vcombine.low %v1882_v59, %v1898_v54  ;;  %v1916_v4 = vcombine.high %v1882_v59, %v1898_v54 }
 0x64a   :  { %v1853_v8 = vcombine.low %v1834_v47, %v1850_v51  ;;  %v1854_v54 = vcombine.high %v1834_v47, %v1850_v51 }
 0x64b   :  { %v6894_v6 = vpop.eup %6893  ;;  %v1907_v57 = vrot.slane %v1899_v55, %v7554_v13  ;;  %v1914_v10 = vrot.slane %v1900_v63, %v7554_v13  ;;  %v1923_v11 = vrot.slane %v1915_v0, %v7554_v13  ;;  %v1930_v12 = vrot.slane %v1916_v4, %v7554_v13 }
 0x64c   :  { %v1265_v20 = vmul.f32 %v6894_v6, %v7654_v29 }
 0x64d   :  { %v1935_v21 = vcombine.low %v1907_v57, %v1914_v10  ;;  %v6303_v22 = vcombine.high %v1907_v57, %v1914_v10  ;;  %v1951_v23 = vcombine.low %v1923_v11, %v1930_v12  ;;  %v6304_v50 = vcombine.high %v1923_v11, %v1930_v12 }
 0x64e   :  { %6601 = vmatmul.mubr.msk.f32.vlgmr.msra.gmra.mrb[16].mxu1 %vm905_vm9, %v1265_v20 }
 0x64f   :  { %v1942_v24 = vrot.slane %v1935_v21, %v7543_v2  ;;  %v1950_v25 = vrot.slane %v6303_v22, %v7543_v2  ;;  %v1958_v56 = vrot.slane %v1951_v23, %v7543_v2  ;;  %v1966_v26 = vrot.slane %v6304_v50, %v7543_v2  ;;  %6610 = vmatprep.mubr.msk.f32.mxu1 %vm7191_vm1, %v7190_v1 }
 0x651   :  { %v1967_v29 = vcombine.low %v1942_v24, %v1950_v25  ;;  %v1968_v28 = vcombine.high %v1942_v24, %v1950_v25  ;;  %v1983_v30 = vcombine.low %v1958_v56, %v1966_v26  ;;  %v1984_v31 = vcombine.high %v1958_v56, %v1966_v26 }
 0x653   :  { %v1975_v32 = vrot.slane %v1967_v29, %v7554_v13  ;;  %v1991_v33 = vrot.slane %v1983_v30, %v7554_v13  ;;  %v1982_v42 = vrot.slane %v1968_v28, %v7554_v13  ;;  %v1998_v43 = vrot.slane %v1984_v31, %v7554_v13 }
 0x655   :  { %v1999_v39 = vcombine.low %v1975_v32, %v1991_v33  ;;  %v2000_v40 = vcombine.high %v1975_v32, %v1991_v33  ;;  %v2001_v3 = vcombine.low %v1982_v42, %v1998_v43  ;;  %v2002_v52 = vcombine.high %v1982_v42, %v1998_v43 }
 0x657   :  { %6604 = vmatpush3.xpose.msk.msra.mxu0 %vm905_vm9, %v1999_v39  ;;  %6609 = vmatpush3.xpose.msk.msra.mxu1 %vm905_vm9, %v2000_v40 }
 0x658   :  { %6613 = vmatprep.subr.mxu0 %v7190_v1  ;;  %6618 = vmatprep.subr.mxu1 %v7190_v1 }
 0x65a   :  { %6606 = vmatmul.mubr.msk.f32.vlgmr.msra.gmra.mrb[14].mxu0 %vm905_vm9, %v1851_v48  ;;  %6611 = vmatmul.mubr.msk.f32.vlgmr.msra.gmra.mrb[18].mxu1 %vm905_vm9, %v1852_v49 }
 0x65b   :  { %6614 = vmatpush3.xpose.msk.msra.mxu0 %vm905_vm9, %v2001_v3  ;;  %6619 = vmatpush3.xpose.msk.msra.mxu1 %vm905_vm9, %v2002_v52 }
 0x65c   :  { %6615 = vmatprep.mubr.msk.f32.mxu0 %vm7191_vm1, %v7190_v1  ;;  %6620 = vmatprep.mubr.msk.f32.mxu1 %vm7191_vm1, %v7190_v1 }
 0x65d   :  { %6623 = vmatprep.subr.mxu0 %v7190_v1  ;;  %6628 = vmatprep.subr.mxu1 %v7190_v1 }
 0x65e   :  { %6616 = vmatmul.mubr.msk.f32.vlgmr.msra.gmra.mrb[16].mxu0 %vm905_vm9, %v1853_v8  ;;  %6621 = vmatmul.mubr.msk.f32.vlgmr.msra.gmra.mrb[20].mxu1 %vm905_vm9, %v1854_v54 }
 0x65f   :  { %6625 = vmatprep.mubr.msk.f32.mxu0 %vm7191_vm1, %v7190_v1  ;;  %6630 = vmatprep.mubr.msk.f32.mxu1 %vm7191_vm1, %v7190_v1 }
 0x6e8   :  { %v1335_v58 = vpop.f32.mrb[10].mxu0 }
 0x6e9   :  { %v6587_v59 = vpop.f32.mrb[11].mxu0 }
 0x6f0   :  { %v1481_v60 = vpop.f32.mrb[12].mxu0 }
 0x6f1   :  { %v1558_v61 = vcombine.low %v1335_v58, %v1481_v60  ;;  %v1559_v62 = vcombine.high %v1335_v58, %v1481_v60  ;;  %v6597_v55 = vpop.f32.mrb[13].mxu0 }
 0x6f3   :  { %v1566_v10 = vrot.slane %v1558_v61, %v7543_v2  ;;  %v1573_v11 = vrot.slane %v1559_v62, %v7543_v2 }
 0x708   :  { %v1408_v63 = vpop.f32.mrb[14].mxu1 }
 0x709   :  { %v6592_v0 = vpop.f32.mrb[15].mxu1 }
 0x721   :  { %v1554_v4 = vpop.f32.mrb[16].mxu1 }
 0x722   :  { %v1574_v5 = vcombine.low %v1408_v63, %v1554_v4  ;;  %v1575_v6 = vcombine.high %v1408_v63, %v1554_v4  ;;  %v6602_v57 = vpop.f32.mrb[17].mxu1 }
 0x724   :  { %v1582_v12 = vrot.slane %v1574_v5, %v7543_v2  ;;  %v1589_v16 = vrot.slane %v1575_v6, %v7543_v2 }
 0x726   :  { %v1590_v18 = vcombine.low %v1566_v10, %v1582_v12  ;;  %v1591_v19 = vcombine.high %v1566_v10, %v1582_v12  ;;  %v1606_v20 = vcombine.low %v1573_v11, %v1589_v16  ;;  %v1607_v21 = vcombine.high %v1573_v11, %v1589_v16 }
 0x728   :  { %v1598_v22 = vrot.slane %v1590_v18, %v7554_v13  ;;  %v1605_v23 = vrot.slane %v1591_v19, %v7554_v13  ;;  %v1614_v50 = vrot.slane %v1606_v20, %v7554_v13  ;;  %v1621_v24 = vrot.slane %v1607_v21, %v7554_v13 }
 0x72a   :  { %v1626_v25 = vcombine.low %v1598_v22, %v1605_v23  ;;  %v6299_v56 = vcombine.high %v1598_v22, %v1605_v23  ;;  %v1642_v26 = vcombine.low %v1614_v50, %v1621_v24  ;;  %v6300_v14 = vcombine.high %v1614_v50, %v1621_v24 }
 0x72c   :  { %v1633_v27 = vrot.slane %v1626_v25, %v7543_v2  ;;  %v1641_v29 = vrot.slane %v6299_v56, %v7543_v2  ;;  %v1649_v28 = vrot.slane %v1642_v26, %v7543_v2  ;;  %v1657_v30 = vrot.slane %v6300_v14, %v7543_v2 }
 0x72d   :  { %v2223_v31 = vpop.f32.mrb[14].mxu0  ;;  %v2299_v32 = vpop.f32.mrb[18].mxu1 }
 0x72e   :  { %v2455_v33 = vmul.f32 0.35355338, %v2223_v31  ;;  %v2456_v35 = vmul.f32 0.35355338, %v2299_v32  ;;  %v6607_v36 = vpop.f32.mrb[15].mxu0  ;;  %v6612_v37 = vpop.f32.mrb[19].mxu1  ;;  %v1659_v38 = vcombine.high %v1633_v27, %v1641_v29  ;;  %v1675_v39 = vcombine.high %v1649_v28, %v1657_v30 }
 0x72f   :  { %v1658_v40 = vcombine.low %v1633_v27, %v1641_v29  ;;  %v1674_v42 = vcombine.low %v1649_v28, %v1657_v30 }
 0x730   :  { %v2464_v43 = vadd.f32 %v7464_v9, %v2456_v35  ;;  %v2463_v47 = vadd.f32 %v7464_v9, %v2455_v33  ;;  %v7771_v48 = vrot.slane %v1659_v38, %v7554_v13  ;;  %v7774_v49 = vrot.slane %v1675_v39, %v7554_v13 }
 0x731   :  { %v2375_v51 = vpop.f32.mrb[16].mxu0  ;;  %v2451_v3 = vpop.f32.mrb[20].mxu1  ;;  %v7777_v52 = vrot.slane %v1658_v40, %v7554_v13  ;;  %v7780_v8 = vrot.slane %v1674_v42, %v7554_v13 }
 0x732   :  { %v2457_v54 = vmul.f32 0.35355338, %v2375_v51  ;;  %v2458_v58 = vmul.f32 0.35355338, %v2451_v3  ;;  %v6617_v59 = vpop.f32.mrb[17].mxu0  ;;  %v6622_v60 = vpop.f32.mrb[21].mxu1  ;;  %v1692_v61 = vcombine.low %v7771_v48, %v7774_v49  ;;  %v1693_v62 = vcombine.high %v7771_v48, %v7774_v49 }
 0x733   :  { %v2470_v55 = vsel %vm905_vm9, %v2464_v43, -inf  ;;  %v2467_v63 = vsel %vm905_vm9, %v2463_v47, -inf  ;;  %v1690_v0 = vcombine.low %v7777_v52, %v7780_v8  ;;  %v1691_v4 = vcombine.high %v7777_v52, %v7780_v8  ;;  %v6321_v52 = vld [vmem:[#allocation13] ss:$0 sm:$0xff] }
 0x734   :  { %2471 = vmax.xlane.f32.xlu1 %v2470_v55  ;;  %2468 = vmax.xlane.f32.xlu0 %v2467_v63  ;;  %v2465_v5 = vadd.f32 %v7464_v9, %v2457_v54  ;;  %v2466_v57 = vadd.f32 %v7464_v9, %v2458_v58 }
 0x736   :  { %v2473_v6 = vsel %vm905_vm9, %v2465_v5, -inf  ;;  %v2476_v10 = vsel %vm905_vm9, %v2466_v57, -inf }
 0x738   :  { %2474 = vmax.xlane.f32.xlu0 %v2473_v6 }
 0x73c   :  { %2477 = vmax.xlane.f32.xlu0 %v2476_v10 }
 0x745   :  { %2003 = vrot.lane.b32.xlu1 %v7516_v53, %s7179_s2 }
 0x7c1   :  { %v2472_v11 = vpop.xlane.xlu1 %2471  ;;  %v2469_v12 = vpop.xlane.xlu0 %2468 }
 0x7c2   :  { %v2480_v16 = vsub.f32 %v2464_v43, %v2472_v11  ;;  %v2479_v18 = vsub.f32 %v2463_v47, %v2469_v12 }
 0x7c4   :  { %v2485_v19 = vmul.f32 1.442695, %v2480_v16  ;;  %v2483_v20 = vmul.f32 1.442695, %v2479_v18 }
 0x7c5   :  { %v2475_v21 = vpop.xlane.xlu0 %2474  ;;  %v2004_v31 = vpop.permute.xlu1 %2003 }
 0x7c6   :  { %6895 = vpow2.f32 %v2485_v19  ;;  %v2481_v22 = vsub.f32 %v2465_v5, %v2475_v21 }
 0x7c7   :  { %6897 = vpow2.f32 %v2483_v20 }
 0x7c8   :  { %v2487_v23 = vmul.f32 1.442695, %v2481_v22 }
 0x7c9   :  { %v2478_v50 = vpop.xlane.xlu0 %2477 }
 0x7ca   :  { %6899 = vpow2.f32 %v2487_v23  ;;  %v2482_v24 = vsub.f32 %v2466_v57, %v2478_v50 }
 0x7cc   :  { %v2489_v25 = vmul.f32 1.442695, %v2482_v24 }
 0x7ce   :  { %6901 = vpow2.f32 %v2489_v25 }
 0x7d0   :  { %v7798_v56 = vpop.eup %6895 }
 0x7d1   :  { %v7800_v26 = vpop.eup %6897  ;;  %v2494_v53 = vsel %vm905_vm9, %v7798_v56, 0.0 }
 0x7d2   :  { %v2491_v14 = vsel %vm905_vm9, %v7800_v26, 0.0  ;;  %2495 = vadd.xlane.f32.xlu0 %v2494_v53 }
 0x7d3   :  { %2492 = vadd.xlane.f32.xlu1 %v2491_v14 }
 0x7d4   :  { %v7806_v27 = vpop.eup %6899 }
 0x7d5   :  { %v2497_v29 = vsel %vm905_vm9, %v7806_v27, 0.0 }
 0x7d7   :  { %2498 = vadd.xlane.f32.xlu1 %v2497_v29 }
 0x7d8   :  { %v7810_v28 = vpop.eup %6901 }
 0x7d9   :  { %v2500_v30 = vsel %vm905_vm9, %v7810_v28, 0.0 }
 0x7da   :  { %2501 = vadd.xlane.f32.xlu0 %v2500_v30 }
 0x7e8   :  { %2007 = vrot.lane.b32.xlu1 %v7646_v15, %s7179_s2 }
 0x7ec   :  { %2009 = vrot.lane.b32.xlu1 %v7650_v17, %s7179_s2 }
 0x7f0   :  { %2005 = vrot.lane.b32.xlu0 %v7632_v7, %s7179_s2 }
 0x85f   :  { %v2496_v33 = vpop.xlane.xlu0 %2495 }
 0x860   :  { %v2493_v32 = vpop.xlane.xlu1 %2492  ;;  %6903 = vrcp.f32 %v2496_v33 }
 0x861   :  { %6905 = vrcp.f32 %v2493_v32 }
 0x864   :  { %v2499_v35 = vpop.xlane.xlu1 %2498 }
 0x865   :  { %6907 = vrcp.f32 %v2499_v35 }
 0x867   :  { %v2502_v36 = vpop.xlane.xlu0 %2501 }
 0x868   :  { %v2008_v37 = vpop.permute.xlu1 %2007  ;;  %6909 = vrcp.f32 %v2502_v36 }
 0x869   :  { %v2015_v38 = vcombine.low %v2004_v31, %v2008_v37  ;;  %v2016_v39 = vcombine.high %v2004_v31, %v2008_v37 }
 0x86a   :  { %v6904_v22 = vpop.eup %6903 }
 0x86b   :  { %v2006_v40 = vpop.permute.xlu0 %2005  ;;  %v2023_v15 = vrot.slane %v2015_v38, %v7543_v2  ;;  %v2030_v51 = vrot.slane %v2016_v39, %v7543_v2  ;;  %v6906_v25 = vpop.eup %6905  ;;  %v2506_v35 = vmul.f32 %v6904_v22, %v7798_v56 }
 0x86c   :  { %v2010_v42 = vpop.permute.xlu1 %2009  ;;  %v2504_v33 = vmul.f32 %v6906_v25, %v7800_v26 }
 0x86d   :  { %v2031_v43 = vcombine.low %v2006_v40, %v2010_v42  ;;  %v2032_v47 = vcombine.high %v2006_v40, %v2010_v42 }
 0x86f   :  { %v2039_v17 = vrot.slane %v2031_v43, %v7543_v2  ;;  %v2046_v7 = vrot.slane %v2032_v47, %v7543_v2  ;;  %v6908_v32 = vpop.eup %6907 }
 0x870   :  { %v2508_v39 = vmul.f32 %v6908_v32, %v7806_v27 }
 0x871   :  { %v2047_v3 = vcombine.low %v2023_v15, %v2039_v17  ;;  %v2048_v54 = vcombine.high %v2023_v15, %v2039_v17  ;;  %v2063_v58 = vcombine.low %v2030_v51, %v2046_v7  ;;  %v2064_v59 = vcombine.high %v2030_v51, %v2046_v7 }
 0x872   :  { %v6910_v36 = vpop.eup %6909 }
 0x873   :  { %v2055_v60 = vrot.slane %v2047_v3, %v7554_v13  ;;  %v2062_v55 = vrot.slane %v2048_v54, %v7554_v13  ;;  %v2071_v63 = vrot.slane %v2063_v58, %v7554_v13  ;;  %v2078_v5 = vrot.slane %v2064_v59, %v7554_v13 }
 0x874   :  { %v2510_v40 = vmul.f32 %v6910_v36, %v7810_v28 }
 0x875   :  { %v2083_v6 = vcombine.low %v2055_v60, %v2062_v55  ;;  %v6305_v57 = vcombine.high %v2055_v60, %v2062_v55  ;;  %v2099_v10 = vcombine.low %v2071_v63, %v2078_v5  ;;  %v6306_v11 = vcombine.high %v2071_v63, %v2078_v5 }
 0x877   :  { %v2090_v12 = vrot.slane %v2083_v6, %v7543_v2  ;;  %v2098_v16 = vrot.slane %v6305_v57, %v7543_v2  ;;  %v2106_v18 = vrot.slane %v2099_v10, %v7543_v2  ;;  %v2114_v19 = vrot.slane %v6306_v11, %v7543_v2 }
 0x879   :  { %v2115_v20 = vcombine.low %v2090_v12, %v2098_v16  ;;  %v2116_v21 = vcombine.high %v2090_v12, %v2098_v16  ;;  %v2131_v23 = vcombine.low %v2106_v18, %v2114_v19  ;;  %v2132_v50 = vcombine.high %v2106_v18, %v2114_v19 }
 0x87b   :  { %v2123_v24 = vrot.slane %v2115_v20, %v7554_v13  ;;  %v2139_v53 = vrot.slane %v2131_v23, %v7554_v13  ;;  %v2130_v14 = vrot.slane %v2116_v21, %v7554_v13  ;;  %v2146_v29 = vrot.slane %v2132_v50, %v7554_v13  ;;  %v6859_v21 = vld [vmem:[%s8458_s10] sm:$0xff]  }
 0x87d   :  { %v2147_v30 = vcombine.low %v2123_v24, %v2139_v53  ;;  %v2148_v31 = vcombine.high %v2123_v24, %v2139_v53  ;;  %v2149_v37 = vcombine.low %v2130_v14, %v2146_v29  ;;  %v2150_v38 = vcombine.high %v2130_v14, %v2146_v29 }
 0x87f   :  { %6624 = vmatpush3.msra.mxu0 %v2147_v30  ;;  %6629 = vmatpush3.msra.mxu1 %v2148_v31  ;;  %v6860_v30 = vld [vmem:[%s8458_s10 + $0x8] sm:$0xff]  }
 0x880   :  { %6626 = vmatmul.mubr.msk.f32.vlgmr.msra.gmra.mrb[18].mxu0 %vm905_vm9, %v2504_v33  ;;  %6631 = vmatmul.mubr.msk.f32.vlgmr.msra.gmra.mrb[22].mxu1 %vm905_vm9, %v2506_v35 }
 0x881   :  { %6633 = vmatprep.subr.mxu0 %v7190_v1  ;;  %6638 = vmatprep.subr.mxu1 %v7190_v1 }
 0x882   :  { %6634 = vmatpush3.msra.mxu0 %v2149_v37  ;;  %6639 = vmatpush3.msra.mxu1 %v2150_v38 }
 0x883   :  { %6635 = vmatprep.mubr.msk.f32.mxu0 %vm7191_vm1, %v7190_v1  ;;  %6640 = vmatprep.mubr.msk.f32.mxu1 %vm7191_vm1, %v7190_v1 }
 0x884   :  { %6636 = vmatmul.mubr.msk.f32.vlgmr.msra.gmra.mrb[20].mxu0 %vm905_vm9, %v2508_v39  ;;  %6641 = vmatmul.mubr.msk.f32.vlgmr.msra.gmra.mrb[24].mxu1 %vm905_vm9, %v2510_v40 }
 0x885   :  { %6643 = vmatprep.subr.bf16.mxu0 %v7190_v1  ;;  %6647 = vmatprep.mubr.msk.bf16.mxu0 %vm7191_vm1, %v7190_v1 }
 0x886   :  { %6651 = vmatprep.subr.bf16.mxu1 %v7190_v1  ;;  %6655 = vmatprep.mubr.msk.bf16.mxu1 %vm7191_vm1, %v7190_v1 }
 0x887   :  { %6644 = vmatpush3.bf16.msra.mxu0 %v6859_v21  ;;  %6652 = vmatpush3.bf16.msra.mxu1 %v6861_v41  ;;  %v6868_v41 = vld [vmem:[%s8456_s8 + $0x18] sm:$0xff]  }
 0x888   :  { %6645 = vmatprep.subr.bf16.mxu0 %v7190_v1  ;;  %6653 = vmatprep.subr.bf16.mxu1 %v7190_v1 }
 0x88b   :  { %6646 = vmatpush3.bf16.msra.mxu0 %v6860_v30  ;;  %6654 = vmatpush3.bf16.msra.mxu1 %v6862_v44 }
 0x88c   :  { %6659 = vmatprep.subr.bf16.mxu0 %v7190_v1  ;;  %6671 = vmatprep.subr.bf16.mxu1 %v7190_v1 }
 0x953   :  { %v2580_v56 = vpop.f32.mrb[18].mxu0  ;;  %v2653_v26 = vpop.f32.mrb[22].mxu1 }
 0x954   :  { %v6627_v27 = vpop.f32.mrb[19].mxu0  ;;  %v6632_v28 = vpop.f32.mrb[23].mxu1 }
 0x957   :  { %v2726_v42 = vpop.f32.mrb[20].mxu0  ;;  %v2799_v43 = vpop.f32.mrb[24].mxu1 }
 0x958   :  { %v2803_v47 = vcombine.low %v2580_v56, %v2726_v42  ;;  %v2804_v15 = vcombine.high %v2580_v56, %v2726_v42  ;;  %v2819_v51 = vcombine.low %v2653_v26, %v2799_v43  ;;  %v2820_v17 = vcombine.high %v2653_v26, %v2799_v43  ;;  %v6637_v7 = vpop.f32.mrb[21].mxu0  ;;  %v6642_v3 = vpop.f32.mrb[25].mxu1 }
 0x95a   :  { %v2811_v54 = vrot.slane %v2803_v47, %v7543_v2  ;;  %v2818_v58 = vrot.slane %v2804_v15, %v7543_v2  ;;  %v2827_v59 = vrot.slane %v2819_v51, %v7543_v2  ;;  %v2834_v60 = vrot.slane %v2820_v17, %v7543_v2 }
 0x95c   :  { %v2835_v55 = vcombine.low %v2811_v54, %v2827_v59  ;;  %v2836_v63 = vcombine.high %v2811_v54, %v2827_v59  ;;  %v2851_v5 = vcombine.low %v2818_v58, %v2834_v60  ;;  %v2852_v6 = vcombine.high %v2818_v58, %v2834_v60 }
 0x95e   :  { %v2843_v57 = vrot.slane %v2835_v55, %v7554_v13  ;;  %v2850_v10 = vrot.slane %v2836_v63, %v7554_v13  ;;  %v2859_v11 = vrot.slane %v2851_v5, %v7554_v13  ;;  %v2866_v12 = vrot.slane %v2852_v6, %v7554_v13 }
 0x960   :  { %v2871_v16 = vcombine.low %v2843_v57, %v2850_v10  ;;  %v6319_v18 = vcombine.high %v2843_v57, %v2850_v10  ;;  %v2887_v19 = vcombine.low %v2859_v11, %v2866_v12  ;;  %v6320_v20 = vcombine.high %v2859_v11, %v2866_v12 }
 0x962   :  { %v2878_v22 = vrot.slane %v2871_v16, %v7543_v2  ;;  %v2886_v23 = vrot.slane %v6319_v18, %v7543_v2  ;;  %v2894_v50 = vrot.slane %v2887_v19, %v7543_v2  ;;  %v2902_v24 = vrot.slane %v6320_v20, %v7543_v2 }
 0x964   :  { %v2904_v25 = vcombine.high %v2878_v22, %v2886_v23  ;;  %v2920_v53 = vcombine.high %v2894_v50, %v2902_v24  ;;  %v2903_v14 = vcombine.low %v2878_v22, %v2886_v23  ;;  %v2919_v29 = vcombine.low %v2894_v50, %v2902_v24 }
 0x966   :  { %v2918_v31 = vrot.slane %v2904_v25, %v7554_v13  ;;  %v2934_v32 = vrot.slane %v2920_v53, %v7554_v13  ;;  %v2911_v33 = vrot.slane %v2903_v14, %v7554_v13  ;;  %v2927_v35 = vrot.slane %v2919_v29, %v7554_v13 }
 0x968   :  { %v2937_v36 = vcombine.low %v2918_v31, %v2934_v32  ;;  %v2936_v37 = vcombine.high %v2911_v33, %v2927_v35  ;;  %v2935_v38 = vcombine.low %v2911_v33, %v2927_v35  ;;  %v2938_v39 = vcombine.high %v2918_v31, %v2934_v32  ;;  %v6325_v35 = vld [vmem:[#allocation14] ss:$0 sm:$0xff] }
 0x96a   :  { %v6826_v40 = vpack.i.bf16 %v2937_v36, %v1692_v61  ;;  %v6821_v56 = vpack.i.bf16 %v2936_v37, %v1691_v4  ;;  %v6831_v26 = vpack.i.bf16 %v2938_v39, %v1693_v62 }
 0x96c   :  { %6827 = vrot.lane.b32.xlu1 %v6826_v40, %s7186_s27  ;;  %6822 = vrot.lane.b32.xlu0 %v6821_v56, %s7198_s25  ;;  %v6326_v56 = vld [vmem:[%s8461_s13] ss:$0 sm:$0xff] }
 0x970   :  { %6832 = vrot.lane.b32.xlu0 %v6831_v26, %s7199_s1 }
 0x9de   :  { %v6828_v27 = vpop.permute.xlu1 %6827  ;;  %v6823_v28 = vpop.permute.xlu0 %6822 }
 0x9df   :  { %v6825_v42 = vunpack.i.h.bf16 %v6823_v28  ;;  %v6824_v61 = vunpack.i.l.bf16 %v6823_v28  ;;  %v6830_v43 = vunpack.i.h.bf16 %v6828_v27  ;;  %v6829_v47 = vunpack.i.l.bf16 %v6828_v27 }
 0x9e1   :  { %v1706_v48 = vsel %vm905_vm9, %v1690_v0, %v6824_v61  ;;  %v2951_v49 = vsel %vm905_vm9, %v2935_v38, %v6825_v42  ;;  %v6865_v61 = vld [vmem:[%s8464_s16 + $0x10] sm:$0xff]  }
 0x9e2   :  { %v6833_v62 = vpop.permute.xlu0 %6832  ;;  %v1707_v51 = vsel %vm266_vm2, %v1706_v48, %v6829_v47  ;;  %v2952_v17 = vsel %vm266_vm2, %v2951_v49, %v6830_v43  ;;  %v6866_v43 = vld [vmem:[%s8464_s16 + $0x18] sm:$0xff]   ;;  %v6327_v47 = vld [vmem:[%s8463_s15] ss:$0 sm:$0xff] }
 0x9e3   :  { %v6835_v4 = vunpack.i.h.bf16 %v6833_v62  ;;  %v6834_v15 = vunpack.i.l.bf16 %v6833_v62 }
 0x9e5   :  { %v1708_v7 = vsel %vm330_vm7, %v1707_v51, %v6834_v15  ;;  %v2953_v3 = vsel %vm330_vm7, %v2952_v17, %v6835_v4 }
 0x9e6   :  { %v2954_v54 = vpack.c.bf16 %v2953_v3, %v1708_v7 }
 0x9e8   :  { %6648 = vmatmul.mubr.msk.bf16.vlgmr.msra.gmra.mrb[24].mxu0 %vm418_vm8, %v2954_v54  ;;  %v6331_v54 = vld [vmem:[%s8465_s17] ss:$0 sm:$0xff] }
 0x9e9   :  { %6667 = vmatprep.mubr.msk.bf16.mxu0 %vm7191_vm1, %v7190_v1 }
 0xabb   :  { %v3015_v8 = vpop.f32.mrb[24].mxu0 }
 0xabc   :  { %v3016_v0 = vadd.f32 %v6321_v52, %v3015_v8  ;;  %v6649_v58 = vpop.f32.mrb[25].mxu0 }
 0xabd   :  { %v3018_v59 = vpop.f32.mrb[26].mxu0 }
 0xabe   :  { %v3022_v60 = vadd.f32 %v3016_v0, %v390_v45  ;;  %v3019_v55 = vadd.f32 %v6321_v52, %v3018_v59  ;;  %v6650_v63 = vpop.f32.mrb[27].mxu0  ;;  %v6863_v45 = vld [vmem:[%s8464_s16] sm:$0xff]  }
 0xabf   :  { %6660 = vmatpush3.bf16.msra.mxu0 %v6863_v45 }
 0xac0   :  { %v3023_v5 = vadd.f32 %v3019_v55, %v391_v46  ;;  %v3026_v6 = vsel %vm418_vm8, %v3022_v60, 0.0  ;;  %v3035_v11 = vmul.f32 %v3022_v60, %v3022_v60  ;;  %v6864_v46 = vld [vmem:[%s8464_s16 + $0x8] sm:$0xff]   ;;  %6661 = vmatprep.subr.bf16.mxu0 %v7190_v1 }
 0xac1   :  { %3027 = vadd.xlane.f32.xlu1 %v3026_v6 }
 0xac2   :  { %v3029_v57 = vsel %vm418_vm8, %v3023_v5, 0.0  ;;  %v3036_v10 = vmul.f32 %v3023_v5, %v3023_v5  ;;  %v3037_v16 = vsel %vm418_vm8, %v3035_v11, 0.0 }
 0xac3   :  { %3030 = vadd.xlane.f32.xlu0 %v3029_v57  ;;  %6662 = vmatpush3.bf16.msra.mxu0 %v6864_v46 }
 0xac4   :  { %v3040_v12 = vsel %vm418_vm8, %v3036_v10, 0.0  ;;  %6663 = vmatprep.subr.bf16.mxu0 %v7190_v1 }
 0xac5   :  { %3041 = vadd.xlane.f32.xlu1 %v3040_v12 }
 0xac7   :  { %3038 = vadd.xlane.f32.xlu0 %v3037_v16  ;;  %6664 = vmatpush3.bf16.msra.mxu0 %v6865_v61  ;;  %v6867_v16 = vld [vmem:[%s8456_s8 + $0x10] sm:$0xff]  }
 0xac8   :  { %6665 = vmatprep.subr.bf16.mxu0 %v7190_v1 }
 0xacb   :  { %6666 = vmatpush3.bf16.msra.mxu0 %v6866_v43 }
 0xacc   :  { %6689 = vmatprep.subr.mxu0 %v7190_v1 }
 0xb4e   :  { %v3028_v18 = vpop.xlane.xlu1 %3027 }
 0xb4f   :  { %v3033_v20 = vmul.f32 0.03125, %v3028_v18 }
 0xb50   :  { %v3031_v19 = vpop.xlane.xlu0 %3030 }
 0xb51   :  { %v3034_v21 = vmul.f32 0.03125, %v3031_v19  ;;  %v3045_v25 = vmul.f32 %v3033_v20, %v3033_v20  ;;  %v3049_v36 = vsub.f32 %v3022_v60, %v3033_v20 }
 0xb52   :  { %v3042_v22 = vpop.xlane.xlu1 %3041 }
 0xb53   :  { %v3046_v23 = vmul.f32 %v3034_v21, %v3034_v21  ;;  %v3044_v50 = vmul.f32 0.03125, %v3042_v22  ;;  %v3050_v32 = vsub.f32 %v3023_v5, %v3034_v21 }
 0xb54   :  { %v3039_v24 = vpop.xlane.xlu0 %3038 }
 0xb55   :  { %v3048_v53 = vsub.f32 %v3044_v50, %v3046_v23  ;;  %v3043_v14 = vmul.f32 0.03125, %v3039_v24 }
 0xb57   :  { %v3052_v29 = vadd.f32 1e-05, %v3048_v53  ;;  %v3047_v30 = vsub.f32 %v3043_v14, %v3045_v25 }
 0xb59   :  { %6911 = vrsqrt.f32 %v3052_v29  ;;  %v3051_v31 = vadd.f32 1e-05, %v3047_v30 }
 0xb5b   :  { %6913 = vrsqrt.f32 %v3051_v31  ;;  %v6337_v31 = vld [vmem:[%s8466_s18] ss:$0 sm:$0xff] }
 0xb63   :  { %v6912_v33 = vpop.eup %6911 }
 0xb64   :  { %v3056_v37 = vmul.f32 %v6912_v33, %v3050_v32 }
 0xb65   :  { %v6914_v38 = vpop.eup %6913 }
 0xb66   :  { %v3055_v39 = vmul.f32 %v6914_v38, %v3049_v36  ;;  %v3064_v40 = vmul.f32 %v6325_v35, %v3056_v37  ;;  %v6338_v38 = vld [vmem:[%s8467_s19] ss:$0 sm:$0xff] }
 0xb68   :  { %v3063_v26 = vmul.f32 %v6325_v35, %v3055_v39  ;;  %v3072_v28 = vadd.f32 %v6326_v56, %v3064_v40 }
 0xb6a   :  { %v3071_v27 = vadd.f32 %v6326_v56, %v3063_v26 }
 0xb6c   :  { %v3073_v42 = vpack.c.bf16 %v3072_v28, %v3071_v27 }
 0xb6e   :  { %6656 = vmatmul.mubr.msk.bf16.vlgmr.msra.gmra.mrb[28].mxu1 %vm418_vm8, %v3073_v42 }
 0xb6f   :  { %6675 = vmatprep.mubr.msk.bf16.mxu1 %vm7191_vm1, %v7190_v1  ;;  %6672 = vmatpush3.bf16.msra.mxu1 %v6867_v16 }
 0xb70   :  { %6673 = vmatprep.subr.bf16.mxu1 %v7190_v1 }
 0xb73   :  { %6674 = vmatpush3.bf16.msra.mxu1 %v6868_v41 }
 0xb74   :  { %6679 = vmatprep.subr.mxu1 %v7190_v1 }
 0xc41   :  { %v3134_v48 = vpop.f32.mrb[28].mxu1 }
 0xc42   :  { %v3135_v49 = vadd.f32 %v6327_v47, %v3134_v48  ;;  %v6657_v62 = vpop.f32.mrb[29].mxu1 }
 0xc43   :  { %v3137_v4 = vpop.f32.mrb[30].mxu1 }
 0xc44   :  { %v3138_v15 = vadd.f32 %v6327_v47, %v3137_v4  ;;  %v6658_v51 = vpop.f32.mrb[31].mxu1  ;;  %v3141_v17 = vmax.f32 %v3135_v49, 0.0 }
 0xc46   :  { %v3142_v7 = vmax.f32 %v3138_v15, 0.0 }
 0xc48   :  { %v3143_v3 = vpack.c.bf16 %v3142_v7, %v3141_v17 }
 0xc4a   :  { %6668 = vmatmul.mubr.msk.bf16.vlgmr.msra.gmra.mrb[28].mxu0 %vm3183_vm10, %v3143_v3 }
 0xc4b   :  { %6691 = vmatprep.mubr.msk.f32.mxu0 %vm7191_vm1, %v7190_v1 }
 0xd1d   :  { %v3221_v52 = vpop.f32.mrb[28].mxu0 }
 0xd1e   :  { %v3222_v8 = vadd.f32 %v6331_v54, %v3221_v52  ;;  %v6669_v0 = vpop.f32.mrb[29].mxu0 }
 0xd1f   :  { %v3224_v58 = vpop.f32.mrb[30].mxu0 }
 0xd20   :  { %v3228_v59 = vadd.f32 %v3222_v8, %v3071_v27  ;;  %v3225_v60 = vadd.f32 %v6331_v54, %v3224_v58  ;;  %v6670_v55 = vpop.f32.mrb[31].mxu0  ;;  %v6344_v27 = vld [vmem:[%s8457_s9 + $0x1] ss:$0 sm:$0xff] }
 0xd22   :  { %v3229_v63 = vadd.f32 %v3225_v60, %v3072_v28  ;;  %v3232_v5 = vsel %vm418_vm8, %v3228_v59, 0.0  ;;  %v3240_v6 = vmul.f32 %v3228_v59, %v3228_v59 }
 0xd23   :  { %3233 = vadd.xlane.f32.xlu0 %v3232_v5 }
 0xd24   :  { %v3235_v57 = vsel %vm418_vm8, %v3229_v63, 0.0  ;;  %v3241_v10 = vmul.f32 %v3229_v63, %v3229_v63  ;;  %v3242_v11 = vsel %vm418_vm8, %v3240_v6, 0.0 }
 0xd25   :  { %3236 = vadd.xlane.f32.xlu1 %v3235_v57 }
 0xd26   :  { %v3245_v12 = vsel %vm418_vm8, %v3241_v10, 0.0 }
 0xd27   :  { %3243 = vadd.xlane.f32.xlu0 %v3242_v11 }
 0xd29   :  { %3246 = vadd.xlane.f32.xlu1 %v3245_v12 }
 0xdb0   :  { %v3234_v44 = vpop.xlane.xlu0 %3233 }
 0xdb1   :  { %v3238_v45 = vmul.f32 0.03125, %v3234_v44 }
 0xdb2   :  { %v3237_v46 = vpop.xlane.xlu1 %3236 }
 0xdb3   :  { %v3239_v18 = vmul.f32 0.03125, %v3237_v46  ;;  %v3250_v20 = vmul.f32 %v3238_v45, %v3238_v45  ;;  %v3254_v29 = vsub.f32 %v3228_v59, %v3238_v45 }
 0xdb4   :  { %v3244_v19 = vpop.xlane.xlu0 %3243 }
 0xdb5   :  { %v3248_v21 = vmul.f32 0.03125, %v3244_v19  ;;  %v3251_v23 = vmul.f32 %v3239_v18, %v3239_v18  ;;  %v3255_v32 = vsub.f32 %v3229_v63, %v3239_v18 }
 0xdb6   :  { %v3247_v22 = vpop.xlane.xlu1 %3246 }
 0xdb7   :  { %v3252_v50 = vsub.f32 %v3248_v21, %v3250_v20  ;;  %v3249_v24 = vmul.f32 0.03125, %v3247_v22 }
 0xdb9   :  { %v3256_v25 = vadd.f32 1e-05, %v3252_v50  ;;  %v3253_v53 = vsub.f32 %v3249_v24, %v3251_v23 }
 0xdbb   :  { %6915 = vrsqrt.f32 %v3256_v25  ;;  %v3257_v14 = vadd.f32 1e-05, %v3253_v53 }
 0xdbd   :  { %6917 = vrsqrt.f32 %v3257_v14 }
 0xdc5   :  { %v6916_v30 = vpop.eup %6915 }
 0xdc6   :  { %v3260_v33 = vmul.f32 %v6916_v30, %v3254_v29 }
 0xdc7   :  { %v6918_v35 = vpop.eup %6917 }
 0xdc8   :  { %v3261_v36 = vmul.f32 %v6918_v35, %v3255_v32  ;;  %v3268_v37 = vmul.f32 %v6337_v31, %v3260_v33 }
 0xdca   :  { %v3269_v39 = vmul.f32 %v6337_v31, %v3261_v36  ;;  %v7969_v40 = vadd.f32 %v6338_v38, %v3268_v37 }
 0xdcc   :  { %v7971_v56 = vadd.f32 %v6338_v38, %v3269_v39 }
 0xdce   :  { %v3278_v26 = vpack.c.bf16 %v7971_v56, %v7969_v40 }
 0xdd0   :  { %6676 = vmatmul.mubr.msk.bf16.vlgmr.msra.gmra.mrb[32].mxu1 %vm418_vm8, %v3278_v26 }
 0xdd1   :  { %6681 = vmatprep.mubr.msk.f32.mxu1 %vm7191_vm1, %v7190_v1 }
 0xea3   :  { %v3341_v28 = vpop.f32.mrb[32].mxu1 }
 0xea4   :  { %v7981_v42 = vadd.f32 %v6344_v27, %v3341_v28  ;;  %v6677_v61 = vpop.f32.mrb[33].mxu1 }
 0xea5   :  { %v3344_v43 = vpop.f32.mrb[34].mxu1 }
 0xea6   :  { %v7983_v47 = vadd.f32 %v6344_v27, %v3344_v43  ;;  %3352 = vrot.lane.b32.xlu1 %v7981_v42, %s7194_s12  ;;  %3349 = vrot.lane.b32.xlu0 %v7981_v42, %s7193_s0  ;;  %v6678_v48 = vpop.f32.mrb[35].mxu1 }
 0xeaa   :  { %3355 = vrot.lane.b32.xlu1 %v7981_v42, %s7192_s11  ;;  %3494 = vrot.lane.b32.xlu0 %v7981_v42, %s7195_s24 }
 0xf18   :  { %v7993_v49 = vpop.permute.xlu1 %3352  ;;  %v7995_v62 = vpop.permute.xlu0 %3349 }
 0xf19   :  { %3498 = vrot.lane.b32.xlu0 %v7993_v49, %s7195_s24  ;;  %3496 = vrot.lane.b32.xlu1 %v7995_v62, %s7195_s24  ;;  %v3358_v17 = vcombine.low %v7981_v42, %v7993_v49  ;;  %v3359_v7 = vcombine.high %v7981_v42, %v7993_v49 }
 0xf1b   :  { %v3366_v8 = vrot.slane %v3358_v17, %v7543_v2  ;;  %v3373_v0 = vrot.slane %v3359_v7, %v7543_v2 }
 0xf1c   :  { %v8001_v4 = vpop.permute.xlu1 %3355  ;;  %v3495_v52 = vpop.permute.xlu0 %3494 }
 0xf1d   :  { %3500 = vrot.lane.b32.xlu1 %v8001_v4, %s7195_s24  ;;  %v3374_v15 = vcombine.low %v7995_v62, %v8001_v4  ;;  %v3375_v51 = vcombine.high %v7995_v62, %v8001_v4 }
 0xf1f   :  { %v3382_v3 = vrot.slane %v3374_v15, %v7543_v2  ;;  %v3389_v54 = vrot.slane %v3375_v51, %v7543_v2 }
 0xf21   :  { %4590 = vrot.lane.b32.xlu1 %v7983_v47, %s7193_s0  ;;  %v3390_v58 = vcombine.low %v3366_v8, %v3382_v3  ;;  %v3391_v59 = vcombine.high %v3366_v8, %v3382_v3  ;;  %v3406_v60 = vcombine.low %v3373_v0, %v3389_v54  ;;  %v3407_v55 = vcombine.high %v3373_v0, %v3389_v54 }
 0xf23   :  { %v3398_v10 = vrot.slane %v3390_v58, %v7554_v13  ;;  %v3405_v11 = vrot.slane %v3391_v59, %v7554_v13  ;;  %v3414_v12 = vrot.slane %v3406_v60, %v7554_v13  ;;  %v3421_v16 = vrot.slane %v3407_v55, %v7554_v13 }
 0xf25   :  { %v3426_v21 = vcombine.low %v3398_v10, %v3405_v11  ;;  %v6348_v22 = vcombine.high %v3398_v10, %v3405_v11  ;;  %v3442_v23 = vcombine.low %v3414_v12, %v3421_v16  ;;  %v6349_v50 = vcombine.high %v3414_v12, %v3421_v16 }
 0xf27   :  { %v3433_v33 = vrot.slane %v3426_v21, %v7543_v2  ;;  %v3441_v35 = vrot.slane %v6348_v22, %v7543_v2  ;;  %v3449_v36 = vrot.slane %v3442_v23, %v7543_v2  ;;  %v3457_v37 = vrot.slane %v6349_v50, %v7543_v2 }
 0xf29   :  { %v3458_v15 = vcombine.low %v3433_v33, %v3441_v35  ;;  %v3474_v51 = vcombine.low %v3449_v36, %v3457_v37  ;;  %v3459_v17 = vcombine.high %v3433_v33, %v3441_v35  ;;  %v3475_v7 = vcombine.high %v3449_v36, %v3457_v37 }
 0xf2b   :  { %v3466_v55 = vrot.slane %v3458_v15, %v7554_v13 }
 0xf8b   :  { %v3497_v63 = vpop.permute.xlu1 %3496  ;;  %v3499_v5 = vpop.permute.xlu0 %3498 }
 0xf8c   :  { %v3506_v6 = vcombine.low %v3495_v52, %v3499_v5  ;;  %v3507_v57 = vcombine.high %v3495_v52, %v3499_v5  ;;  %v3473_v5 = vrot.slane %v3459_v17, %v7554_v13 }
 0xf8e   :  { %v3514_v46 = vrot.slane %v3506_v6, %v7543_v2  ;;  %v3521_v18 = vrot.slane %v3507_v57, %v7543_v2  ;;  %v3489_v6 = vrot.slane %v3475_v7, %v7554_v13 }
 0xf8f   :  { %v3501_v41 = vpop.permute.xlu1 %3500 }
 0xf90   :  { %v3522_v44 = vcombine.low %v3497_v63, %v3501_v41  ;;  %v3523_v45 = vcombine.high %v3497_v63, %v3501_v41  ;;  %v3482_v63 = vrot.slane %v3474_v51, %v7554_v13  ;;  %v3492_v12 = vcombine.low %v3473_v5, %v3489_v6 }
 0xf92   :  { %v3530_v19 = vrot.slane %v3522_v44, %v7543_v2  ;;  %v3537_v20 = vrot.slane %v3523_v45, %v7543_v2  ;;  %v3490_v11 = vcombine.low %v3466_v55, %v3482_v63  ;;  %v3491_v41 = vcombine.high %v3466_v55, %v3482_v63 }
 0xf93   :  { %v3493_v45 = vcombine.high %v3473_v5, %v3489_v6 }
 0xf94   :  { %v3538_v24 = vcombine.low %v3514_v46, %v3530_v19  ;;  %v3539_v25 = vcombine.high %v3514_v46, %v3530_v19  ;;  %v3554_v53 = vcombine.low %v3521_v18, %v3537_v20  ;;  %v3555_v14 = vcombine.high %v3521_v18, %v3537_v20 }
 0xf96   :  { %v3546_v29 = vrot.slane %v3538_v24, %v7554_v13  ;;  %v3553_v30 = vrot.slane %v3539_v25, %v7554_v13  ;;  %v3562_v31 = vrot.slane %v3554_v53, %v7554_v13  ;;  %v3569_v32 = vrot.slane %v3555_v14, %v7554_v13 }
 0xf98   :  { %v3574_v38 = vcombine.low %v3546_v29, %v3553_v30  ;;  %v6350_v39 = vcombine.high %v3546_v29, %v3553_v30  ;;  %v3590_v26 = vcombine.low %v3562_v31, %v3569_v32  ;;  %v6351_v27 = vcombine.high %v3562_v31, %v3569_v32 }
 0xf9a   :  { %v3581_v28 = vrot.slane %v3574_v38, %v7543_v2  ;;  %v3589_v61 = vrot.slane %v6350_v39, %v7543_v2  ;;  %v3597_v43 = vrot.slane %v3590_v26, %v7543_v2  ;;  %v3605_v48 = vrot.slane %v6351_v27, %v7543_v2 }
 0xf9c   :  { %v3606_v3 = vcombine.low %v3581_v28, %v3589_v61  ;;  %v3607_v54 = vcombine.high %v3581_v28, %v3589_v61  ;;  %v3622_v52 = vcombine.low %v3597_v43, %v3605_v48  ;;  %v3623_v8 = vcombine.high %v3597_v43, %v3605_v48 }
 0xf9e   :  { %v3614_v0 = vrot.slane %v3606_v3, %v7554_v13  ;;  %v3630_v58 = vrot.slane %v3622_v52, %v7554_v13  ;;  %v3621_v59 = vrot.slane %v3607_v54, %v7554_v13  ;;  %v3637_v60 = vrot.slane %v3623_v8, %v7554_v13 }
 0xfa0   :  { %v3638_v57 = vcombine.low %v3614_v0, %v3630_v58  ;;  %v3640_v10 = vcombine.low %v3621_v59, %v3637_v60  ;;  %v3639_v16 = vcombine.high %v3614_v0, %v3630_v58  ;;  %v3641_v44 = vcombine.high %v3621_v59, %v3637_v60 }
 0xfa2   :  { %6680 = vmatpush3.xpose.msk.msra.mxu1 %vm905_vm9, %v3638_v57  ;;  %6690 = vmatpush3.xpose.msk.msra.mxu0 %vm905_vm9, %v3640_v10 }
 0xfa3   :  { %6684 = vmatprep.subr.mxu1 %v7190_v1  ;;  %6699 = vmatprep.subr.mxu0 %v7190_v1 }
 0xfa5   :  { %6682 = vmatmul.mubr.msk.f32.vlgmr.msra.gmra.mrb[26].mxu1 %vm905_vm9, %v3490_v11  ;;  %6692 = vmatmul.mubr.msk.f32.vlgmr.msra.gmra.mrb[22].mxu0 %vm905_vm9, %v3492_v12 }
 0xfa6   :  { %6685 = vmatpush3.xpose.msk.msra.mxu1 %vm905_vm9, %v3639_v16  ;;  %6686 = vmatprep.mubr.msk.f32.mxu1 %vm7191_vm1, %v7190_v1 }
 0xfa7   :  { %6694 = vmatprep.subr.mxu1 %v7190_v1  ;;  %6701 = vmatprep.mubr.msk.f32.mxu0 %vm7191_vm1, %v7190_v1 }
 0xfa9   :  { %6687 = vmatmul.mubr.msk.f32.vlgmr.msra.gmra.mrb[36].mxu1 %vm905_vm9, %v3491_v41 }
 0xfaa   :  { %6695 = vmatpush3.xpose.msk.msra.mxu1 %vm905_vm9, %v3641_v44  ;;  %6696 = vmatprep.mubr.msk.f32.mxu1 %vm7191_vm1, %v7190_v1 }
 0xfab   :  { %6704 = vmatprep.subr.mxu1 %v7190_v1 }
 0xfad   :  { %6697 = vmatmul.mubr.msk.f32.vlgmr.msra.gmra.mrb[38].mxu1 %vm905_vm9, %v3493_v45 }
 0xfae   :  { %6706 = vmatprep.mubr.msk.f32.mxu1 %vm7191_vm1, %v7190_v1 }
0x1078   :  { %v3862_v46 = vpop.f32.mrb[26].mxu1  ;;  %v4014_v18 = vpop.f32.mrb[22].mxu0 }
0x1079   :  { %v4094_v19 = vmul.f32 0.35355338, %v3862_v46  ;;  %v4096_v20 = vmul.f32 0.35355338, %v4014_v18  ;;  %v6683_v21 = vpop.f32.mrb[27].mxu1  ;;  %v6693_v22 = vpop.f32.mrb[23].mxu0 }
0x107b   :  { %v4098_v23 = vadd.f32 %v4094_v19, %v7606_v34  ;;  %v4100_v14 = vadd.f32 %v4096_v20, %v7606_v34 }
0x107c   :  { %v3938_v50 = vpop.f32.mrb[36].mxu1 }
0x107d   :  { %v4095_v24 = vmul.f32 0.35355338, %v3938_v50  ;;  %v6688_v25 = vpop.f32.mrb[37].mxu1  ;;  %v4102_v53 = vsel %vm905_vm9, %v4098_v23, -inf  ;;  %v4108_v35 = vsel %vm905_vm9, %v4100_v14, -inf }
0x107e   :  { %4103 = vmax.xlane.f32.xlu0 %v4102_v53 }
0x107f   :  { %v4099_v29 = vadd.f32 %v4095_v24, %v7606_v34 }
0x1080   :  { %v4090_v30 = vpop.f32.mrb[38].mxu1 }
0x1081   :  { %v4097_v31 = vmul.f32 0.35355338, %v4090_v30  ;;  %v6698_v32 = vpop.f32.mrb[39].mxu1  ;;  %v4105_v33 = vsel %vm905_vm9, %v4099_v29, -inf }
0x1082   :  { %4106 = vmax.xlane.f32.xlu1 %v4105_v33  ;;  %4109 = vmax.xlane.f32.xlu0 %v4108_v35 }
0x1083   :  { %v4101_v36 = vadd.f32 %v4097_v31, %v7606_v34  ;;  %v8089_v34 = vpop.permute.xlu1 %4590 }
0x1085   :  { %v4111_v37 = vsel %vm905_vm9, %v4101_v36, -inf }
0x1086   :  { %4112 = vmax.xlane.f32.xlu0 %v4111_v37 }
0x1093   :  { %4596 = vrot.lane.b32.xlu1 %v7983_v47, %s7192_s11 }
0x1097   :  { %3644 = vrot.lane.b32.xlu1 %v7995_v62, %s7179_s2 }
0x109b   :  { %3646 = vrot.lane.b32.xlu1 %v7993_v49, %s7179_s2 }
0x109c   :  { %4593 = vrot.lane.b32.xlu0 %v7983_v47, %s7194_s12 }
0x109f   :  { %4735 = vrot.lane.b32.xlu1 %v7983_v47, %s7195_s24 }
0x10a0   :  { %3642 = vrot.lane.b32.xlu0 %v7981_v42, %s7179_s2 }
0x10a4   :  { %3648 = vrot.lane.b32.xlu0 %v8001_v4, %s7179_s2 }
0x10a8   :  { %4737 = vrot.lane.b32.xlu0 %v8089_v34, %s7195_s24 }
0x110b   :  { %v4104_v62 = vpop.xlane.xlu0 %4103 }
0x110c   :  { %v4114_v38 = vsub.f32 %v4098_v23, %v4104_v62 }
0x110e   :  { %v4118_v49 = vmul.f32 1.442695, %v4114_v38 }
0x110f   :  { %v4107_v39 = vpop.xlane.xlu1 %4106  ;;  %v4110_v26 = vpop.xlane.xlu0 %4109 }
0x1110   :  { %6919 = vpow2.f32 %v4118_v49  ;;  %v4115_v27 = vsub.f32 %v4099_v29, %v4107_v39  ;;  %v4116_v28 = vsub.f32 %v4100_v14, %v4110_v26 }
0x1112   :  { %v4122_v61 = vmul.f32 1.442695, %v4116_v28  ;;  %v4120_v43 = vmul.f32 1.442695, %v4115_v27 }
0x1113   :  { %v8093_v48 = vpop.permute.xlu1 %4596  ;;  %v4113_v42 = vpop.xlane.xlu0 %4112 }
0x1114   :  { %v4117_v15 = vsub.f32 %v4101_v36, %v4113_v42  ;;  %6921 = vpow2.f32 %v4122_v61  ;;  %v4615_v42 = vcombine.low %v8089_v34, %v8093_v48 }
0x1115   :  { %6923 = vpow2.f32 %v4120_v43 }
0x1116   :  { %v4124_v4 = vmul.f32 1.442695, %v4117_v15 }
0x1117   :  { %v3645_v51 = vpop.permute.xlu1 %3644  ;;  %v8095_v17 = vpop.permute.xlu0 %4593 }
0x1118   :  { %6925 = vpow2.f32 %v4124_v4  ;;  %v4599_v61 = vcombine.low %v7983_v47, %v8095_v17  ;;  %v4600_v15 = vcombine.high %v7983_v47, %v8095_v17 }
0x111a   :  { %v8097_v7 = vpop.eup %6919 }
0x111b   :  { %v3647_v3 = vpop.permute.xlu1 %3646  ;;  %v3643_v54 = vpop.permute.xlu0 %3642  ;;  %v4126_v52 = vsel %vm905_vm9, %v8097_v7, 0.0 }
0x111c   :  { %4127 = vadd.xlane.f32.xlu1 %v4126_v52  ;;  %v3654_v8 = vcombine.low %v3643_v54, %v3647_v3  ;;  %v3655_v58 = vcombine.high %v3643_v54, %v3647_v3  ;;  %v4607_v3 = vrot.slane %v4599_v61, %v7543_v2  ;;  %v4623_v54 = vrot.slane %v4615_v42, %v7543_v2 }
0x111d   :  { %v4614_v52 = vrot.slane %v4600_v15, %v7543_v2 }
0x111e   :  { %v8101_v0 = vpop.eup %6921  ;;  %v3662_v57 = vrot.slane %v3654_v8, %v7543_v2  ;;  %v3669_v10 = vrot.slane %v3655_v58, %v7543_v2 }
0x111f   :  { %v3649_v59 = vpop.permute.xlu0 %3648  ;;  %v8103_v60 = vpop.eup %6923  ;;  %v4132_v5 = vsel %vm905_vm9, %v8101_v0, 0.0 }
0x1120   :  { %v3670_v55 = vcombine.low %v3645_v51, %v3649_v59  ;;  %v3671_v63 = vcombine.high %v3645_v51, %v3649_v59  ;;  %4133 = vadd.xlane.f32.xlu0 %v4132_v5  ;;  %v4129_v41 = vsel %vm905_vm9, %v8103_v60, 0.0  ;;  %v4736_v28 = vpop.permute.xlu1 %4735  ;;  %v4616_v51 = vcombine.high %v8089_v34, %v8093_v48 }
0x1121   :  { %v4631_v59 = vcombine.low %v4607_v3, %v4623_v54 }
0x1122   :  { %v8107_v6 = vpop.eup %6925  ;;  %v3678_v11 = vrot.slane %v3670_v55, %v7543_v2  ;;  %v3685_v12 = vrot.slane %v3671_v63, %v7543_v2  ;;  %v4630_v58 = vrot.slane %v4616_v51, %v7543_v2  ;;  %v4632_v55 = vcombine.high %v4607_v3, %v4623_v54 }
0x1123   :  { %v4135_v16 = vsel %vm905_vm9, %v8107_v6, 0.0  ;;  %v4738_v4 = vpop.permute.xlu0 %4737 }
0x1124   :  { %4136 = vadd.xlane.f32.xlu1 %v4135_v16  ;;  %v3686_v44 = vcombine.low %v3662_v57, %v3678_v11  ;;  %v3687_v45 = vcombine.high %v3662_v57, %v3678_v11  ;;  %v3702_v46 = vcombine.low %v3669_v10, %v3685_v12  ;;  %v3703_v18 = vcombine.high %v3669_v10, %v3685_v12 }
0x1125   :  { %4130 = vadd.xlane.f32.xlu0 %v4129_v41  ;;  %v4647_v5 = vcombine.low %v4614_v52, %v4630_v58  ;;  %v4648_v57 = vcombine.high %v4614_v52, %v4630_v58  ;;  %v4639_v12 = vrot.slane %v4631_v59, %v7554_v13  ;;  %v4646_v16 = vrot.slane %v4632_v55, %v7554_v13 }
0x1126   :  { %v3694_v19 = vrot.slane %v3686_v44, %v7554_v13  ;;  %v3701_v20 = vrot.slane %v3687_v45, %v7554_v13  ;;  %v3710_v21 = vrot.slane %v3702_v46, %v7554_v13  ;;  %v3717_v22 = vrot.slane %v3703_v18, %v7554_v13 }
0x1127   :  { %v4655_v18 = vrot.slane %v4647_v5, %v7554_v13 }
0x1128   :  { %v3722_v23 = vcombine.low %v3694_v19, %v3701_v20  ;;  %v6352_v50 = vcombine.high %v3694_v19, %v3701_v20  ;;  %v3738_v24 = vcombine.low %v3710_v21, %v3717_v22  ;;  %v6353_v25 = vcombine.high %v3710_v21, %v3717_v22 }
0x1129   :  { %v4662_v19 = vrot.slane %v4648_v57, %v7554_v13 }
0x112a   :  { %v3729_v53 = vrot.slane %v3722_v23, %v7543_v2  ;;  %v3737_v14 = vrot.slane %v6352_v50, %v7543_v2  ;;  %v3745_v29 = vrot.slane %v3738_v24, %v7543_v2  ;;  %v3753_v30 = vrot.slane %v6353_v25, %v7543_v2 }
0x112b   :  { %v4667_v24 = vcombine.low %v4639_v12, %v4646_v16 }
0x112c   :  { %v3754_v31 = vcombine.low %v3729_v53, %v3737_v14  ;;  %v3770_v32 = vcombine.low %v3745_v29, %v3753_v30  ;;  %v3755_v33 = vcombine.high %v3729_v53, %v3737_v14  ;;  %v3771_v35 = vcombine.high %v3745_v29, %v3753_v30 }
0x112d   :  { %v6368_v14 = vcombine.high %v4639_v12, %v4646_v16  ;;  %v4683_v29 = vcombine.low %v4655_v18, %v4662_v19  ;;  %v6369_v30 = vcombine.high %v4655_v18, %v4662_v19 }
0x112e   :  { %v3762_v36 = vrot.slane %v3754_v31, %v7554_v13  ;;  %v3778_v37 = vrot.slane %v3770_v32, %v7554_v13  ;;  %v8128_v62 = vrot.slane %v3755_v33, %v7554_v13  ;;  %v8131_v38 = vrot.slane %v3771_v35, %v7554_v13 }
0x112f   :  { %v4698_v42 = vrot.slane %v6369_v30, %v7543_v2 }
0x1130   :  { %v3786_v49 = vcombine.low %v3762_v36, %v3778_v37  ;;  %v3787_v39 = vcombine.high %v3762_v36, %v3778_v37  ;;  %v3788_v26 = vcombine.low %v8128_v62, %v8131_v38  ;;  %v3789_v27 = vcombine.high %v8128_v62, %v8131_v38 }
0x1131   :  { %v4674_v37 = vrot.slane %v4667_v24, %v7543_v2 }
0x1132   :  { %6700 = vmatpush3.msra.mxu0 %v3786_v49  ;;  %6705 = vmatpush3.msra.mxu1 %v3787_v39 }
0x1133   :  { %6709 = vmatprep.subr.mxu0 %v7190_v1  ;;  %6714 = vmatprep.subr.mxu1 %v7190_v1 }
0x1135   :  { %4739 = vrot.lane.b32.xlu1 %v8095_v17, %s7195_s24 }
0x113b   :  { %4741 = vrot.lane.b32.xlu0 %v8093_v48, %s7195_s24 }
0x11a9   :  { %v4128_v43 = vpop.xlane.xlu1 %4127 }
0x11aa   :  { %6927 = vrcp.f32 %v4128_v43  ;;  %v4690_v43 = vrot.slane %v4683_v29, %v7543_v2 }
0x11ac   :  { %v4715_v5 = vcombine.low %v4690_v43, %v4698_v42 }
0x11ad   :  { %v4134_v8 = vpop.xlane.xlu0 %4133 }
0x11ae   :  { %6929 = vrcp.f32 %v4134_v8 }
0x11b1   :  { %v4137_v63 = vpop.xlane.xlu1 %4136 }
0x11b2   :  { %v4131_v10 = vpop.xlane.xlu0 %4130 }
0x11b3   :  { %6931 = vrcp.f32 %v4131_v10 }
0x11b4   :  { %v6928_v11 = vpop.eup %6927  ;;  %6933 = vrcp.f32 %v4137_v63 }
0x11b5   :  { %v4139_v41 = vmul.f32 %v6928_v11, %v8097_v7  ;;  %v4740_v44 = vpop.permute.xlu1 %4739 }
0x11b6   :  { %v4747_v45 = vcombine.low %v4736_v28, %v4740_v44  ;;  %v4748_v46 = vcombine.high %v4736_v28, %v4740_v44  ;;  %v4742_v20 = vpop.permute.xlu0 %4741 }
0x11b7   :  { %6702 = vmatmul.mubr.msk.f32.vlgmr.msra.gmra.mrb[32].mxu0 %vm905_vm9, %v4139_v41  ;;  %v4763_v23 = vcombine.low %v4738_v4, %v4742_v20  ;;  %v4764_v50 = vcombine.high %v4738_v4, %v4742_v20  ;;  %v4716_v41 = vcombine.high %v4690_v43, %v4698_v42 }
0x11b8   :  { %v4755_v21 = vrot.slane %v4747_v45, %v7543_v2  ;;  %v4762_v22 = vrot.slane %v4748_v46, %v7543_v2  ;;  %6710 = vmatpush3.msra.mxu0 %v3788_v26  ;;  %6711 = vmatprep.mubr.msk.f32.mxu0 %vm7191_vm1, %v7190_v1  ;;  %v6930_v7 = vpop.eup %6929 }
0x11b9   :  { %6719 = vmatprep.subr.mxu0 %v7190_v1  ;;  %v4771_v25 = vrot.slane %v4763_v23, %v7543_v2  ;;  %v4778_v53 = vrot.slane %v4764_v50, %v7543_v2  ;;  %v4143_v31 = vmul.f32 %v6930_v7, %v8101_v0  ;;  %v4682_v0 = vrot.slane %v6368_v14, %v7543_v2 }
0x11bb   :  { %v4779_v32 = vcombine.low %v4755_v21, %v4771_v25  ;;  %v4780_v33 = vcombine.high %v4755_v21, %v4771_v25  ;;  %v4795_v35 = vcombine.low %v4762_v22, %v4778_v53  ;;  %v4796_v36 = vcombine.high %v4762_v22, %v4778_v53  ;;  %6712 = vmatmul.mubr.msk.f32.vlgmr.msra.gmra.mrb[34].mxu0 %vm905_vm9, %v4143_v31 }
0x11bc   :  { %6721 = vmatprep.mubr.msk.f32.mxu0 %vm7191_vm1, %v7190_v1  ;;  %v4699_v63 = vcombine.low %v4674_v37, %v4682_v0  ;;  %v4730_v22 = vrot.slane %v4716_v41, %v7554_v13 }
0x11bd   :  { %v6932_v49 = vpop.eup %6931  ;;  %v4787_v39 = vrot.slane %v4779_v32, %v7554_v13  ;;  %v4794_v26 = vrot.slane %v4780_v33, %v7554_v13  ;;  %v4803_v28 = vrot.slane %v4795_v35, %v7554_v13  ;;  %v4810_v61 = vrot.slane %v4796_v36, %v7554_v13 }
0x11be   :  { %v4141_v15 = vmul.f32 %v6932_v49, %v8103_v60  ;;  %v6934_v4 = vpop.eup %6933  ;;  %v4707_v38 = vrot.slane %v4699_v63, %v7554_v13 }
0x11bf   :  { %v4815_v51 = vcombine.low %v4787_v39, %v4794_v26  ;;  %v6370_v3 = vcombine.high %v4787_v39, %v4794_v26  ;;  %v4831_v54 = vcombine.low %v4803_v28, %v4810_v61  ;;  %v6371_v52 = vcombine.high %v4803_v28, %v4810_v61 }
0x11c0   :  { %6707 = vmatmul.mubr.msk.f32.vlgmr.msra.gmra.mrb[40].mxu1 %vm905_vm9, %v4141_v15  ;;  %v4145_v60 = vmul.f32 %v6934_v4, %v8107_v6  ;;  %v4700_v6 = vcombine.high %v4674_v37, %v4682_v0 }
0x11c1   :  { %v4822_v8 = vrot.slane %v4815_v51, %v7543_v2  ;;  %v4830_v58 = vrot.slane %v6370_v3, %v7543_v2  ;;  %v4838_v59 = vrot.slane %v4831_v54, %v7543_v2  ;;  %v4846_v55 = vrot.slane %v6371_v52, %v7543_v2  ;;  %6715 = vmatpush3.msra.mxu1 %v3789_v27 }
0x11c2   :  { %6716 = vmatprep.mubr.msk.f32.mxu1 %vm7191_vm1, %v7190_v1  ;;  %6724 = vmatprep.subr.mxu1 %v7190_v1  ;;  %v4723_v27 = vrot.slane %v4715_v5, %v7554_v13  ;;  %v4714_v19 = vrot.slane %v4700_v6, %v7554_v13 }
0x11c3   :  { %v4847_v57 = vcombine.low %v4822_v8, %v4830_v58  ;;  %v4848_v10 = vcombine.high %v4822_v8, %v4830_v58  ;;  %v4863_v11 = vcombine.low %v4838_v59, %v4846_v55  ;;  %v4864_v12 = vcombine.high %v4838_v59, %v4846_v55 }
0x11c4   :  { %6717 = vmatmul.mubr.msk.f32.vlgmr.msra.gmra.mrb[42].mxu1 %vm905_vm9, %v4145_v60  ;;  %v4731_v20 = vcombine.low %v4707_v38, %v4723_v27  ;;  %v4732_v21 = vcombine.high %v4707_v38, %v4723_v27  ;;  %v4733_v24 = vcombine.low %v4714_v19, %v4730_v22  ;;  %v4734_v7 = vcombine.high %v4714_v19, %v4730_v22 }
0x11c5   :  { %v4855_v16 = vrot.slane %v4847_v57, %v7554_v13  ;;  %v4871_v62 = vrot.slane %v4863_v11, %v7554_v13  ;;  %6726 = vmatprep.mubr.msk.f32.mxu1 %vm7191_vm1, %v7190_v1  ;;  %v4862_v46 = vrot.slane %v4848_v10, %v7554_v13  ;;  %v4878_v18 = vrot.slane %v4864_v12, %v7554_v13 }
0x11c7   :  { %v4879_v44 = vcombine.low %v4855_v16, %v4871_v62  ;;  %v4880_v45 = vcombine.high %v4855_v16, %v4871_v62  ;;  %v4881_v23 = vcombine.low %v4862_v46, %v4878_v18  ;;  %v4882_v50 = vcombine.high %v4862_v46, %v4878_v18 }
0x11c9   :  { %6720 = vmatpush3.xpose.msk.msra.mxu0 %vm905_vm9, %v4879_v44  ;;  %6725 = vmatpush3.xpose.msk.msra.mxu1 %vm905_vm9, %v4880_v45 }
0x11ca   :  { %6729 = vmatprep.subr.mxu0 %v7190_v1  ;;  %6734 = vmatprep.subr.mxu1 %v7190_v1 }
0x11cc   :  { %6722 = vmatmul.mubr.msk.f32.vlgmr.msra.gmra.mrb[36].mxu0 %vm905_vm9, %v4731_v20  ;;  %6727 = vmatmul.mubr.msk.f32.vlgmr.msra.gmra.mrb[44].mxu1 %vm905_vm9, %v4732_v21 }
0x11cd   :  { %6730 = vmatpush3.xpose.msk.msra.mxu0 %vm905_vm9, %v4881_v23  ;;  %6735 = vmatpush3.xpose.msk.msra.mxu1 %vm905_vm9, %v4882_v50 }
0x11ce   :  { %6731 = vmatprep.mubr.msk.f32.mxu0 %vm7191_vm1, %v7190_v1  ;;  %6736 = vmatprep.mubr.msk.f32.mxu1 %vm7191_vm1, %v7190_v1 }
0x11cf   :  { %6739 = vmatprep.subr.mxu0 %v7190_v1  ;;  %6744 = vmatprep.subr.mxu1 %v7190_v1 }
0x11d0   :  { %6732 = vmatmul.mubr.msk.f32.vlgmr.msra.gmra.mrb[38].mxu0 %vm905_vm9, %v4733_v24  ;;  %6737 = vmatmul.mubr.msk.f32.vlgmr.msra.gmra.mrb[46].mxu1 %vm905_vm9, %v4734_v7 }
0x11d1   :  { %6741 = vmatprep.mubr.msk.f32.mxu0 %vm7191_vm1, %v7190_v1  ;;  %6746 = vmatprep.mubr.msk.f32.mxu1 %vm7191_vm1, %v7190_v1 }
0x128a   :  { %v4215_v25 = vpop.f32.mrb[32].mxu0 }
0x128b   :  { %v6703_v53 = vpop.f32.mrb[33].mxu0 }
0x128e   :  { %v4361_v14 = vpop.f32.mrb[34].mxu0 }
0x128f   :  { %v4438_v29 = vcombine.low %v4215_v25, %v4361_v14  ;;  %v4439_v30 = vcombine.high %v4215_v25, %v4361_v14  ;;  %v6713_v31 = vpop.f32.mrb[35].mxu0 }
0x1291   :  { %v4446_v39 = vrot.slane %v4438_v29, %v7543_v2  ;;  %v4453_v26 = vrot.slane %v4439_v30, %v7543_v2 }
0x1293   :  { %v4288_v32 = vpop.f32.mrb[40].mxu1 }
0x1294   :  { %v6708_v33 = vpop.f32.mrb[41].mxu1 }
0x1297   :  { %v4434_v35 = vpop.f32.mrb[42].mxu1 }
0x1298   :  { %v4454_v36 = vcombine.low %v4288_v32, %v4434_v35  ;;  %v4455_v37 = vcombine.high %v4288_v32, %v4434_v35  ;;  %v6718_v49 = vpop.f32.mrb[43].mxu1 }
0x129a   :  { %v4462_v28 = vrot.slane %v4454_v36, %v7543_v2  ;;  %v4469_v61 = vrot.slane %v4455_v37, %v7543_v2 }
0x129c   :  { %v4470_v0 = vcombine.low %v4446_v39, %v4462_v28  ;;  %v4471_v43 = vcombine.high %v4446_v39, %v4462_v28  ;;  %v4486_v42 = vcombine.low %v4453_v26, %v4469_v61  ;;  %v4487_v15 = vcombine.high %v4453_v26, %v4469_v61 }
0x129e   :  { %v4478_v4 = vrot.slane %v4470_v0, %v7554_v13  ;;  %v4485_v51 = vrot.slane %v4471_v43, %v7554_v13  ;;  %v4494_v3 = vrot.slane %v4486_v42, %v7554_v13  ;;  %v4501_v54 = vrot.slane %v4487_v15, %v7554_v13 }
0x129f   :  { %v5103_v52 = vpop.f32.mrb[36].mxu0  ;;  %v5179_v8 = vpop.f32.mrb[44].mxu1 }
0x12a0   :  { %v4506_v58 = vcombine.low %v4478_v4, %v4485_v51  ;;  %v6366_v59 = vcombine.high %v4478_v4, %v4485_v51  ;;  %v4522_v55 = vcombine.low %v4494_v3, %v4501_v54  ;;  %v6367_v60 = vcombine.high %v4494_v3, %v4501_v54  ;;  %v6723_v63 = vpop.f32.mrb[37].mxu0  ;;  %v6728_v5 = vpop.f32.mrb[45].mxu1 }
0x12a1   :  { %v5335_v57 = vmul.f32 0.35355338, %v5103_v52  ;;  %v5336_v10 = vmul.f32 0.35355338, %v5179_v8 }
0x12a2   :  { %v4513_v11 = vrot.slane %v4506_v58, %v7543_v2  ;;  %v4521_v12 = vrot.slane %v6366_v59, %v7543_v2  ;;  %v4529_v16 = vrot.slane %v4522_v55, %v7543_v2  ;;  %v4537_v62 = vrot.slane %v6367_v60, %v7543_v2 }
0x12a3   :  { %v5255_v6 = vpop.f32.mrb[38].mxu0  ;;  %v5331_v38 = vpop.f32.mrb[46].mxu1  ;;  %v5340_v27 = vadd.f32 %v5336_v10, %v7464_v9  ;;  %v5339_v41 = vadd.f32 %v5335_v57, %v7464_v9 }
0x12a4   :  { %v5337_v44 = vmul.f32 0.35355338, %v5255_v6  ;;  %v5338_v45 = vmul.f32 0.35355338, %v5331_v38  ;;  %v6733_v46 = vpop.f32.mrb[39].mxu0  ;;  %v6738_v18 = vpop.f32.mrb[47].mxu1  ;;  %v4539_v19 = vcombine.high %v4513_v11, %v4521_v12  ;;  %v4555_v20 = vcombine.high %v4529_v16, %v4537_v62 }
0x12a5   :  { %v5346_v21 = vsel %vm905_vm9, %v5340_v27, -inf  ;;  %v5343_v22 = vsel %vm905_vm9, %v5339_v41, -inf  ;;  %v4538_v23 = vcombine.low %v4513_v11, %v4521_v12  ;;  %v4554_v50 = vcombine.low %v4529_v16, %v4537_v62 }
0x12a6   :  { %5347 = vmax.xlane.f32.xlu0 %v5346_v21  ;;  %5344 = vmax.xlane.f32.xlu1 %v5343_v22  ;;  %v5342_v24 = vadd.f32 %v5338_v45, %v7464_v9  ;;  %v5341_v7 = vadd.f32 %v5337_v44, %v7464_v9  ;;  %v8243_v25 = vrot.slane %v4539_v19, %v7554_v13 }
0x12a7   :  { %v8246_v53 = vrot.slane %v4555_v20, %v7554_v13  ;;  %v8249_v14 = vrot.slane %v4538_v23, %v7554_v13  ;;  %v8252_v29 = vrot.slane %v4554_v50, %v7554_v13 }
0x12a8   :  { %v5352_v30 = vsel %vm905_vm9, %v5342_v24, -inf  ;;  %v5349_v31 = vsel %vm905_vm9, %v5341_v7, -inf }
0x12a9   :  { %v4572_v32 = vcombine.low %v8243_v25, %v8246_v53  ;;  %v4570_v9 = vcombine.low %v8249_v14, %v8252_v29  ;;  %v4571_v33 = vcombine.high %v8249_v14, %v8252_v29  ;;  %v4573_v35 = vcombine.high %v8243_v25, %v8246_v53  ;;  %v6392_v14 = vld [vmem:[#allocation13 + $0x1] ss:$0 sm:$0xff] }
0x12aa   :  { %5353 = vmax.xlane.f32.xlu1 %v5352_v30  ;;  %5350 = vmax.xlane.f32.xlu0 %v5349_v31 }
0x12bb   :  { %4885 = vrot.lane.b32.xlu1 %v8089_v34, %s7179_s2 }
0x12c0   :  { %4883 = vrot.lane.b32.xlu0 %v7983_v47, %s7179_s2 }
0x1333   :  { %v5348_v36 = vpop.xlane.xlu0 %5347  ;;  %v5345_v37 = vpop.xlane.xlu1 %5344 }
0x1334   :  { %v5356_v49 = vsub.f32 %v5340_v27, %v5348_v36  ;;  %v5355_v39 = vsub.f32 %v5339_v41, %v5345_v37 }
0x1336   :  { %v5361_v26 = vmul.f32 1.442695, %v5356_v49  ;;  %v5359_v28 = vmul.f32 1.442695, %v5355_v39 }
0x1337   :  { %v5354_v61 = vpop.xlane.xlu1 %5353  ;;  %v5351_v0 = vpop.xlane.xlu0 %5350 }
0x1338   :  { %6935 = vpow2.f32 %v5361_v26  ;;  %v5358_v43 = vsub.f32 %v5342_v24, %v5354_v61  ;;  %v5357_v42 = vsub.f32 %v5341_v7, %v5351_v0 }
0x1339   :  { %6937 = vpow2.f32 %v5359_v28 }
0x133a   :  { %v5365_v15 = vmul.f32 1.442695, %v5358_v43  ;;  %v5363_v4 = vmul.f32 1.442695, %v5357_v42 }
0x133b   :  { %v4886_v59 = vpop.permute.xlu1 %4885  ;;  %v4884_v55 = vpop.permute.xlu0 %4883 }
0x133c   :  { %6939 = vpow2.f32 %v5365_v15 }
0x133d   :  { %6941 = vpow2.f32 %v5363_v4 }
0x1342   :  { %v8268_v34 = vpop.eup %6935 }
0x1343   :  { %v8270_v51 = vpop.eup %6937  ;;  %v5370_v47 = vsel %vm905_vm9, %v8268_v34, 0.0 }
0x1344   :  { %5371 = vadd.xlane.f32.xlu1 %v5370_v47  ;;  %v5367_v3 = vsel %vm905_vm9, %v8270_v51, 0.0 }
0x1345   :  { %5368 = vadd.xlane.f32.xlu0 %v5367_v3 }
0x1346   :  { %v8276_v54 = vpop.eup %6939 }
0x1347   :  { %v8278_v52 = vpop.eup %6941  ;;  %v5376_v8 = vsel %vm905_vm9, %v8276_v54, 0.0 }
0x1348   :  { %5377 = vadd.xlane.f32.xlu1 %v5376_v8  ;;  %v5373_v58 = vsel %vm905_vm9, %v8278_v52, 0.0 }
0x1349   :  { %5374 = vadd.xlane.f32.xlu0 %v5373_v58 }
0x1359   :  { %4887 = vrot.lane.b32.xlu1 %v8095_v17, %s7179_s2 }
0x135f   :  { %4889 = vrot.lane.b32.xlu0 %v8093_v48, %s7179_s2 }
0x13d1   :  { %v5372_v60 = vpop.xlane.xlu1 %5371 }
0x13d2   :  { %v5369_v63 = vpop.xlane.xlu0 %5368  ;;  %6943 = vrcp.f32 %v5372_v60 }
0x13d3   :  { %6945 = vrcp.f32 %v5369_v63 }
0x13d5   :  { %v5378_v5 = vpop.xlane.xlu1 %5377 }
0x13d6   :  { %v5375_v57 = vpop.xlane.xlu0 %5374  ;;  %6947 = vrcp.f32 %v5378_v5 }
0x13d7   :  { %6949 = vrcp.f32 %v5375_v57 }
0x13d9   :  { %v4888_v10 = vpop.permute.xlu1 %4887 }
0x13da   :  { %v4895_v11 = vcombine.low %v4884_v55, %v4888_v10  ;;  %v4896_v12 = vcombine.high %v4884_v55, %v4888_v10  ;;  %v4890_v16 = vpop.permute.xlu0 %4889 }
0x13db   :  { %v4911_v62 = vcombine.low %v4886_v59, %v4890_v16  ;;  %v4912_v6 = vcombine.high %v4886_v59, %v4890_v16 }
0x13dc   :  { %v4903_v38 = vrot.slane %v4895_v11, %v7543_v2  ;;  %v4910_v27 = vrot.slane %v4896_v12, %v7543_v2  ;;  %v6944_v39 = vpop.eup %6943 }
0x13dd   :  { %v4919_v17 = vrot.slane %v4911_v62, %v7543_v2  ;;  %v4926_v48 = vrot.slane %v4912_v6, %v7543_v2  ;;  %v6946_v0 = vpop.eup %6945  ;;  %v5382_v8 = vmul.f32 %v6944_v39, %v8268_v34 }
0x13de   :  { %v5380_v58 = vmul.f32 %v6946_v0, %v8270_v51  ;;  %v6870_v0 = vld [vmem:[%s8458_s10 + $0x18] sm:$0xff]  }
0x13df   :  { %v4927_v41 = vcombine.low %v4903_v38, %v4919_v17  ;;  %v4928_v44 = vcombine.high %v4903_v38, %v4919_v17  ;;  %v4943_v45 = vcombine.low %v4910_v27, %v4926_v48  ;;  %v4944_v46 = vcombine.high %v4910_v27, %v4926_v48 }
0x13e0   :  { %v6948_v3 = vpop.eup %6947 }
0x13e1   :  { %v4935_v18 = vrot.slane %v4927_v41, %v7554_v13  ;;  %v4942_v19 = vrot.slane %v4928_v44, %v7554_v13  ;;  %v4951_v20 = vrot.slane %v4943_v45, %v7554_v13  ;;  %v4958_v21 = vrot.slane %v4944_v46, %v7554_v13  ;;  %v6950_v59 = vpop.eup %6949 }
0x13e2   :  { %v5386_v63 = vmul.f32 %v6948_v3, %v8276_v54  ;;  %v5384_v5 = vmul.f32 %v6950_v59, %v8278_v52 }
0x13e3   :  { %v4963_v22 = vcombine.low %v4935_v18, %v4942_v19  ;;  %v6372_v23 = vcombine.high %v4935_v18, %v4942_v19  ;;  %v4979_v50 = vcombine.low %v4951_v20, %v4958_v21  ;;  %v6373_v24 = vcombine.high %v4951_v20, %v4958_v21 }
0x13e5   :  { %v4970_v7 = vrot.slane %v4963_v22, %v7543_v2  ;;  %v4978_v30 = vrot.slane %v6372_v23, %v7543_v2  ;;  %v4986_v31 = vrot.slane %v4979_v50, %v7543_v2  ;;  %v4994_v36 = vrot.slane %v6373_v24, %v7543_v2 }
0x13e7   :  { %v4995_v37 = vcombine.low %v4970_v7, %v4978_v30  ;;  %v4996_v49 = vcombine.high %v4970_v7, %v4978_v30  ;;  %v5011_v26 = vcombine.low %v4986_v31, %v4994_v36  ;;  %v5012_v28 = vcombine.high %v4986_v31, %v4994_v36  ;;  %v6869_v30 = vld [vmem:[%s8458_s10 + $0x10] sm:$0xff]   ;;  %s8495_s10 = sld [smem:[#allocation30_spill]] }
0x13e9   :  { %v5003_v61 = vrot.slane %v4995_v37, %v7554_v13  ;;  %v5019_v43 = vrot.slane %v5011_v26, %v7554_v13  ;;  %v5010_v42 = vrot.slane %v4996_v49, %v7554_v13  ;;  %v5026_v15 = vrot.slane %v5012_v28, %v7554_v13 }
0x13eb   :  { %v5027_v4 = vcombine.low %v5003_v61, %v5019_v43  ;;  %v5028_v47 = vcombine.high %v5003_v61, %v5019_v43  ;;  %v5029_v55 = vcombine.low %v5010_v42, %v5026_v15  ;;  %v5030_v60 = vcombine.high %v5010_v42, %v5026_v15 }
0x13ed   :  { %6740 = vmatpush3.msra.mxu0 %v5027_v4  ;;  %6745 = vmatpush3.msra.mxu1 %v5028_v47 }
0x13ee   :  { %6742 = vmatmul.mubr.msk.f32.vlgmr.msra.gmra.mrb[40].mxu0 %vm905_vm9, %v5380_v58  ;;  %6747 = vmatmul.mubr.msk.f32.vlgmr.msra.gmra.mrb[48].mxu1 %vm905_vm9, %v5382_v8 }
0x13ef   :  { %6749 = vmatprep.subr.mxu0 %v7190_v1  ;;  %6754 = vmatprep.subr.mxu1 %v7190_v1 }
0x13f0   :  { %6750 = vmatpush3.msra.mxu0 %v5029_v55  ;;  %6755 = vmatpush3.msra.mxu1 %v5030_v60 }
0x13f1   :  { %6751 = vmatprep.mubr.msk.f32.mxu0 %vm7191_vm1, %v7190_v1  ;;  %6756 = vmatprep.mubr.msk.f32.mxu1 %vm7191_vm1, %v7190_v1 }
0x13f2   :  { %6752 = vmatmul.mubr.msk.f32.vlgmr.msra.gmra.mrb[42].mxu0 %vm905_vm9, %v5384_v5  ;;  %6757 = vmatmul.mubr.msk.f32.vlgmr.msra.gmra.mrb[50].mxu1 %vm905_vm9, %v5386_v63 }
0x13f3   :  { %6759 = vmatprep.subr.bf16.mxu0 %v7190_v1  ;;  %6763 = vmatprep.mubr.msk.bf16.mxu0 %vm7191_vm1, %v7190_v1 }
0x13f4   :  { %6767 = vmatprep.subr.bf16.mxu1 %v7190_v1  ;;  %6771 = vmatprep.mubr.msk.bf16.mxu1 %vm7191_vm1, %v7190_v1 }
0x13f5   :  { %6760 = vmatpush3.bf16.msra.mxu0 %v6869_v30 }
0x13f6   :  { %6761 = vmatprep.subr.bf16.mxu0 %v7190_v1 }
0x13f9   :  { %6762 = vmatpush3.bf16.msra.mxu0 %v6870_v0 }
0x13fa   :  { %6775 = vmatprep.subr.bf16.mxu0 %v7190_v1 }
0x14c1   :  { %v5456_v34 = vpop.f32.mrb[40].mxu0  ;;  %v5529_v51 = vpop.f32.mrb[48].mxu1 }
0x14c2   :  { %v6743_v54 = vpop.f32.mrb[41].mxu0  ;;  %v6748_v52 = vpop.f32.mrb[49].mxu1 }
0x14c5   :  { %v5602_v57 = vpop.f32.mrb[42].mxu0  ;;  %v5675_v10 = vpop.f32.mrb[50].mxu1 }
0x14c6   :  { %v5679_v11 = vcombine.low %v5456_v34, %v5602_v57  ;;  %v5680_v12 = vcombine.high %v5456_v34, %v5602_v57  ;;  %v5695_v16 = vcombine.low %v5529_v51, %v5675_v10  ;;  %v5696_v62 = vcombine.high %v5529_v51, %v5675_v10  ;;  %v6753_v6 = vpop.f32.mrb[43].mxu0  ;;  %v6758_v38 = vpop.f32.mrb[51].mxu1 }
0x14c8   :  { %v5687_v27 = vrot.slane %v5679_v11, %v7543_v2  ;;  %v5694_v17 = vrot.slane %v5680_v12, %v7543_v2  ;;  %v5703_v48 = vrot.slane %v5695_v16, %v7543_v2  ;;  %v5710_v41 = vrot.slane %v5696_v62, %v7543_v2 }
0x14ca   :  { %v5711_v44 = vcombine.low %v5687_v27, %v5703_v48  ;;  %v5712_v45 = vcombine.high %v5687_v27, %v5703_v48  ;;  %v5727_v46 = vcombine.low %v5694_v17, %v5710_v41  ;;  %v5728_v18 = vcombine.high %v5694_v17, %v5710_v41 }
0x14cc   :  { %v5719_v19 = vrot.slane %v5711_v44, %v7554_v13  ;;  %v5726_v20 = vrot.slane %v5712_v45, %v7554_v13  ;;  %v5735_v21 = vrot.slane %v5727_v46, %v7554_v13  ;;  %v5742_v22 = vrot.slane %v5728_v18, %v7554_v13  ;;  %v6873_v18 = vld [vmem:[%s8464_s16 + $0x20] sm:$0xff]  }
0x14ce   :  { %v5747_v23 = vcombine.low %v5719_v19, %v5726_v20  ;;  %v6386_v50 = vcombine.high %v5719_v19, %v5726_v20  ;;  %v5763_v24 = vcombine.low %v5735_v21, %v5742_v22  ;;  %v6387_v7 = vcombine.high %v5735_v21, %v5742_v22  ;;  %v6874_v19 = vld [vmem:[%s8464_s16 + $0x28] sm:$0xff]  }
0x14d0   :  { %v5754_v31 = vrot.slane %v5747_v23, %v7543_v2  ;;  %v5762_v36 = vrot.slane %v6386_v50, %v7543_v2  ;;  %v5770_v37 = vrot.slane %v5763_v24, %v7543_v2  ;;  %v5778_v49 = vrot.slane %v6387_v7, %v7543_v2 }
0x14d2   :  { %v5780_v39 = vcombine.high %v5754_v31, %v5762_v36  ;;  %v5796_v26 = vcombine.high %v5770_v37, %v5778_v49  ;;  %v5779_v28 = vcombine.low %v5754_v31, %v5762_v36  ;;  %v5795_v61 = vcombine.low %v5770_v37, %v5778_v49 }
0x14d4   :  { %v5794_v43 = vrot.slane %v5780_v39, %v7554_v13  ;;  %v5810_v42 = vrot.slane %v5796_v26, %v7554_v13  ;;  %v5787_v15 = vrot.slane %v5779_v28, %v7554_v13  ;;  %v5803_v4 = vrot.slane %v5795_v61, %v7554_v13 }
0x14d6   :  { %v5813_v2 = vcombine.low %v5794_v43, %v5810_v42  ;;  %v5812_v47 = vcombine.high %v5787_v15, %v5803_v4  ;;  %v5811_v3 = vcombine.low %v5787_v15, %v5803_v4  ;;  %v5814_v8 = vcombine.high %v5794_v43, %v5810_v42  ;;  %v6397_v43 = vld [vmem:[#allocation14 + $0x1] ss:$0 sm:$0xff] }
0x14d8   :  { %v6841_v58 = vpack.i.bf16 %v5813_v2, %v4572_v32  ;;  %v6836_v59 = vpack.i.bf16 %v5812_v47, %v4571_v33  ;;  %v6846_v55 = vpack.i.bf16 %v5814_v8, %v4573_v35  ;;  %v6398_v47 = vld [vmem:[%s8461_s13 + $0x1] ss:$0 sm:$0xff] }
0x14da   :  { %6842 = vrot.lane.b32.xlu0 %v6841_v58, %s7186_s27  ;;  %6837 = vrot.lane.b32.xlu1 %v6836_v59, %s7198_s25 }
0x14de   :  { %6847 = vrot.lane.b32.xlu1 %v6846_v55, %s7199_s1  ;;  %v6875_v55 = vld [vmem:[%s8464_s16 + $0x30] sm:$0xff]  }
0x154c   :  { %v6843_v13 = vpop.permute.xlu0 %6842  ;;  %v6838_v60 = vpop.permute.xlu1 %6837 }
0x154d   :  { %v6840_v63 = vunpack.i.h.bf16 %v6838_v60  ;;  %v6839_v5 = vunpack.i.l.bf16 %v6838_v60  ;;  %v6845_v34 = vunpack.i.h.bf16 %v6843_v13  ;;  %v6844_v32 = vunpack.i.l.bf16 %v6843_v13  ;;  %v6876_v13 = vld [vmem:[%s8464_s16 + $0x38] sm:$0xff]   ;;  %v6404_v60 = vld [vmem:[%s8463_s15 + $0x1] ss:$0 sm:$0xff] }
0x154f   :  { %v4586_v33 = vsel %vm905_vm9, %v4570_v9, %v6839_v5  ;;  %v5827_v25 = vsel %vm905_vm9, %v5811_v3, %v6840_v63 }
0x1550   :  { %v6848_v53 = vpop.permute.xlu1 %6847  ;;  %v4587_v54 = vsel %vm266_vm2, %v4586_v33, %v6844_v32  ;;  %v5828_v52 = vsel %vm266_vm2, %v5827_v25, %v6845_v34 }
0x1551   :  { %v6850_v35 = vunpack.i.h.bf16 %v6848_v53  ;;  %v6849_v51 = vunpack.i.l.bf16 %v6848_v53 }
0x1553   :  { %v4588_v57 = vsel %vm330_vm7, %v4587_v54, %v6849_v51  ;;  %v5829_v10 = vsel %vm330_vm7, %v5828_v52, %v6850_v35  ;;  %v6417_v54 = vld [vmem:[%s8465_s17 + $0x1] ss:$0 sm:$0xff] }
0x1554   :  { %v5830_v11 = vpack.c.bf16 %v5829_v10, %v4588_v57 }
0x1556   :  { %6764 = vmatmul.mubr.msk.bf16.vlgmr.msra.gmra.mrb[44].mxu0 %vm418_vm8, %v5830_v11 }
0x1557   :  { %6783 = vmatprep.mubr.msk.bf16.mxu0 %vm7191_vm1, %v7190_v1  ;;  %6776 = vmatpush3.bf16.msra.mxu0 %v6873_v18 }
0x1558   :  { %6777 = vmatprep.subr.bf16.mxu0 %v7190_v1 }
0x155b   :  { %6778 = vmatpush3.bf16.msra.mxu0 %v6874_v19 }
0x155c   :  { %6779 = vmatprep.subr.bf16.mxu0 %v7190_v1 }
0x155f   :  { %6780 = vmatpush3.bf16.msra.mxu0 %v6875_v55 }
0x1560   :  { %6781 = vmatprep.subr.bf16.mxu0 %v7190_v1 }
0x1563   :  { %6782 = vmatpush3.bf16.msra.mxu0 %v6876_v13 }
0x1629   :  { %v5893_v29 = vpop.f32.mrb[44].mxu0 }
0x162a   :  { %v5894_v9 = vadd.f32 %v6392_v14, %v5893_v29  ;;  %v6765_v12 = vpop.f32.mrb[45].mxu0 }
0x162b   :  { %v5896_v16 = vpop.f32.mrb[46].mxu0 }
0x162c   :  { %v5900_v62 = vadd.f32 %v5894_v9, %v7969_v40  ;;  %v5897_v6 = vadd.f32 %v6392_v14, %v5896_v16  ;;  %v6766_v38 = vpop.f32.mrb[47].mxu0  ;;  %v6871_v40 = vld [vmem:[%s8462_s14 + $0x10] sm:$0xff]  }
0x162d   :  { %6768 = vmatpush3.bf16.msra.mxu1 %v6871_v40 }
0x162e   :  { %v5901_v27 = vadd.f32 %v5897_v6, %v7971_v56  ;;  %v5906_v17 = vsel %vm418_vm8, %v5900_v62, 0.0  ;;  %v5914_v48 = vmul.f32 %v5900_v62, %v5900_v62  ;;  %v6872_v56 = vld [vmem:[%s8462_s14 + $0x18] sm:$0xff]   ;;  %6769 = vmatprep.subr.bf16.mxu1 %v7190_v1 }
0x162f   :  { %5907 = vadd.xlane.f32.xlu0 %v5906_v17 }
0x1630   :  { %v5909_v41 = vsel %vm418_vm8, %v5901_v27, 0.0  ;;  %v5916_v44 = vsel %vm418_vm8, %v5914_v48, 0.0  ;;  %v5915_v45 = vmul.f32 %v5901_v27, %v5901_v27  ;;  %v6877_v48 = vld [vmem:[%s8468_s20] sm:$0xff]  }
0x1631   :  { %5910 = vadd.xlane.f32.xlu1 %v5909_v41  ;;  %6770 = vmatpush3.bf16.msra.mxu1 %v6872_v56  ;;  %v6878_v41 = vld [vmem:[%s8468_s20 + $0x8] sm:$0xff]  }
0x1632   :  { %v5919_v46 = vsel %vm418_vm8, %v5915_v45, 0.0  ;;  %6787 = vmatprep.subr.bf16.mxu1 %v7190_v1 }
0x1633   :  { %5917 = vadd.xlane.f32.xlu0 %v5916_v44 }
0x1637   :  { %5920 = vadd.xlane.f32.xlu0 %v5919_v46 }
0x16bc   :  { %v5908_v20 = vpop.xlane.xlu0 %5907 }
0x16bd   :  { %v5912_v21 = vmul.f32 0.03125, %v5908_v20 }
0x16be   :  { %v5911_v22 = vpop.xlane.xlu1 %5910 }
0x16bf   :  { %v5924_v50 = vmul.f32 %v5912_v21, %v5912_v21  ;;  %v5913_v24 = vmul.f32 0.03125, %v5911_v22  ;;  %v5928_v28 = vsub.f32 %v5900_v62, %v5912_v21 }
0x16c0   :  { %v5918_v23 = vpop.xlane.xlu0 %5917 }
0x16c1   :  { %v5922_v7 = vmul.f32 0.03125, %v5918_v23  ;;  %v5925_v36 = vmul.f32 %v5913_v24, %v5913_v24  ;;  %v5929_v42 = vsub.f32 %v5901_v27, %v5913_v24 }
0x16c3   :  { %v5926_v30 = vsub.f32 %v5922_v7, %v5924_v50 }
0x16c4   :  { %v5921_v31 = vpop.xlane.xlu0 %5920 }
0x16c5   :  { %v5930_v37 = vadd.f32 1e-05, %v5926_v30  ;;  %v5923_v49 = vmul.f32 0.03125, %v5921_v31 }
0x16c7   :  { %6951 = vrsqrt.f32 %v5930_v37  ;;  %v5927_v39 = vsub.f32 %v5923_v49, %v5925_v36 }
0x16c9   :  { %v5931_v26 = vadd.f32 1e-05, %v5927_v39 }
0x16cb   :  { %6953 = vrsqrt.f32 %v5931_v26 }
0x16d1   :  { %v6952_v61 = vpop.eup %6951 }
0x16d2   :  { %v5934_v0 = vmul.f32 %v6952_v61, %v5928_v28  ;;  %v6426_v28 = vld [vmem:[%s8467_s19 + $0x1] ss:$0 sm:$0xff] }
0x16d4   :  { %v5942_v2 = vmul.f32 %v6397_v43, %v5934_v0 }
0x16d5   :  { %v6954_v15 = vpop.eup %6953 }
0x16d6   :  { %v5935_v4 = vmul.f32 %v6954_v15, %v5929_v42  ;;  %v5950_v8 = vadd.f32 %v6398_v47, %v5942_v2  ;;  %v6427_v15 = vld [vmem:[%s8495_s10] ss:$0 sm:$0xff] }
0x16d8   :  { %v5943_v3 = vmul.f32 %v6397_v43, %v5935_v4 }
0x16da   :  { %v5951_v58 = vadd.f32 %v6398_v47, %v5943_v3 }
0x16dc   :  { %v5952_v59 = vpack.c.bf16 %v5951_v58, %v5950_v8 }
0x16de   :  { %6772 = vmatmul.mubr.msk.bf16.vlgmr.msra.gmra.mrb[52].mxu1 %vm418_vm8, %v5952_v59 }
0x16df   :  { %6791 = vmatprep.mubr.msk.bf16.mxu1 %vm7191_vm1, %v7190_v1  ;;  %6788 = vmatpush3.bf16.msra.mxu1 %v6877_v48 }
0x16e0   :  { %6789 = vmatprep.subr.bf16.mxu1 %v7190_v1  ;;  %v6425_v1 = vld [vmem:[%s8466_s18 + $0x1] ss:$0 sm:$0xff]  ;;  %s7200_s18 = smov [#allocation16]  }
0x16e1   :  { %s6249_s19 = sshll.u32 %s7200_s18, 4  ;;  %s6250_s19 = int_to_ptr.vmem [resolvable:$true] %s6249_s19 }
0x16e2   :  { %s7143_s27 = scalar_lea.vmem %s6250_s19, 256  ;;  %p7148_p9 = scmp.lt.s32.totalorder %s6250_s19, %s6250_s19 }
0x16e3   :  { %6790 = vmatpush3.bf16.msra.mxu1 %v6878_v41  ;;  %p7144_p8 = scmp.ne.s32.totalorder %s6250_s19, %s7143_s27  ;;  %p7149_p10 = scmp.lt.s32.totalorder %s7143_s27, %s7143_s27 }
0x16e5   :  { %p7150_p11 = por %p7149_p10, %p7148_p9 }
0x16e7   :  { %p7151_p12 = pnand %p7150_p11, %p7144_p8 }
0x17b1   :  { %v6015_v63 = vpop.f32.mrb[52].mxu1 }
0x17b2   :  { %v6016_v5 = vadd.f32 %v6404_v60, %v6015_v63  ;;  %v6773_v34 = vpop.f32.mrb[53].mxu1 }
0x17b3   :  { %v6018_v32 = vpop.f32.mrb[54].mxu1 }
0x17b4   :  { %v6019_v33 = vadd.f32 %v6404_v60, %v6018_v32  ;;  %v6774_v25 = vpop.f32.mrb[55].mxu1  ;;  %v6022_v53 = vmax.f32 %v6016_v5, 0.0 }
0x17b6   :  { %v6023_v35 = vmax.f32 %v6019_v33, 0.0 }
0x17b8   :  { %v6024_v51 = vpack.c.bf16 %v6023_v35, %v6022_v53 }
0x17ba   :  { %6784 = vmatmul.mubr.msk.bf16.vlgmr.msra.gmra.mrb[48].mxu0 %vm3183_vm10, %v6024_v51 }
0x188d   :  { %v6103_v52 = vpop.f32.mrb[48].mxu0 }
0x188e   :  { %v6104_v57 = vadd.f32 %v6417_v54, %v6103_v52  ;;  %v6785_v10 = vpop.f32.mrb[49].mxu0 }
0x188f   :  { %v6106_v11 = vpop.f32.mrb[50].mxu0 }
0x1890   :  { %v6110_v14 = vadd.f32 %v6104_v57, %v5950_v8  ;;  %v6107_v29 = vadd.f32 %v6417_v54, %v6106_v11  ;;  %v6786_v9 = vpop.f32.mrb[51].mxu0 }
0x1892   :  { %v6111_v12 = vadd.f32 %v6107_v29, %v5951_v58  ;;  %v6116_v16 = vsel %vm418_vm8, %v6110_v14, 0.0  ;;  %v6124_v62 = vmul.f32 %v6110_v14, %v6110_v14 }
0x1893   :  { %6117 = vadd.xlane.f32.xlu1 %v6116_v16 }
0x1894   :  { %v6119_v6 = vsel %vm418_vm8, %v6111_v12, 0.0  ;;  %v6125_v38 = vmul.f32 %v6111_v12, %v6111_v12  ;;  %v6126_v27 = vsel %vm418_vm8, %v6124_v62, 0.0 }
0x1895   :  { %6120 = vadd.xlane.f32.xlu0 %v6119_v6 }
0x1896   :  { %v6129_v17 = vsel %vm418_vm8, %v6125_v38, 0.0 }
0x1897   :  { %6127 = vadd.xlane.f32.xlu1 %v6126_v27 }
0x1899   :  { %6130 = vadd.xlane.f32.xlu0 %v6129_v17 }
0x1920   :  { %v6118_v44 = vpop.xlane.xlu1 %6117 }
0x1921   :  { %v6122_v45 = vmul.f32 0.03125, %v6118_v44 }
0x1922   :  { %v6121_v46 = vpop.xlane.xlu0 %6120 }
0x1923   :  { %v6123_v40 = vmul.f32 0.03125, %v6121_v46  ;;  %v6134_v18 = vmul.f32 %v6122_v45, %v6122_v45  ;;  %v6138_v30 = vsub.f32 %v6110_v14, %v6122_v45 }
0x1924   :  { %v6128_v56 = vpop.xlane.xlu1 %6127 }
0x1925   :  { %v6132_v19 = vmul.f32 0.03125, %v6128_v56  ;;  %v6135_v21 = vmul.f32 %v6123_v40, %v6123_v40  ;;  %v6139_v36 = vsub.f32 %v6111_v12, %v6123_v40 }
0x1926   :  { %v6131_v20 = vpop.xlane.xlu0 %6130 }
0x1927   :  { %v6136_v22 = vsub.f32 %v6132_v19, %v6134_v18  ;;  %v6133_v23 = vmul.f32 0.03125, %v6131_v20 }
0x1929   :  { %v6140_v50 = vadd.f32 1e-05, %v6136_v22  ;;  %v6137_v24 = vsub.f32 %v6133_v23, %v6135_v21 }
0x192b   :  { %6955 = vrsqrt.f32 %v6140_v50  ;;  %v6141_v7 = vadd.f32 1e-05, %v6137_v24 }
0x192d   :  { %6957 = vrsqrt.f32 %v6141_v7 }
0x1935   :  { %v6956_v31 = vpop.eup %6955 }
0x1936   :  { %v6144_v37 = vmul.f32 %v6956_v31, %v6138_v30 }
0x1937   :  { %v6958_v49 = vpop.eup %6957 }
0x1938   :  { %v6152_v39 = vmul.f32 %v6425_v1, %v6144_v37  ;;  %v6145_v26 = vmul.f32 %v6958_v49, %v6139_v36 }
0x193a   :  { %v6153_v61 = vmul.f32 %v6425_v1, %v6145_v26  ;;  %v6160_v0 = vadd.f32 %v6426_v28, %v6152_v39 }
0x193c   :  { %v6161_v43 = vadd.f32 %v6426_v28, %v6153_v61 }
0x193e   :  { %v6162_v42 = vpack.c.bf16 %v6161_v43, %v6160_v0 }
0x1940   :  { %6792 = vmatmul.mubr.msk.bf16.vlgmr.msra.gmra.mrb[56].mxu1 %vm418_vm8, %v6162_v42 }
0x1a13   :  { %v6223_v4 = vpop.f32.mrb[56].mxu1 }
0x1a14   :  { %v6224_v2 = vadd.f32 %v6427_v15, %v6223_v4  ;;  %v6793_v47 = vpop.f32.mrb[57].mxu1 }
0x1a15   :  { %v6226_v3 = vpop.f32.mrb[58].mxu1 }
0x1a16   :  { %v6431_v8 = vmul.f32 -1.442695, %v6224_v2  ;;  %v6227_v58 = vadd.f32 %v6427_v15, %v6226_v3  ;;  %v6794_v59 = vpop.f32.mrb[59].mxu1 }
0x1a18   :  { %6959 = vpow2.f32 %v6431_v8  ;;  %v6432_v55 = vmul.f32 -1.442695, %v6227_v58 }
0x1a1a   :  { %6961 = vpow2.f32 %v6432_v55 }
0x1a22   :  { %v6960_v13 = vpop.eup %6959 }
0x1a23   :  { %v6236_v60 = vadd.f32 1.0, %v6960_v13 }
0x1a24   :  { %v6962_v63 = vpop.eup %6961 }
0x1a25   :  { %6963 = vrcp.f32 %v6236_v60  ;;  %v6237_v5 = vadd.f32 1.0, %v6962_v63 }
0x1a27   :  { %6965 = vrcp.f32 %v6237_v5 }
0x1a2f   :  { %v6964_v34 = vpop.eup %6963 }
0x1a30   :  { %6242 = vst [vmem:[#allocation16] sm:$0xff] %v6964_v34 }
0x1a31   :  { %v6966_v32 = vpop.eup %6965 }
0x1a32   :  { %6243 = vst [vmem:[#allocation16 + $0x8] sm:$0xff] %v6966_v32 }
0x1a33   :  { %7154 = shalt.err (!%p7151_p12)
}
0x1a34   :  { %s8496_s1 = sld [smem:[#allocation31_spill]] }
0x1a3a   :  { %s7155_s7 = scalar_lea.hbm %s8496_s1, 256 }
0x1a3b   :  { %p7156_p13 = scmp.ne.s32.totalorder %s8496_s1, %s7155_s7  ;;  %p7159_p0 = scmp.lt.u32.totalorder %s7155_s7, %s8496_s1 }
0x1a3d   :  { %p7161_p1 = pnand %p7159_p0, %p7156_p13 }
0x1a3f   :  { %7164 = shalt.err (!%p7161_p1)
}
0x1a40   :  { %s7201_s4 = smov 128  }
0x1a41   :  { %6255 = dma.vmem_to_hbm [thread:$0]  %s6250_s19, 256, %s8496_s1, [#allocation4], %s7201_s4, %s7201_s4, %s7198_s25  }
0x1a42   :  { %7175 = dma.done.wait [#allocation4], 256  }
0x1a43   :  { %7176 = vsyncadd [#allocation4], 4294967040 }
0x1a44   :  { %6259 = vsyncpa [#allocation3], 1 }
0x1a45   :  { %6260 = vsyncpa [#allocation6], 1 }
0x1a46   :  { %6261 = vsyncpa [#allocation9], 1 }
0x1a47   :  { %6262 = vsyncpa [#allocation12], 1 }
0x1a48   :  { %6263 = vsyncpa [#allocation15], 1 }
0x1a49   :  { %6264 = vsyncpa [#allocation4], 1 }

</bundles_post_ra>
